<compile_context>
chip_gen: v6e
topology: v6e:2x2x1
jax: 0.10.0
libtpu: 0.0.40
codegen_flags: <defaults>
</compile_context>

<pallas_src>
import functools
import math

import jax
import jax.numpy as jnp
import numpy as np
from jax.experimental import pallas as pl
from jax.experimental.pallas import tpu as pltpu


# ---------------------------------------------------------------------------
# Static plan: per-tap weight matrices + 0/1 selection (gather/scatter) matrices
# ---------------------------------------------------------------------------
def _conv_out(h, k, s, p):
    return (h + 2 * p - k) // s + 1


def _deconv_out(h, k, s, p, op):
    return (h - 1) * s - 2 * p + k + op


def _conv_taps_select(hin, win, hout, wout, stride, k, pad):
    # S[t, (hi,wi), (i,j)] = 1  iff  hi = stride*i + kh - pad, wi = stride*j + kw - pad
    S = np.zeros((k * k, hin * win, hout * wout), np.float32)
    for kh in range(k):
        for kw in range(k):
            t = kh * k + kw
            for i in range(hout):
                hi = stride * i + kh - pad
                if not 0 <= hi < hin:
                    continue
                for j in range(wout):
                    wi = stride * j + kw - pad
                    if 0 <= wi < win:
                        S[t, hi * win + wi, i * wout + j] = 1.0
    return S


def _deconv_taps_select(hin, win, hout, wout, stride, k, pad):
    # ConvTranspose: input (i,j) scatters to output (stride*i + kh - pad, stride*j + kw - pad)
    S = np.zeros((k * k, hin * win, hout * wout), np.float32)
    for kh in range(k):
        for kw in range(k):
            t = kh * k + kw
            for i in range(hin):
                io = stride * i + kh - pad
                if not 0 <= io < hout:
                    continue
                for j in range(win):
                    jo = stride * j + kw - pad
                    if 0 <= jo < wout:
                        S[t, i * win + j, io * wout + jo] = 1.0
    return S


def init_params(key, enc_shape, k, Nc):
    """Raw parameters in PyTorch layouts (Conv2d: (O,I,kh,kw), ConvTranspose2d: (I,O,kh,kw))."""
    enc_N = enc_shape[0]
    ks = jax.random.split(key, 12)

    def gdn(kk, c):
        return dict(gamma=0.1 * jnp.eye(c, dtype=jnp.float32)
                    + 0.01 * jax.random.uniform(kk, (c, c), jnp.float32),
                    beta=jnp.ones((c,), jnp.float32),
                    alpha=jnp.float32(0.25))

    def conv_w(kk, ci, co):
        return 0.1 * jax.random.normal(kk, (co, ci, k, k), jnp.float32)

    def deconv_w(kk, ci, co):
        return 0.1 * jax.random.normal(kk, (ci, co, k, k), jnp.float32)

    return dict(
        enc1=dict(w=conv_w(ks[0], 3, Nc), **gdn(ks[6], Nc)),
        enc2=dict(w=conv_w(ks[1], Nc, Nc), **gdn(ks[7], Nc)),
        enc3=dict(w=conv_w(ks[2], Nc, enc_N), **gdn(ks[8], enc_N)),
        dec1=dict(w=deconv_w(ks[3], enc_N, Nc), **gdn(ks[9], Nc)),
        dec2=dict(w=deconv_w(ks[4], Nc, Nc), **gdn(ks[10], Nc)),
        dec3=dict(w=deconv_w(ks[5], Nc, 3), **gdn(ks[11], 3)),
    )


def build_plan(params, H, W, k):
    """One-time (outside the per-step path) prep of all kernel constants."""
    pad = (k - 1) // 2
    layer_defs = [  # (name, kind, stride, output_padding, activation)
        ("enc1", "conv", 2, 0, "prelu"),
        ("enc2", "conv", 2, 0, "prelu"),
        ("enc3", "conv", 1, 0, "prelu"),
        ("dec1", "deconv", 1, 0, "prelu"),
        ("dec2", "deconv", 2, 1, "prelu"),
        ("dec3", "deconv", 2, 1, "sigmoid"),
    ]
    consts, meta = [], []
    h, w = H, W
    for name, kind, s, op, act in layer_defs:
        p = params[name]
        wt = p["w"]
        if kind == "conv":
            co, ci = wt.shape[0], wt.shape[1]
            ho, wo = _conv_out(h, k, s, pad), _conv_out(w, k, s, pad)
            w_taps = jnp.transpose(wt, (2, 3, 0, 1)).reshape(k * k, co, ci)
            s_taps = _conv_taps_select(h, w, ho, wo, s, k, pad)
        else:
            ci, co = wt.shape[0], wt.shape[1]
            ho, wo = _deconv_out(h, k, s, pad, op), _deconv_out(w, k, s, pad, op)
            w_taps = jnp.transpose(wt, (2, 3, 1, 0)).reshape(k * k, co, ci)
            s_taps = _deconv_taps_select(h, w, ho, wo, s, k, pad)
        consts.append(dict(
            w=w_taps.astype(jnp.bfloat16),                       # (9, Cout, Cin)  MXU operand
            s=jnp.asarray(s_taps, jnp.bfloat16),                 # (9, Min,  Mout) 0/1 gather/scatter
            gamma=p["gamma"].astype(jnp.float32),                # (Cout, Cout)
            beta=p["beta"].reshape(co, 1).astype(jnp.float32),   # (Cout, 1)
            alpha=jnp.full((co, 1), p["alpha"], jnp.float32),    # (Cout, 1) PReLU slope
        ))
        meta.append((kind == "deconv", act))                     # (inverse GDN?, activation)
        h, w = ho, wo
    return consts, tuple(meta)


# ---------------------------------------------------------------------------
# Fused kernel: encoder -> Power_norm + AWGN -> decoder, one sample per grid step
# ---------------------------------------------------------------------------
def _fused_kernel(*refs, meta, n_enc, norm_scale, sigma):
    n_layers = len(meta)
    lrefs = refs[:5 * n_layers]
    x_ref = refs[5 * n_layers]
    noise_ref = refs[5 * n_layers + 1]
    o_ref = refs[5 * n_layers + 2]

    def layer(x_bf16, li):
        w_ref, s_ref, g_ref, b_ref, a_ref = lrefs[5 * li:5 * li + 5]
        inverse, act = meta[li]
        n_taps, cout, _ = w_ref.shape
        mout = s_ref.shape[2]
        acc = jnp.zeros((cout, mout), jnp.float32)
        for t in range(n_taps):
            # (Cout,Cin) @ (Cin,Min) on the MXU, f32 accumulation ...
            z = jnp.dot(w_ref[t], x_bf16, preferred_element_type=jnp.float32)
            # ... then route this tap to its output positions via a 0/1 selection
            # matmul (exact in bf16: at most one nonzero per output column).
            acc = acc + jnp.dot(z.astype(jnp.bfloat16), s_ref[t],
                                preferred_element_type=jnp.float32)
        # (I)GDN: tiny Cout x Cout channel-mixing matmul kept in f32.
        q = jnp.dot(g_ref[...], acc * acc, preferred_element_type=jnp.float32) + b_ref[...]
        y = acc * (jnp.sqrt(q) if inverse else jax.lax.rsqrt(q))
        if act == "prelu":
            y = jnp.maximum(y, 0.0) + a_ref[...] * jnp.minimum(y, 0.0)
        else:
            y = jax.nn.sigmoid(y)
        return y

    # ---- encoder -----------------------------------------------------------
    x = x_ref[0].astype(jnp.bfloat16)        # (Cin0, H*W), channel-major per sample
    y = x
    for li in range(n_enc):
        y = layer(x, li)
        x = y.astype(jnp.bfloat16)

    # ---- channel: Power_norm  z <- sqrt(P*z_dim) * z / ||z||_2, then AWGN ---
    z = y                                    # (enc_N, h*w) f32, flatten order == torch NCHW flatten
    ssq = jnp.sum(jnp.sum(z * z, axis=1, keepdims=True), axis=0, keepdims=True)
    z = norm_scale * z * jax.lax.rsqrt(jnp.maximum(ssq, 1e-20)) + sigma * noise_ref[0]
    x = z.astype(jnp.bfloat16)

    # ---- decoder ------------------------------------------------------------
    for li in range(n_enc, n_layers):
        y = layer(x, li)
        x = y.astype(jnp.bfloat16)

    o_ref[0] = y                             # (3, H*W) f32 (post-sigmoid)


@functools.partial(jax.jit, static_argnames=("meta", "snr", "P"))
def deepjscc_forward(consts, x_nchw, noise, *, meta, snr, P=1.0):
    B, C0, H, W = x_nchw.shape
    n_layers = len(meta)
    n_enc = 3
    z_dim = noise.shape[1] * noise.shape[2]
    norm_scale = math.sqrt(P * z_dim)
    sigma = math.sqrt(P / (10.0 ** (float(snr) / 10.0)))

    args, in_specs = [], []

    def const_spec(a):
        if a.ndim == 3:
            return pl.BlockSpec(a.shape, lambda b: (0, 0, 0))   # resident across grid steps
        return pl.BlockSpec(a.shape, lambda b: (0, 0))

    for c in consts:
        for name in ("w", "s", "gamma", "beta", "alpha"):
            args.append(c[name])
            in_specs.append(const_spec(c[name]))

    x_cm = x_nchw.reshape(B, C0, H * W)        # metadata-only reshape (NCHW is already channel-major)
    args += [x_cm, noise]
    in_specs += [
        pl.BlockSpec((1, C0, H * W), lambda b: (b, 0, 0)),
        pl.BlockSpec((1,) + noise.shape[1:], lambda b: (b, 0, 0)),
    ]

    cout_last = consts[-1]["w"].shape[1]
    mout_last = consts[-1]["s"].shape[2]       # == H*W for this architecture
    out_shape = jax.ShapeDtypeStruct((B, cout_last, mout_last), jnp.float32)
    out_spec = pl.BlockSpec((1, cout_last, mout_last), lambda b: (b, 0, 0))

    kern = functools.partial(_fused_kernel, meta=meta, n_enc=n_enc,
                             norm_scale=norm_scale, sigma=sigma)
    y = pl.pallas_call(
        kern,
        out_shape=out_shape,
        grid=(B,),
        in_specs=in_specs,
        out_specs=out_spec,
        compiler_params=pltpu.CompilerParams(dimension_semantics=("parallel",)),
    )(*args)
    return y.reshape(B, cout_last, H, W)


# ---------------------------------------------------------------------------
# Pure-XLA reference (same math, f32) for the in-script correctness check
# ---------------------------------------------------------------------------
_HI = jax.lax.Precision.HIGHEST


def _ref_gdn(x, gamma, beta, inverse):
    q = jnp.einsum("cd,bdhw->bchw", gamma, x * x, precision=_HI) + beta[None, :, None, None]
    return x * jnp.sqrt(q) if inverse else x * jax.lax.rsqrt(q)


def _ref_block(x, p, *, kind, stride, out_pad, act, k, pad):
    if kind == "conv":
        y = jax.lax.conv_general_dilated(
            x, p["w"], (stride, stride), ((pad, pad), (pad, pad)),
            dimension_numbers=("NCHW", "OIHW", "NCHW"), precision=_HI)
    else:
        wf = jnp.transpose(p["w"], (1, 0, 2, 3))[:, :, ::-1, ::-1]
        lo, hi = k - 1 - pad, k - 1 - pad + out_pad
        y = jax.lax.conv_general_dilated(
            x, wf, (1, 1), ((lo, hi), (lo, hi)), lhs_dilation=(stride, stride),
            dimension_numbers=("NCHW", "OIHW", "NCHW"), precision=_HI)
    y = _ref_gdn(y, p["gamma"], p["beta"], inverse=(kind == "deconv"))
    if act == "prelu":
        return jnp.where(y >= 0, y, p["alpha"] * y)
    return jax.nn.sigmoid(y)


def reference_forward(params, x, noise, *, snr, enc_shape, k, P=1.0):
    pad = (k - 1) // 2
    B = x.shape[0]
    y = _ref_block(x, params["enc1"], kind="conv", stride=2, out_pad=0, act="prelu", k=k, pad=pad)
    y = _ref_block(y, params["enc2"], kind="conv", stride=2, out_pad=0, act="prelu", k=k, pad=pad)
    y = _ref_block(y, params["enc3"], kind="conv", stride=1, out_pad=0, act="prelu", k=k, pad=pad)
    z = y.reshape(B, -1)
    z_dim = z.shape[1]
    z = math.sqrt(P * z_dim) * z / jnp.sqrt(jnp.sum(z * z, axis=1, keepdims=True))
    sigma = math.sqrt(P / (10.0 ** (float(snr) / 10.0)))
    z = z + sigma * noise.reshape(B, -1)
    y = z.reshape(B, enc_shape[0], enc_shape[1], enc_shape[2])
    y = _ref_block(y, params["dec1"], kind="deconv", stride=1, out_pad=0, act="prelu", k=k, pad=pad)
    y = _ref_block(y, params["dec2"], kind="deconv", stride=2, out_pad=1, act="prelu", k=k, pad=pad)
    y = _ref_block(y, params["dec3"], kind="deconv", stride=2, out_pad=1, act="sigmoid", k=k, pad=pad)
    return y


# ---------------------------------------------------------------------------
if __name__ == "__main__":
    key = jax.random.PRNGKey(0)
    k_param, k_x, k_noise = jax.random.split(key, 3)

    B, H, W = 2, 16, 16
    Kernel_sz, Nc = 3, 8
    enc_shape = (4, H // 4, W // 4)            # (enc_N, 4, 4) -> z_dim = 64
    snr = 10.0

    params = init_params(k_param, enc_shape, Kernel_sz, Nc)
    consts, meta = build_plan(params, H, W, Kernel_sz)

    x = jax.random.uniform(k_x, (B, 3, H, W), jnp.float32)
    # AWGN noise (unit variance), generated on host so the kernel and the XLA
    # reference see the exact same stream; layout matches the NCHW flatten order.
    noise = jax.random.normal(
        k_noise, (B, enc_shape[0], enc_shape[1] * enc_shape[2]), jnp.float32)

    out = deepjscc_forward(consts, x, noise, meta=meta, snr=snr)
    out = jax.block_until_ready(out)

    assert out.shape == (B, 3, H, W), out.shape
    assert bool(jnp.all(jnp.isfinite(out)))
    assert bool(jnp.all(out >= 0.0)) and bool(jnp.all(out <= 1.0))   # sigmoid output

    # Numerical check of the fused kernel (bf16 MXU operands) against the pure
    # f32 XLA reference (validates conv / ConvTranspose / GDN / channel math).
    ref = jax.block_until_ready(
        reference_forward(params, x, noise, snr=snr, enc_shape=enc_shape, k=Kernel_sz))
    err = float(jnp.max(jnp.abs(out - ref)))
    assert err < 3e-2, f"max |kernel - reference| = {err}"

    print("KERNEL_OK")
</pallas_src>

<mosaic_0001>
module attributes {stable_mosaic.version = 11 : i64} {
  func.func @_fused_kernel(%arg0: i32, %arg1: memref<9x8x3xbf16, #tpu.memory_space<vmem>>, %arg2: memref<9x256x64xbf16, #tpu.memory_space<vmem>>, %arg3: memref<8x8xf32, #tpu.memory_space<vmem>>, %arg4: memref<8x1xf32, #tpu.memory_space<vmem>>, %arg5: memref<8x1xf32, #tpu.memory_space<vmem>>, %arg6: memref<9x8x8xbf16, #tpu.memory_space<vmem>>, %arg7: memref<9x64x16xbf16, #tpu.memory_space<vmem>>, %arg8: memref<8x8xf32, #tpu.memory_space<vmem>>, %arg9: memref<8x1xf32, #tpu.memory_space<vmem>>, %arg10: memref<8x1xf32, #tpu.memory_space<vmem>>, %arg11: memref<9x4x8xbf16, #tpu.memory_space<vmem>>, %arg12: memref<9x16x16xbf16, #tpu.memory_space<vmem>>, %arg13: memref<4x4xf32, #tpu.memory_space<vmem>>, %arg14: memref<4x1xf32, #tpu.memory_space<vmem>>, %arg15: memref<4x1xf32, #tpu.memory_space<vmem>>, %arg16: memref<9x8x4xbf16, #tpu.memory_space<vmem>>, %arg17: memref<9x16x16xbf16, #tpu.memory_space<vmem>>, %arg18: memref<8x8xf32, #tpu.memory_space<vmem>>, %arg19: memref<8x1xf32, #tpu.memory_space<vmem>>, %arg20: memref<8x1xf32, #tpu.memory_space<vmem>>, %arg21: memref<9x8x8xbf16, #tpu.memory_space<vmem>>, %arg22: memref<9x16x64xbf16, #tpu.memory_space<vmem>>, %arg23: memref<8x8xf32, #tpu.memory_space<vmem>>, %arg24: memref<8x1xf32, #tpu.memory_space<vmem>>, %arg25: memref<8x1xf32, #tpu.memory_space<vmem>>, %arg26: memref<9x3x8xbf16, #tpu.memory_space<vmem>>, %arg27: memref<9x64x256xbf16, #tpu.memory_space<vmem>>, %arg28: memref<3x3xf32, #tpu.memory_space<vmem>>, %arg29: memref<3x1xf32, #tpu.memory_space<vmem>>, %arg30: memref<3x1xf32, #tpu.memory_space<vmem>>, %arg31: memref<1x3x256xf32, #tpu.memory_space<vmem>>, %arg32: memref<1x4x16xf32, #tpu.memory_space<vmem>>, %arg33: memref<1x3x256xf32, #tpu.memory_space<vmem>>) attributes {dimension_semantics = [#tpu.dimension_semantics<parallel>], iteration_bounds = array<i64: 2>, scalar_prefetch = 0 : i64, scratch_operands = 0 : i64, tpu.core_type = #tpu.core_type<tc>, window_params = [{pipeline_mode = #tpu.pipeline_mode<synchronous>, transform_indices = @transform_0, window_bounds = array<i64: 9, 8, 3>}, {pipeline_mode = #tpu.pipeline_mode<synchronous>, transform_indices = @transform_1, window_bounds = array<i64: 9, 256, 64>}, {pipeline_mode = #tpu.pipeline_mode<synchronous>, transform_indices = @transform_2, window_bounds = array<i64: 8, 8>}, {pipeline_mode = #tpu.pipeline_mode<synchronous>, transform_indices = @transform_3, window_bounds = array<i64: 8, 1>}, {pipeline_mode = #tpu.pipeline_mode<synchronous>, transform_indices = @transform_4, window_bounds = array<i64: 8, 1>}, {pipeline_mode = #tpu.pipeline_mode<synchronous>, transform_indices = @transform_5, window_bounds = array<i64: 9, 8, 8>}, {pipeline_mode = #tpu.pipeline_mode<synchronous>, transform_indices = @transform_6, window_bounds = array<i64: 9, 64, 16>}, {pipeline_mode = #tpu.pipeline_mode<synchronous>, transform_indices = @transform_7, window_bounds = array<i64: 8, 8>}, {pipeline_mode = #tpu.pipeline_mode<synchronous>, transform_indices = @transform_8, window_bounds = array<i64: 8, 1>}, {pipeline_mode = #tpu.pipeline_mode<synchronous>, transform_indices = @transform_9, window_bounds = array<i64: 8, 1>}, {pipeline_mode = #tpu.pipeline_mode<synchronous>, transform_indices = @transform_10, window_bounds = array<i64: 9, 4, 8>}, {pipeline_mode = #tpu.pipeline_mode<synchronous>, transform_indices = @transform_11, window_bounds = array<i64: 9, 16, 16>}, {pipeline_mode = #tpu.pipeline_mode<synchronous>, transform_indices = @transform_12, window_bounds = array<i64: 4, 4>}, {pipeline_mode = #tpu.pipeline_mode<synchronous>, transform_indices = @transform_13, window_bounds = array<i64: 4, 1>}, {pipeline_mode = #tpu.pipeline_mode<synchronous>, transform_indices = @transform_14, window_bounds = array<i64: 4, 1>}, {pipeline_mode = #tpu.pipeline_mode<synchronous>, transform_indices = @transform_15, window_bounds = array<i64: 9, 8, 4>}, {pipeline_mode = #tpu.pipeline_mode<synchronous>, transform_indices = @transform_16, window_bounds = array<i64: 9, 16, 16>}, {pipeline_mode = #tpu.pipeline_mode<synchronous>, transform_indices = @transform_17, window_bounds = array<i64: 8, 8>}, {pipeline_mode = #tpu.pipeline_mode<synchronous>, transform_indices = @transform_18, window_bounds = array<i64: 8, 1>}, {pipeline_mode = #tpu.pipeline_mode<synchronous>, transform_indices = @transform_19, window_bounds = array<i64: 8, 1>}, {pipeline_mode = #tpu.pipeline_mode<synchronous>, transform_indices = @transform_20, window_bounds = array<i64: 9, 8, 8>}, {pipeline_mode = #tpu.pipeline_mode<synchronous>, transform_indices = @transform_21, window_bounds = array<i64: 9, 16, 64>}, {pipeline_mode = #tpu.pipeline_mode<synchronous>, transform_indices = @transform_22, window_bounds = array<i64: 8, 8>}, {pipeline_mode = #tpu.pipeline_mode<synchronous>, transform_indices = @transform_23, window_bounds = array<i64: 8, 1>}, {pipeline_mode = #tpu.pipeline_mode<synchronous>, transform_indices = @transform_24, window_bounds = array<i64: 8, 1>}, {pipeline_mode = #tpu.pipeline_mode<synchronous>, transform_indices = @transform_25, window_bounds = array<i64: 9, 3, 8>}, {pipeline_mode = #tpu.pipeline_mode<synchronous>, transform_indices = @transform_26, window_bounds = array<i64: 9, 64, 256>}, {pipeline_mode = #tpu.pipeline_mode<synchronous>, transform_indices = @transform_27, window_bounds = array<i64: 3, 3>}, {pipeline_mode = #tpu.pipeline_mode<synchronous>, transform_indices = @transform_28, window_bounds = array<i64: 3, 1>}, {pipeline_mode = #tpu.pipeline_mode<synchronous>, transform_indices = @transform_29, window_bounds = array<i64: 3, 1>}, {transform_indices = @transform_30, window_bounds = array<i64: 1, 3, 256>}, {transform_indices = @transform_31, window_bounds = array<i64: 1, 4, 16>}, {transform_indices = @transform_32, window_bounds = array<i64: 1, 3, 256>}]} {
    %c0 = arith.constant 0 : index
    %c0_0 = arith.constant 0 : index
    %c0_1 = arith.constant 0 : index
    %0 = vector.load %arg31[%c0, %c0_0, %c0_1] : memref<1x3x256xf32, #tpu.memory_space<vmem>>, vector<1x3x256xf32>
    %1 = vector.shape_cast %0 : vector<1x3x256xf32> to vector<3x256xf32>
    %2 = arith.truncf %1 : vector<3x256xf32> to vector<3x256xbf16>
    %cst = arith.constant 0.000000e+00 : f32
    %3 = vector.broadcast %cst : f32 to vector<8x64xf32>
    %c0_2 = arith.constant 0 : index
    %c0_3 = arith.constant 0 : index
    %c0_4 = arith.constant 0 : index
    %4 = vector.load %arg1[%c0_2, %c0_3, %c0_4] : memref<9x8x3xbf16, #tpu.memory_space<vmem>>, vector<1x8x3xbf16>
    %5 = vector.shape_cast %4 : vector<1x8x3xbf16> to vector<8x3xbf16>
    %cst_5 = arith.constant dense<0.000000e+00> : vector<8x256xf32>
    %6 = tpu.matmul %5, %2, %cst_5 {dimension_numbers = #tpu.dot_dimension_numbers<[1], [0], [0], [1], [0, 0, 1, 1], [], []>} : vector<8x3xbf16>, vector<3x256xbf16>, vector<8x256xf32> -> vector<8x256xf32>
    %7 = arith.truncf %6 : vector<8x256xf32> to vector<8x256xbf16>
    %c0_6 = arith.constant 0 : index
    %c0_7 = arith.constant 0 : index
    %c0_8 = arith.constant 0 : index
    %8 = vector.load %arg2[%c0_6, %c0_7, %c0_8] : memref<9x256x64xbf16, #tpu.memory_space<vmem>>, vector<1x256x64xbf16>
    %9 = vector.shape_cast %8 : vector<1x256x64xbf16> to vector<256x64xbf16>
    %cst_9 = arith.constant dense<0.000000e+00> : vector<8x64xf32>
    %10 = tpu.matmul %7, %9, %cst_9 {dimension_numbers = #tpu.dot_dimension_numbers<[1], [0], [0], [1], [0, 0, 1, 1], [], []>} : vector<8x256xbf16>, vector<256x64xbf16>, vector<8x64xf32> -> vector<8x64xf32>
    %11 = arith.addf %3, %10 : vector<8x64xf32>
    %c1 = arith.constant 1 : index
    %c0_10 = arith.constant 0 : index
    %c0_11 = arith.constant 0 : index
    %12 = vector.load %arg1[%c1, %c0_10, %c0_11] : memref<9x8x3xbf16, #tpu.memory_space<vmem>>, vector<1x8x3xbf16>
    %13 = vector.shape_cast %12 : vector<1x8x3xbf16> to vector<8x3xbf16>
    %cst_12 = arith.constant dense<0.000000e+00> : vector<8x256xf32>
    %14 = tpu.matmul %13, %2, %cst_12 {dimension_numbers = #tpu.dot_dimension_numbers<[1], [0], [0], [1], [0, 0, 1, 1], [], []>} : vector<8x3xbf16>, vector<3x256xbf16>, vector<8x256xf32> -> vector<8x256xf32>
    %15 = arith.truncf %14 : vector<8x256xf32> to vector<8x256xbf16>
    %c1_13 = arith.constant 1 : index
    %c0_14 = arith.constant 0 : index
    %c0_15 = arith.constant 0 : index
    %16 = vector.load %arg2[%c1_13, %c0_14, %c0_15] : memref<9x256x64xbf16, #tpu.memory_space<vmem>>, vector<1x256x64xbf16>
    %17 = vector.shape_cast %16 : vector<1x256x64xbf16> to vector<256x64xbf16>
    %cst_16 = arith.constant dense<0.000000e+00> : vector<8x64xf32>
    %18 = tpu.matmul %15, %17, %cst_16 {dimension_numbers = #tpu.dot_dimension_numbers<[1], [0], [0], [1], [0, 0, 1, 1], [], []>} : vector<8x256xbf16>, vector<256x64xbf16>, vector<8x64xf32> -> vector<8x64xf32>
    %19 = arith.addf %11, %18 : vector<8x64xf32>
    %c2 = arith.constant 2 : index
    %c0_17 = arith.constant 0 : index
    %c0_18 = arith.constant 0 : index
    %20 = vector.load %arg1[%c2, %c0_17, %c0_18] : memref<9x8x3xbf16, #tpu.memory_space<vmem>>, vector<1x8x3xbf16>
    %21 = vector.shape_cast %20 : vector<1x8x3xbf16> to vector<8x3xbf16>
    %cst_19 = arith.constant dense<0.000000e+00> : vector<8x256xf32>
    %22 = tpu.matmul %21, %2, %cst_19 {dimension_numbers = #tpu.dot_dimension_numbers<[1], [0], [0], [1], [0, 0, 1, 1], [], []>} : vector<8x3xbf16>, vector<3x256xbf16>, vector<8x256xf32> -> vector<8x256xf32>
    %23 = arith.truncf %22 : vector<8x256xf32> to vector<8x256xbf16>
    %c2_20 = arith.constant 2 : index
    %c0_21 = arith.constant 0 : index
    %c0_22 = arith.constant 0 : index
    %24 = vector.load %arg2[%c2_20, %c0_21, %c0_22] : memref<9x256x64xbf16, #tpu.memory_space<vmem>>, vector<1x256x64xbf16>
    %25 = vector.shape_cast %24 : vector<1x256x64xbf16> to vector<256x64xbf16>
    %cst_23 = arith.constant dense<0.000000e+00> : vector<8x64xf32>
    %26 = tpu.matmul %23, %25, %cst_23 {dimension_numbers = #tpu.dot_dimension_numbers<[1], [0], [0], [1], [0, 0, 1, 1], [], []>} : vector<8x256xbf16>, vector<256x64xbf16>, vector<8x64xf32> -> vector<8x64xf32>
    %27 = arith.addf %19, %26 : vector<8x64xf32>
    %c3 = arith.constant 3 : index
    %c0_24 = arith.constant 0 : index
    %c0_25 = arith.constant 0 : index
    %28 = vector.load %arg1[%c3, %c0_24, %c0_25] : memref<9x8x3xbf16, #tpu.memory_space<vmem>>, vector<1x8x3xbf16>
    %29 = vector.shape_cast %28 : vector<1x8x3xbf16> to vector<8x3xbf16>
    %cst_26 = arith.constant dense<0.000000e+00> : vector<8x256xf32>
    %30 = tpu.matmul %29, %2, %cst_26 {dimension_numbers = #tpu.dot_dimension_numbers<[1], [0], [0], [1], [0, 0, 1, 1], [], []>} : vector<8x3xbf16>, vector<3x256xbf16>, vector<8x256xf32> -> vector<8x256xf32>
    %31 = arith.truncf %30 : vector<8x256xf32> to vector<8x256xbf16>
    %c3_27 = arith.constant 3 : index
    %c0_28 = arith.constant 0 : index
    %c0_29 = arith.constant 0 : index
    %32 = vector.load %arg2[%c3_27, %c0_28, %c0_29] : memref<9x256x64xbf16, #tpu.memory_space<vmem>>, vector<1x256x64xbf16>
    %33 = vector.shape_cast %32 : vector<1x256x64xbf16> to vector<256x64xbf16>
    %cst_30 = arith.constant dense<0.000000e+00> : vector<8x64xf32>
    %34 = tpu.matmul %31, %33, %cst_30 {dimension_numbers = #tpu.dot_dimension_numbers<[1], [0], [0], [1], [0, 0, 1, 1], [], []>} : vector<8x256xbf16>, vector<256x64xbf16>, vector<8x64xf32> -> vector<8x64xf32>
    %35 = arith.addf %27, %34 : vector<8x64xf32>
    %c4 = arith.constant 4 : index
    %c0_31 = arith.constant 0 : index
    %c0_32 = arith.constant 0 : index
    %36 = vector.load %arg1[%c4, %c0_31, %c0_32] : memref<9x8x3xbf16, #tpu.memory_space<vmem>>, vector<1x8x3xbf16>
    %37 = vector.shape_cast %36 : vector<1x8x3xbf16> to vector<8x3xbf16>
    %cst_33 = arith.constant dense<0.000000e+00> : vector<8x256xf32>
    %38 = tpu.matmul %37, %2, %cst_33 {dimension_numbers = #tpu.dot_dimension_numbers<[1], [0], [0], [1], [0, 0, 1, 1], [], []>} : vector<8x3xbf16>, vector<3x256xbf16>, vector<8x256xf32> -> vector<8x256xf32>
    %39 = arith.truncf %38 : vector<8x256xf32> to vector<8x256xbf16>
    %c4_34 = arith.constant 4 : index
    %c0_35 = arith.constant 0 : index
    %c0_36 = arith.constant 0 : index
    %40 = vector.load %arg2[%c4_34, %c0_35, %c0_36] : memref<9x256x64xbf16, #tpu.memory_space<vmem>>, vector<1x256x64xbf16>
    %41 = vector.shape_cast %40 : vector<1x256x64xbf16> to vector<256x64xbf16>
    %cst_37 = arith.constant dense<0.000000e+00> : vector<8x64xf32>
    %42 = tpu.matmul %39, %41, %cst_37 {dimension_numbers = #tpu.dot_dimension_numbers<[1], [0], [0], [1], [0, 0, 1, 1], [], []>} : vector<8x256xbf16>, vector<256x64xbf16>, vector<8x64xf32> -> vector<8x64xf32>
    %43 = arith.addf %35, %42 : vector<8x64xf32>
    %c5 = arith.constant 5 : index
    %c0_38 = arith.constant 0 : index
    %c0_39 = arith.constant 0 : index
    %44 = vector.load %arg1[%c5, %c0_38, %c0_39] : memref<9x8x3xbf16, #tpu.memory_space<vmem>>, vector<1x8x3xbf16>
    %45 = vector.shape_cast %44 : vector<1x8x3xbf16> to vector<8x3xbf16>
    %cst_40 = arith.constant dense<0.000000e+00> : vector<8x256xf32>
    %46 = tpu.matmul %45, %2, %cst_40 {dimension_numbers = #tpu.dot_dimension_numbers<[1], [0], [0], [1], [0, 0, 1, 1], [], []>} : vector<8x3xbf16>, vector<3x256xbf16>, vector<8x256xf32> -> vector<8x256xf32>
    %47 = arith.truncf %46 : vector<8x256xf32> to vector<8x256xbf16>
    %c5_41 = arith.constant 5 : index
    %c0_42 = arith.constant 0 : index
    %c0_43 = arith.constant 0 : index
    %48 = vector.load %arg2[%c5_41, %c0_42, %c0_43] : memref<9x256x64xbf16, #tpu.memory_space<vmem>>, vector<1x256x64xbf16>
    %49 = vector.shape_cast %48 : vector<1x256x64xbf16> to vector<256x64xbf16>
    %cst_44 = arith.constant dense<0.000000e+00> : vector<8x64xf32>
    %50 = tpu.matmul %47, %49, %cst_44 {dimension_numbers = #tpu.dot_dimension_numbers<[1], [0], [0], [1], [0, 0, 1, 1], [], []>} : vector<8x256xbf16>, vector<256x64xbf16>, vector<8x64xf32> -> vector<8x64xf32>
    %51 = arith.addf %43, %50 : vector<8x64xf32>
    %c6 = arith.constant 6 : index
    %c0_45 = arith.constant 0 : index
    %c0_46 = arith.constant 0 : index
    %52 = vector.load %arg1[%c6, %c0_45, %c0_46] : memref<9x8x3xbf16, #tpu.memory_space<vmem>>, vector<1x8x3xbf16>
    %53 = vector.shape_cast %52 : vector<1x8x3xbf16> to vector<8x3xbf16>
    %cst_47 = arith.constant dense<0.000000e+00> : vector<8x256xf32>
    %54 = tpu.matmul %53, %2, %cst_47 {dimension_numbers = #tpu.dot_dimension_numbers<[1], [0], [0], [1], [0, 0, 1, 1], [], []>} : vector<8x3xbf16>, vector<3x256xbf16>, vector<8x256xf32> -> vector<8x256xf32>
    %55 = arith.truncf %54 : vector<8x256xf32> to vector<8x256xbf16>
    %c6_48 = arith.constant 6 : index
    %c0_49 = arith.constant 0 : index
    %c0_50 = arith.constant 0 : index
    %56 = vector.load %arg2[%c6_48, %c0_49, %c0_50] : memref<9x256x64xbf16, #tpu.memory_space<vmem>>, vector<1x256x64xbf16>
    %57 = vector.shape_cast %56 : vector<1x256x64xbf16> to vector<256x64xbf16>
    %cst_51 = arith.constant dense<0.000000e+00> : vector<8x64xf32>
    %58 = tpu.matmul %55, %57, %cst_51 {dimension_numbers = #tpu.dot_dimension_numbers<[1], [0], [0], [1], [0, 0, 1, 1], [], []>} : vector<8x256xbf16>, vector<256x64xbf16>, vector<8x64xf32> -> vector<8x64xf32>
    %59 = arith.addf %51, %58 : vector<8x64xf32>
    %c7 = arith.constant 7 : index
    %c0_52 = arith.constant 0 : index
    %c0_53 = arith.constant 0 : index
    %60 = vector.load %arg1[%c7, %c0_52, %c0_53] : memref<9x8x3xbf16, #tpu.memory_space<vmem>>, vector<1x8x3xbf16>
    %61 = vector.shape_cast %60 : vector<1x8x3xbf16> to vector<8x3xbf16>
    %cst_54 = arith.constant dense<0.000000e+00> : vector<8x256xf32>
    %62 = tpu.matmul %61, %2, %cst_54 {dimension_numbers = #tpu.dot_dimension_numbers<[1], [0], [0], [1], [0, 0, 1, 1], [], []>} : vector<8x3xbf16>, vector<3x256xbf16>, vector<8x256xf32> -> vector<8x256xf32>
    %63 = arith.truncf %62 : vector<8x256xf32> to vector<8x256xbf16>
    %c7_55 = arith.constant 7 : index
    %c0_56 = arith.constant 0 : index
    %c0_57 = arith.constant 0 : index
    %64 = vector.load %arg2[%c7_55, %c0_56, %c0_57] : memref<9x256x64xbf16, #tpu.memory_space<vmem>>, vector<1x256x64xbf16>
    %65 = vector.shape_cast %64 : vector<1x256x64xbf16> to vector<256x64xbf16>
    %cst_58 = arith.constant dense<0.000000e+00> : vector<8x64xf32>
    %66 = tpu.matmul %63, %65, %cst_58 {dimension_numbers = #tpu.dot_dimension_numbers<[1], [0], [0], [1], [0, 0, 1, 1], [], []>} : vector<8x256xbf16>, vector<256x64xbf16>, vector<8x64xf32> -> vector<8x64xf32>
    %67 = arith.addf %59, %66 : vector<8x64xf32>
    %c8 = arith.constant 8 : index
    %c0_59 = arith.constant 0 : index
    %c0_60 = arith.constant 0 : index
    %68 = vector.load %arg1[%c8, %c0_59, %c0_60] : memref<9x8x3xbf16, #tpu.memory_space<vmem>>, vector<1x8x3xbf16>
    %69 = vector.shape_cast %68 : vector<1x8x3xbf16> to vector<8x3xbf16>
    %cst_61 = arith.constant dense<0.000000e+00> : vector<8x256xf32>
    %70 = tpu.matmul %69, %2, %cst_61 {dimension_numbers = #tpu.dot_dimension_numbers<[1], [0], [0], [1], [0, 0, 1, 1], [], []>} : vector<8x3xbf16>, vector<3x256xbf16>, vector<8x256xf32> -> vector<8x256xf32>
    %71 = arith.truncf %70 : vector<8x256xf32> to vector<8x256xbf16>
    %c8_62 = arith.constant 8 : index
    %c0_63 = arith.constant 0 : index
    %c0_64 = arith.constant 0 : index
    %72 = vector.load %arg2[%c8_62, %c0_63, %c0_64] : memref<9x256x64xbf16, #tpu.memory_space<vmem>>, vector<1x256x64xbf16>
    %73 = vector.shape_cast %72 : vector<1x256x64xbf16> to vector<256x64xbf16>
    %cst_65 = arith.constant dense<0.000000e+00> : vector<8x64xf32>
    %74 = tpu.matmul %71, %73, %cst_65 {dimension_numbers = #tpu.dot_dimension_numbers<[1], [0], [0], [1], [0, 0, 1, 1], [], []>} : vector<8x256xbf16>, vector<256x64xbf16>, vector<8x64xf32> -> vector<8x64xf32>
    %75 = arith.addf %67, %74 : vector<8x64xf32>
    %c0_66 = arith.constant 0 : index
    %c0_67 = arith.constant 0 : index
    %76 = vector.load %arg3[%c0_66, %c0_67] : memref<8x8xf32, #tpu.memory_space<vmem>>, vector<8x8xf32>
    %77 = arith.mulf %75, %75 : vector<8x64xf32>
    %cst_68 = arith.constant dense<0.000000e+00> : vector<8x64xf32>
    %78 = tpu.matmul %76, %77, %cst_68 {dimension_numbers = #tpu.dot_dimension_numbers<[1], [0], [0], [1], [0, 0, 1, 1], [], []>} : vector<8x8xf32>, vector<8x64xf32>, vector<8x64xf32> -> vector<8x64xf32>
    %c0_69 = arith.constant 0 : index
    %c0_70 = arith.constant 0 : index
    %79 = vector.load %arg4[%c0_69, %c0_70] : memref<8x1xf32, #tpu.memory_space<vmem>>, vector<8x1xf32>
    %80 = vector.broadcast %79 : vector<8x1xf32> to vector<8x64xf32>
    %81 = arith.addf %78, %80 : vector<8x64xf32>
    %82 = math.rsqrt %81 : vector<8x64xf32>
    %83 = arith.mulf %75, %82 : vector<8x64xf32>
    %cst_71 = arith.constant 0.000000e+00 : f32
    %84 = vector.broadcast %cst_71 : f32 to vector<8x64xf32>
    %85 = arith.maximumf %83, %84 : vector<8x64xf32>
    %c0_72 = arith.constant 0 : index
    %c0_73 = arith.constant 0 : index
    %86 = vector.load %arg5[%c0_72, %c0_73] : memref<8x1xf32, #tpu.memory_space<vmem>>, vector<8x1xf32>
    %cst_74 = arith.constant 0.000000e+00 : f32
    %87 = vector.broadcast %cst_74 : f32 to vector<8x64xf32>
    %88 = arith.minimumf %83, %87 : vector<8x64xf32>
    %89 = vector.broadcast %86 : vector<8x1xf32> to vector<8x64xf32>
    %90 = arith.mulf %89, %88 : vector<8x64xf32>
    %91 = arith.addf %85, %90 : vector<8x64xf32>
    %92 = arith.truncf %91 : vector<8x64xf32> to vector<8x64xbf16>
    %cst_75 = arith.constant 0.000000e+00 : f32
    %93 = vector.broadcast %cst_75 : f32 to vector<8x16xf32>
    %c0_76 = arith.constant 0 : index
    %c0_77 = arith.constant 0 : index
    %c0_78 = arith.constant 0 : index
    %94 = vector.load %arg6[%c0_76, %c0_77, %c0_78] : memref<9x8x8xbf16, #tpu.memory_space<vmem>>, vector<1x8x8xbf16>
    %95 = vector.shape_cast %94 : vector<1x8x8xbf16> to vector<8x8xbf16>
    %cst_79 = arith.constant dense<0.000000e+00> : vector<8x64xf32>
    %96 = tpu.matmul %95, %92, %cst_79 {dimension_numbers = #tpu.dot_dimension_numbers<[1], [0], [0], [1], [0, 0, 1, 1], [], []>} : vector<8x8xbf16>, vector<8x64xbf16>, vector<8x64xf32> -> vector<8x64xf32>
    %97 = arith.truncf %96 : vector<8x64xf32> to vector<8x64xbf16>
    %c0_80 = arith.constant 0 : index
    %c0_81 = arith.constant 0 : index
    %c0_82 = arith.constant 0 : index
    %98 = vector.load %arg7[%c0_80, %c0_81, %c0_82] : memref<9x64x16xbf16, #tpu.memory_space<vmem>>, vector<1x64x16xbf16>
    %99 = vector.shape_cast %98 : vector<1x64x16xbf16> to vector<64x16xbf16>
    %cst_83 = arith.constant dense<0.000000e+00> : vector<8x16xf32>
    %100 = tpu.matmul %97, %99, %cst_83 {dimension_numbers = #tpu.dot_dimension_numbers<[1], [0], [0], [1], [0, 0, 1, 1], [], []>} : vector<8x64xbf16>, vector<64x16xbf16>, vector<8x16xf32> -> vector<8x16xf32>
    %101 = arith.addf %93, %100 : vector<8x16xf32>
    %c1_84 = arith.constant 1 : index
    %c0_85 = arith.constant 0 : index
    %c0_86 = arith.constant 0 : index
    %102 = vector.load %arg6[%c1_84, %c0_85, %c0_86] : memref<9x8x8xbf16, #tpu.memory_space<vmem>>, vector<1x8x8xbf16>
    %103 = vector.shape_cast %102 : vector<1x8x8xbf16> to vector<8x8xbf16>
    %cst_87 = arith.constant dense<0.000000e+00> : vector<8x64xf32>
    %104 = tpu.matmul %103, %92, %cst_87 {dimension_numbers = #tpu.dot_dimension_numbers<[1], [0], [0], [1], [0, 0, 1, 1], [], []>} : vector<8x8xbf16>, vector<8x64xbf16>, vector<8x64xf32> -> vector<8x64xf32>
    %105 = arith.truncf %104 : vector<8x64xf32> to vector<8x64xbf16>
    %c1_88 = arith.constant 1 : index
    %c0_89 = arith.constant 0 : index
    %c0_90 = arith.constant 0 : index
    %106 = vector.load %arg7[%c1_88, %c0_89, %c0_90] : memref<9x64x16xbf16, #tpu.memory_space<vmem>>, vector<1x64x16xbf16>
    %107 = vector.shape_cast %106 : vector<1x64x16xbf16> to vector<64x16xbf16>
    %cst_91 = arith.constant dense<0.000000e+00> : vector<8x16xf32>
    %108 = tpu.matmul %105, %107, %cst_91 {dimension_numbers = #tpu.dot_dimension_numbers<[1], [0], [0], [1], [0, 0, 1, 1], [], []>} : vector<8x64xbf16>, vector<64x16xbf16>, vector<8x16xf32> -> vector<8x16xf32>
    %109 = arith.addf %101, %108 : vector<8x16xf32>
    %c2_92 = arith.constant 2 : index
    %c0_93 = arith.constant 0 : index
    %c0_94 = arith.constant 0 : index
    %110 = vector.load %arg6[%c2_92, %c0_93, %c0_94] : memref<9x8x8xbf16, #tpu.memory_space<vmem>>, vector<1x8x8xbf16>
    %111 = vector.shape_cast %110 : vector<1x8x8xbf16> to vector<8x8xbf16>
    %cst_95 = arith.constant dense<0.000000e+00> : vector<8x64xf32>
    %112 = tpu.matmul %111, %92, %cst_95 {dimension_numbers = #tpu.dot_dimension_numbers<[1], [0], [0], [1], [0, 0, 1, 1], [], []>} : vector<8x8xbf16>, vector<8x64xbf16>, vector<8x64xf32> -> vector<8x64xf32>
    %113 = arith.truncf %112 : vector<8x64xf32> to vector<8x64xbf16>
    %c2_96 = arith.constant 2 : index
    %c0_97 = arith.constant 0 : index
    %c0_98 = arith.constant 0 : index
    %114 = vector.load %arg7[%c2_96, %c0_97, %c0_98] : memref<9x64x16xbf16, #tpu.memory_space<vmem>>, vector<1x64x16xbf16>
    %115 = vector.shape_cast %114 : vector<1x64x16xbf16> to vector<64x16xbf16>
    %cst_99 = arith.constant dense<0.000000e+00> : vector<8x16xf32>
    %116 = tpu.matmul %113, %115, %cst_99 {dimension_numbers = #tpu.dot_dimension_numbers<[1], [0], [0], [1], [0, 0, 1, 1], [], []>} : vector<8x64xbf16>, vector<64x16xbf16>, vector<8x16xf32> -> vector<8x16xf32>
    %117 = arith.addf %109, %116 : vector<8x16xf32>
    %c3_100 = arith.constant 3 : index
    %c0_101 = arith.constant 0 : index
    %c0_102 = arith.constant 0 : index
    %118 = vector.load %arg6[%c3_100, %c0_101, %c0_102] : memref<9x8x8xbf16, #tpu.memory_space<vmem>>, vector<1x8x8xbf16>
    %119 = vector.shape_cast %118 : vector<1x8x8xbf16> to vector<8x8xbf16>
    %cst_103 = arith.constant dense<0.000000e+00> : vector<8x64xf32>
    %120 = tpu.matmul %119, %92, %cst_103 {dimension_numbers = #tpu.dot_dimension_numbers<[1], [0], [0], [1], [0, 0, 1, 1], [], []>} : vector<8x8xbf16>, vector<8x64xbf16>, vector<8x64xf32> -> vector<8x64xf32>
    %121 = arith.truncf %120 : vector<8x64xf32> to vector<8x64xbf16>
    %c3_104 = arith.constant 3 : index
    %c0_105 = arith.constant 0 : index
    %c0_106 = arith.constant 0 : index
    %122 = vector.load %arg7[%c3_104, %c0_105, %c0_106] : memref<9x64x16xbf16, #tpu.memory_space<vmem>>, vector<1x64x16xbf16>
    %123 = vector.shape_cast %122 : vector<1x64x16xbf16> to vector<64x16xbf16>
    %cst_107 = arith.constant dense<0.000000e+00> : vector<8x16xf32>
    %124 = tpu.matmul %121, %123, %cst_107 {dimension_numbers = #tpu.dot_dimension_numbers<[1], [0], [0], [1], [0, 0, 1, 1], [], []>} : vector<8x64xbf16>, vector<64x16xbf16>, vector<8x16xf32> -> vector<8x16xf32>
    %125 = arith.addf %117, %124 : vector<8x16xf32>
    %c4_108 = arith.constant 4 : index
    %c0_109 = arith.constant 0 : index
    %c0_110 = arith.constant 0 : index
    %126 = vector.load %arg6[%c4_108, %c0_109, %c0_110] : memref<9x8x8xbf16, #tpu.memory_space<vmem>>, vector<1x8x8xbf16>
    %127 = vector.shape_cast %126 : vector<1x8x8xbf16> to vector<8x8xbf16>
    %cst_111 = arith.constant dense<0.000000e+00> : vector<8x64xf32>
    %128 = tpu.matmul %127, %92, %cst_111 {dimension_numbers = #tpu.dot_dimension_numbers<[1], [0], [0], [1], [0, 0, 1, 1], [], []>} : vector<8x8xbf16>, vector<8x64xbf16>, vector<8x64xf32> -> vector<8x64xf32>
    %129 = arith.truncf %128 : vector<8x64xf32> to vector<8x64xbf16>
    %c4_112 = arith.constant 4 : index
    %c0_113 = arith.constant 0 : index
    %c0_114 = arith.constant 0 : index
    %130 = vector.load %arg7[%c4_112, %c0_113, %c0_114] : memref<9x64x16xbf16, #tpu.memory_space<vmem>>, vector<1x64x16xbf16>
    %131 = vector.shape_cast %130 : vector<1x64x16xbf16> to vector<64x16xbf16>
    %cst_115 = arith.constant dense<0.000000e+00> : vector<8x16xf32>
    %132 = tpu.matmul %129, %131, %cst_115 {dimension_numbers = #tpu.dot_dimension_numbers<[1], [0], [0], [1], [0, 0, 1, 1], [], []>} : vector<8x64xbf16>, vector<64x16xbf16>, vector<8x16xf32> -> vector<8x16xf32>
    %133 = arith.addf %125, %132 : vector<8x16xf32>
    %c5_116 = arith.constant 5 : index
    %c0_117 = arith.constant 0 : index
    %c0_118 = arith.constant 0 : index
    %134 = vector.load %arg6[%c5_116, %c0_117, %c0_118] : memref<9x8x8xbf16, #tpu.memory_space<vmem>>, vector<1x8x8xbf16>
    %135 = vector.shape_cast %134 : vector<1x8x8xbf16> to vector<8x8xbf16>
    %cst_119 = arith.constant dense<0.000000e+00> : vector<8x64xf32>
    %136 = tpu.matmul %135, %92, %cst_119 {dimension_numbers = #tpu.dot_dimension_numbers<[1], [0], [0], [1], [0, 0, 1, 1], [], []>} : vector<8x8xbf16>, vector<8x64xbf16>, vector<8x64xf32> -> vector<8x64xf32>
    %137 = arith.truncf %136 : vector<8x64xf32> to vector<8x64xbf16>
    %c5_120 = arith.constant 5 : index
    %c0_121 = arith.constant 0 : index
    %c0_122 = arith.constant 0 : index
    %138 = vector.load %arg7[%c5_120, %c0_121, %c0_122] : memref<9x64x16xbf16, #tpu.memory_space<vmem>>, vector<1x64x16xbf16>
    %139 = vector.shape_cast %138 : vector<1x64x16xbf16> to vector<64x16xbf16>
    %cst_123 = arith.constant dense<0.000000e+00> : vector<8x16xf32>
    %140 = tpu.matmul %137, %139, %cst_123 {dimension_numbers = #tpu.dot_dimension_numbers<[1], [0], [0], [1], [0, 0, 1, 1], [], []>} : vector<8x64xbf16>, vector<64x16xbf16>, vector<8x16xf32> -> vector<8x16xf32>
    %141 = arith.addf %133, %140 : vector<8x16xf32>
    %c6_124 = arith.constant 6 : index
    %c0_125 = arith.constant 0 : index
    %c0_126 = arith.constant 0 : index
    %142 = vector.load %arg6[%c6_124, %c0_125, %c0_126] : memref<9x8x8xbf16, #tpu.memory_space<vmem>>, vector<1x8x8xbf16>
    %143 = vector.shape_cast %142 : vector<1x8x8xbf16> to vector<8x8xbf16>
    %cst_127 = arith.constant dense<0.000000e+00> : vector<8x64xf32>
    %144 = tpu.matmul %143, %92, %cst_127 {dimension_numbers = #tpu.dot_dimension_numbers<[1], [0], [0], [1], [0, 0, 1, 1], [], []>} : vector<8x8xbf16>, vector<8x64xbf16>, vector<8x64xf32> -> vector<8x64xf32>
    %145 = arith.truncf %144 : vector<8x64xf32> to vector<8x64xbf16>
    %c6_128 = arith.constant 6 : index
    %c0_129 = arith.constant 0 : index
    %c0_130 = arith.constant 0 : index
    %146 = vector.load %arg7[%c6_128, %c0_129, %c0_130] : memref<9x64x16xbf16, #tpu.memory_space<vmem>>, vector<1x64x16xbf16>
    %147 = vector.shape_cast %146 : vector<1x64x16xbf16> to vector<64x16xbf16>
    %cst_131 = arith.constant dense<0.000000e+00> : vector<8x16xf32>
    %148 = tpu.matmul %145, %147, %cst_131 {dimension_numbers = #tpu.dot_dimension_numbers<[1], [0], [0], [1], [0, 0, 1, 1], [], []>} : vector<8x64xbf16>, vector<64x16xbf16>, vector<8x16xf32> -> vector<8x16xf32>
    %149 = arith.addf %141, %148 : vector<8x16xf32>
    %c7_132 = arith.constant 7 : index
    %c0_133 = arith.constant 0 : index
    %c0_134 = arith.constant 0 : index
    %150 = vector.load %arg6[%c7_132, %c0_133, %c0_134] : memref<9x8x8xbf16, #tpu.memory_space<vmem>>, vector<1x8x8xbf16>
    %151 = vector.shape_cast %150 : vector<1x8x8xbf16> to vector<8x8xbf16>
    %cst_135 = arith.constant dense<0.000000e+00> : vector<8x64xf32>
    %152 = tpu.matmul %151, %92, %cst_135 {dimension_numbers = #tpu.dot_dimension_numbers<[1], [0], [0], [1], [0, 0, 1, 1], [], []>} : vector<8x8xbf16>, vector<8x64xbf16>, vector<8x64xf32> -> vector<8x64xf32>
    %153 = arith.truncf %152 : vector<8x64xf32> to vector<8x64xbf16>
    %c7_136 = arith.constant 7 : index
    %c0_137 = arith.constant 0 : index
    %c0_138 = arith.constant 0 : index
    %154 = vector.load %arg7[%c7_136, %c0_137, %c0_138] : memref<9x64x16xbf16, #tpu.memory_space<vmem>>, vector<1x64x16xbf16>
    %155 = vector.shape_cast %154 : vector<1x64x16xbf16> to vector<64x16xbf16>
    %cst_139 = arith.constant dense<0.000000e+00> : vector<8x16xf32>
    %156 = tpu.matmul %153, %155, %cst_139 {dimension_numbers = #tpu.dot_dimension_numbers<[1], [0], [0], [1], [0, 0, 1, 1], [], []>} : vector<8x64xbf16>, vector<64x16xbf16>, vector<8x16xf32> -> vector<8x16xf32>
    %157 = arith.addf %149, %156 : vector<8x16xf32>
    %c8_140 = arith.constant 8 : index
    %c0_141 = arith.constant 0 : index
    %c0_142 = arith.constant 0 : index
    %158 = vector.load %arg6[%c8_140, %c0_141, %c0_142] : memref<9x8x8xbf16, #tpu.memory_space<vmem>>, vector<1x8x8xbf16>
    %159 = vector.shape_cast %158 : vector<1x8x8xbf16> to vector<8x8xbf16>
    %cst_143 = arith.constant dense<0.000000e+00> : vector<8x64xf32>
    %160 = tpu.matmul %159, %92, %cst_143 {dimension_numbers = #tpu.dot_dimension_numbers<[1], [0], [0], [1], [0, 0, 1, 1], [], []>} : vector<8x8xbf16>, vector<8x64xbf16>, vector<8x64xf32> -> vector<8x64xf32>
    %161 = arith.truncf %160 : vector<8x64xf32> to vector<8x64xbf16>
    %c8_144 = arith.constant 8 : index
    %c0_145 = arith.constant 0 : index
    %c0_146 = arith.constant 0 : index
    %162 = vector.load %arg7[%c8_144, %c0_145, %c0_146] : memref<9x64x16xbf16, #tpu.memory_space<vmem>>, vector<1x64x16xbf16>
    %163 = vector.shape_cast %162 : vector<1x64x16xbf16> to vector<64x16xbf16>
    %cst_147 = arith.constant dense<0.000000e+00> : vector<8x16xf32>
    %164 = tpu.matmul %161, %163, %cst_147 {dimension_numbers = #tpu.dot_dimension_numbers<[1], [0], [0], [1], [0, 0, 1, 1], [], []>} : vector<8x64xbf16>, vector<64x16xbf16>, vector<8x16xf32> -> vector<8x16xf32>
    %165 = arith.addf %157, %164 : vector<8x16xf32>
    %c0_148 = arith.constant 0 : index
    %c0_149 = arith.constant 0 : index
    %166 = vector.load %arg8[%c0_148, %c0_149] : memref<8x8xf32, #tpu.memory_space<vmem>>, vector<8x8xf32>
    %167 = arith.mulf %165, %165 : vector<8x16xf32>
    %cst_150 = arith.constant dense<0.000000e+00> : vector<8x16xf32>
    %168 = tpu.matmul %166, %167, %cst_150 {dimension_numbers = #tpu.dot_dimension_numbers<[1], [0], [0], [1], [0, 0, 1, 1], [], []>} : vector<8x8xf32>, vector<8x16xf32>, vector<8x16xf32> -> vector<8x16xf32>
    %c0_151 = arith.constant 0 : index
    %c0_152 = arith.constant 0 : index
    %169 = vector.load %arg9[%c0_151, %c0_152] : memref<8x1xf32, #tpu.memory_space<vmem>>, vector<8x1xf32>
    %170 = vector.broadcast %169 : vector<8x1xf32> to vector<8x16xf32>
    %171 = arith.addf %168, %170 : vector<8x16xf32>
    %172 = math.rsqrt %171 : vector<8x16xf32>
    %173 = arith.mulf %165, %172 : vector<8x16xf32>
    %cst_153 = arith.constant 0.000000e+00 : f32
    %174 = vector.broadcast %cst_153 : f32 to vector<8x16xf32>
    %175 = arith.maximumf %173, %174 : vector<8x16xf32>
    %c0_154 = arith.constant 0 : index
    %c0_155 = arith.constant 0 : index
    %176 = vector.load %arg10[%c0_154, %c0_155] : memref<8x1xf32, #tpu.memory_space<vmem>>, vector<8x1xf32>
    %cst_156 = arith.constant 0.000000e+00 : f32
    %177 = vector.broadcast %cst_156 : f32 to vector<8x16xf32>
    %178 = arith.minimumf %173, %177 : vector<8x16xf32>
    %179 = vector.broadcast %176 : vector<8x1xf32> to vector<8x16xf32>
    %180 = arith.mulf %179, %178 : vector<8x16xf32>
    %181 = arith.addf %175, %180 : vector<8x16xf32>
    %182 = arith.truncf %181 : vector<8x16xf32> to vector<8x16xbf16>
    %cst_157 = arith.constant 0.000000e+00 : f32
    %183 = vector.broadcast %cst_157 : f32 to vector<4x16xf32>
    %c0_158 = arith.constant 0 : index
    %c0_159 = arith.constant 0 : index
    %c0_160 = arith.constant 0 : index
    %184 = vector.load %arg11[%c0_158, %c0_159, %c0_160] : memref<9x4x8xbf16, #tpu.memory_space<vmem>>, vector<1x4x8xbf16>
    %185 = vector.shape_cast %184 : vector<1x4x8xbf16> to vector<4x8xbf16>
    %cst_161 = arith.constant dense<0.000000e+00> : vector<4x16xf32>
    %186 = tpu.matmul %185, %182, %cst_161 {dimension_numbers = #tpu.dot_dimension_numbers<[1], [0], [0], [1], [0, 0, 1, 1], [], []>} : vector<4x8xbf16>, vector<8x16xbf16>, vector<4x16xf32> -> vector<4x16xf32>
    %187 = arith.truncf %186 : vector<4x16xf32> to vector<4x16xbf16>
    %c0_162 = arith.constant 0 : index
    %c0_163 = arith.constant 0 : index
    %c0_164 = arith.constant 0 : index
    %188 = vector.load %arg12[%c0_162, %c0_163, %c0_164] : memref<9x16x16xbf16, #tpu.memory_space<vmem>>, vector<1x16x16xbf16>
    %189 = vector.shape_cast %188 : vector<1x16x16xbf16> to vector<16x16xbf16>
    %cst_165 = arith.constant dense<0.000000e+00> : vector<4x16xf32>
    %190 = tpu.matmul %187, %189, %cst_165 {dimension_numbers = #tpu.dot_dimension_numbers<[1], [0], [0], [1], [0, 0, 1, 1], [], []>} : vector<4x16xbf16>, vector<16x16xbf16>, vector<4x16xf32> -> vector<4x16xf32>
    %191 = arith.addf %183, %190 : vector<4x16xf32>
    %c1_166 = arith.constant 1 : index
    %c0_167 = arith.constant 0 : index
    %c0_168 = arith.constant 0 : index
    %192 = vector.load %arg11[%c1_166, %c0_167, %c0_168] : memref<9x4x8xbf16, #tpu.memory_space<vmem>>, vector<1x4x8xbf16>
    %193 = vector.shape_cast %192 : vector<1x4x8xbf16> to vector<4x8xbf16>
    %cst_169 = arith.constant dense<0.000000e+00> : vector<4x16xf32>
    %194 = tpu.matmul %193, %182, %cst_169 {dimension_numbers = #tpu.dot_dimension_numbers<[1], [0], [0], [1], [0, 0, 1, 1], [], []>} : vector<4x8xbf16>, vector<8x16xbf16>, vector<4x16xf32> -> vector<4x16xf32>
    %195 = arith.truncf %194 : vector<4x16xf32> to vector<4x16xbf16>
    %c1_170 = arith.constant 1 : index
    %c0_171 = arith.constant 0 : index
    %c0_172 = arith.constant 0 : index
    %196 = vector.load %arg12[%c1_170, %c0_171, %c0_172] : memref<9x16x16xbf16, #tpu.memory_space<vmem>>, vector<1x16x16xbf16>
    %197 = vector.shape_cast %196 : vector<1x16x16xbf16> to vector<16x16xbf16>
    %cst_173 = arith.constant dense<0.000000e+00> : vector<4x16xf32>
    %198 = tpu.matmul %195, %197, %cst_173 {dimension_numbers = #tpu.dot_dimension_numbers<[1], [0], [0], [1], [0, 0, 1, 1], [], []>} : vector<4x16xbf16>, vector<16x16xbf16>, vector<4x16xf32> -> vector<4x16xf32>
    %199 = arith.addf %191, %198 : vector<4x16xf32>
    %c2_174 = arith.constant 2 : index
    %c0_175 = arith.constant 0 : index
    %c0_176 = arith.constant 0 : index
    %200 = vector.load %arg11[%c2_174, %c0_175, %c0_176] : memref<9x4x8xbf16, #tpu.memory_space<vmem>>, vector<1x4x8xbf16>
    %201 = vector.shape_cast %200 : vector<1x4x8xbf16> to vector<4x8xbf16>
    %cst_177 = arith.constant dense<0.000000e+00> : vector<4x16xf32>
    %202 = tpu.matmul %201, %182, %cst_177 {dimension_numbers = #tpu.dot_dimension_numbers<[1], [0], [0], [1], [0, 0, 1, 1], [], []>} : vector<4x8xbf16>, vector<8x16xbf16>, vector<4x16xf32> -> vector<4x16xf32>
    %203 = arith.truncf %202 : vector<4x16xf32> to vector<4x16xbf16>
    %c2_178 = arith.constant 2 : index
    %c0_179 = arith.constant 0 : index
    %c0_180 = arith.constant 0 : index
    %204 = vector.load %arg12[%c2_178, %c0_179, %c0_180] : memref<9x16x16xbf16, #tpu.memory_space<vmem>>, vector<1x16x16xbf16>
    %205 = vector.shape_cast %204 : vector<1x16x16xbf16> to vector<16x16xbf16>
    %cst_181 = arith.constant dense<0.000000e+00> : vector<4x16xf32>
    %206 = tpu.matmul %203, %205, %cst_181 {dimension_numbers = #tpu.dot_dimension_numbers<[1], [0], [0], [1], [0, 0, 1, 1], [], []>} : vector<4x16xbf16>, vector<16x16xbf16>, vector<4x16xf32> -> vector<4x16xf32>
    %207 = arith.addf %199, %206 : vector<4x16xf32>
    %c3_182 = arith.constant 3 : index
    %c0_183 = arith.constant 0 : index
    %c0_184 = arith.constant 0 : index
    %208 = vector.load %arg11[%c3_182, %c0_183, %c0_184] : memref<9x4x8xbf16, #tpu.memory_space<vmem>>, vector<1x4x8xbf16>
    %209 = vector.shape_cast %208 : vector<1x4x8xbf16> to vector<4x8xbf16>
    %cst_185 = arith.constant dense<0.000000e+00> : vector<4x16xf32>
    %210 = tpu.matmul %209, %182, %cst_185 {dimension_numbers = #tpu.dot_dimension_numbers<[1], [0], [0], [1], [0, 0, 1, 1], [], []>} : vector<4x8xbf16>, vector<8x16xbf16>, vector<4x16xf32> -> vector<4x16xf32>
    %211 = arith.truncf %210 : vector<4x16xf32> to vector<4x16xbf16>
    %c3_186 = arith.constant 3 : index
    %c0_187 = arith.constant 0 : index
    %c0_188 = arith.constant 0 : index
    %212 = vector.load %arg12[%c3_186, %c0_187, %c0_188] : memref<9x16x16xbf16, #tpu.memory_space<vmem>>, vector<1x16x16xbf16>
    %213 = vector.shape_cast %212 : vector<1x16x16xbf16> to vector<16x16xbf16>
    %cst_189 = arith.constant dense<0.000000e+00> : vector<4x16xf32>
    %214 = tpu.matmul %211, %213, %cst_189 {dimension_numbers = #tpu.dot_dimension_numbers<[1], [0], [0], [1], [0, 0, 1, 1], [], []>} : vector<4x16xbf16>, vector<16x16xbf16>, vector<4x16xf32> -> vector<4x16xf32>
    %215 = arith.addf %207, %214 : vector<4x16xf32>
    %c4_190 = arith.constant 4 : index
    %c0_191 = arith.constant 0 : index
    %c0_192 = arith.constant 0 : index
    %216 = vector.load %arg11[%c4_190, %c0_191, %c0_192] : memref<9x4x8xbf16, #tpu.memory_space<vmem>>, vector<1x4x8xbf16>
    %217 = vector.shape_cast %216 : vector<1x4x8xbf16> to vector<4x8xbf16>
    %cst_193 = arith.constant dense<0.000000e+00> : vector<4x16xf32>
    %218 = tpu.matmul %217, %182, %cst_193 {dimension_numbers = #tpu.dot_dimension_numbers<[1], [0], [0], [1], [0, 0, 1, 1], [], []>} : vector<4x8xbf16>, vector<8x16xbf16>, vector<4x16xf32> -> vector<4x16xf32>
    %219 = arith.truncf %218 : vector<4x16xf32> to vector<4x16xbf16>
    %c4_194 = arith.constant 4 : index
    %c0_195 = arith.constant 0 : index
    %c0_196 = arith.constant 0 : index
    %220 = vector.load %arg12[%c4_194, %c0_195, %c0_196] : memref<9x16x16xbf16, #tpu.memory_space<vmem>>, vector<1x16x16xbf16>
    %221 = vector.shape_cast %220 : vector<1x16x16xbf16> to vector<16x16xbf16>
    %cst_197 = arith.constant dense<0.000000e+00> : vector<4x16xf32>
    %222 = tpu.matmul %219, %221, %cst_197 {dimension_numbers = #tpu.dot_dimension_numbers<[1], [0], [0], [1], [0, 0, 1, 1], [], []>} : vector<4x16xbf16>, vector<16x16xbf16>, vector<4x16xf32> -> vector<4x16xf32>
    %223 = arith.addf %215, %222 : vector<4x16xf32>
    %c5_198 = arith.constant 5 : index
    %c0_199 = arith.constant 0 : index
    %c0_200 = arith.constant 0 : index
    %224 = vector.load %arg11[%c5_198, %c0_199, %c0_200] : memref<9x4x8xbf16, #tpu.memory_space<vmem>>, vector<1x4x8xbf16>
    %225 = vector.shape_cast %224 : vector<1x4x8xbf16> to vector<4x8xbf16>
    %cst_201 = arith.constant dense<0.000000e+00> : vector<4x16xf32>
    %226 = tpu.matmul %225, %182, %cst_201 {dimension_numbers = #tpu.dot_dimension_numbers<[1], [0], [0], [1], [0, 0, 1, 1], [], []>} : vector<4x8xbf16>, vector<8x16xbf16>, vector<4x16xf32> -> vector<4x16xf32>
    %227 = arith.truncf %226 : vector<4x16xf32> to vector<4x16xbf16>
    %c5_202 = arith.constant 5 : index
    %c0_203 = arith.constant 0 : index
    %c0_204 = arith.constant 0 : index
    %228 = vector.load %arg12[%c5_202, %c0_203, %c0_204] : memref<9x16x16xbf16, #tpu.memory_space<vmem>>, vector<1x16x16xbf16>
    %229 = vector.shape_cast %228 : vector<1x16x16xbf16> to vector<16x16xbf16>
    %cst_205 = arith.constant dense<0.000000e+00> : vector<4x16xf32>
    %230 = tpu.matmul %227, %229, %cst_205 {dimension_numbers = #tpu.dot_dimension_numbers<[1], [0], [0], [1], [0, 0, 1, 1], [], []>} : vector<4x16xbf16>, vector<16x16xbf16>, vector<4x16xf32> -> vector<4x16xf32>
    %231 = arith.addf %223, %230 : vector<4x16xf32>
    %c6_206 = arith.constant 6 : index
    %c0_207 = arith.constant 0 : index
    %c0_208 = arith.constant 0 : index
    %232 = vector.load %arg11[%c6_206, %c0_207, %c0_208] : memref<9x4x8xbf16, #tpu.memory_space<vmem>>, vector<1x4x8xbf16>
    %233 = vector.shape_cast %232 : vector<1x4x8xbf16> to vector<4x8xbf16>
    %cst_209 = arith.constant dense<0.000000e+00> : vector<4x16xf32>
    %234 = tpu.matmul %233, %182, %cst_209 {dimension_numbers = #tpu.dot_dimension_numbers<[1], [0], [0], [1], [0, 0, 1, 1], [], []>} : vector<4x8xbf16>, vector<8x16xbf16>, vector<4x16xf32> -> vector<4x16xf32>
    %235 = arith.truncf %234 : vector<4x16xf32> to vector<4x16xbf16>
    %c6_210 = arith.constant 6 : index
    %c0_211 = arith.constant 0 : index
    %c0_212 = arith.constant 0 : index
    %236 = vector.load %arg12[%c6_210, %c0_211, %c0_212] : memref<9x16x16xbf16, #tpu.memory_space<vmem>>, vector<1x16x16xbf16>
    %237 = vector.shape_cast %236 : vector<1x16x16xbf16> to vector<16x16xbf16>
    %cst_213 = arith.constant dense<0.000000e+00> : vector<4x16xf32>
    %238 = tpu.matmul %235, %237, %cst_213 {dimension_numbers = #tpu.dot_dimension_numbers<[1], [0], [0], [1], [0, 0, 1, 1], [], []>} : vector<4x16xbf16>, vector<16x16xbf16>, vector<4x16xf32> -> vector<4x16xf32>
    %239 = arith.addf %231, %238 : vector<4x16xf32>
    %c7_214 = arith.constant 7 : index
    %c0_215 = arith.constant 0 : index
    %c0_216 = arith.constant 0 : index
    %240 = vector.load %arg11[%c7_214, %c0_215, %c0_216] : memref<9x4x8xbf16, #tpu.memory_space<vmem>>, vector<1x4x8xbf16>
    %241 = vector.shape_cast %240 : vector<1x4x8xbf16> to vector<4x8xbf16>
    %cst_217 = arith.constant dense<0.000000e+00> : vector<4x16xf32>
    %242 = tpu.matmul %241, %182, %cst_217 {dimension_numbers = #tpu.dot_dimension_numbers<[1], [0], [0], [1], [0, 0, 1, 1], [], []>} : vector<4x8xbf16>, vector<8x16xbf16>, vector<4x16xf32> -> vector<4x16xf32>
    %243 = arith.truncf %242 : vector<4x16xf32> to vector<4x16xbf16>
    %c7_218 = arith.constant 7 : index
    %c0_219 = arith.constant 0 : index
    %c0_220 = arith.constant 0 : index
    %244 = vector.load %arg12[%c7_218, %c0_219, %c0_220] : memref<9x16x16xbf16, #tpu.memory_space<vmem>>, vector<1x16x16xbf16>
    %245 = vector.shape_cast %244 : vector<1x16x16xbf16> to vector<16x16xbf16>
    %cst_221 = arith.constant dense<0.000000e+00> : vector<4x16xf32>
    %246 = tpu.matmul %243, %245, %cst_221 {dimension_numbers = #tpu.dot_dimension_numbers<[1], [0], [0], [1], [0, 0, 1, 1], [], []>} : vector<4x16xbf16>, vector<16x16xbf16>, vector<4x16xf32> -> vector<4x16xf32>
    %247 = arith.addf %239, %246 : vector<4x16xf32>
    %c8_222 = arith.constant 8 : index
    %c0_223 = arith.constant 0 : index
    %c0_224 = arith.constant 0 : index
    %248 = vector.load %arg11[%c8_222, %c0_223, %c0_224] : memref<9x4x8xbf16, #tpu.memory_space<vmem>>, vector<1x4x8xbf16>
    %249 = vector.shape_cast %248 : vector<1x4x8xbf16> to vector<4x8xbf16>
    %cst_225 = arith.constant dense<0.000000e+00> : vector<4x16xf32>
    %250 = tpu.matmul %249, %182, %cst_225 {dimension_numbers = #tpu.dot_dimension_numbers<[1], [0], [0], [1], [0, 0, 1, 1], [], []>} : vector<4x8xbf16>, vector<8x16xbf16>, vector<4x16xf32> -> vector<4x16xf32>
    %251 = arith.truncf %250 : vector<4x16xf32> to vector<4x16xbf16>
    %c8_226 = arith.constant 8 : index
    %c0_227 = arith.constant 0 : index
    %c0_228 = arith.constant 0 : index
    %252 = vector.load %arg12[%c8_226, %c0_227, %c0_228] : memref<9x16x16xbf16, #tpu.memory_space<vmem>>, vector<1x16x16xbf16>
    %253 = vector.shape_cast %252 : vector<1x16x16xbf16> to vector<16x16xbf16>
    %cst_229 = arith.constant dense<0.000000e+00> : vector<4x16xf32>
    %254 = tpu.matmul %251, %253, %cst_229 {dimension_numbers = #tpu.dot_dimension_numbers<[1], [0], [0], [1], [0, 0, 1, 1], [], []>} : vector<4x16xbf16>, vector<16x16xbf16>, vector<4x16xf32> -> vector<4x16xf32>
    %255 = arith.addf %247, %254 : vector<4x16xf32>
    %c0_230 = arith.constant 0 : index
    %c0_231 = arith.constant 0 : index
    %256 = vector.load %arg13[%c0_230, %c0_231] : memref<4x4xf32, #tpu.memory_space<vmem>>, vector<4x4xf32>
    %257 = arith.mulf %255, %255 : vector<4x16xf32>
    %cst_232 = arith.constant dense<0.000000e+00> : vector<4x16xf32>
    %258 = tpu.matmul %256, %257, %cst_232 {dimension_numbers = #tpu.dot_dimension_numbers<[1], [0], [0], [1], [0, 0, 1, 1], [], []>} : vector<4x4xf32>, vector<4x16xf32>, vector<4x16xf32> -> vector<4x16xf32>
    %c0_233 = arith.constant 0 : index
    %c0_234 = arith.constant 0 : index
    %259 = vector.load %arg14[%c0_233, %c0_234] : memref<4x1xf32, #tpu.memory_space<vmem>>, vector<4x1xf32>
    %260 = vector.broadcast %259 : vector<4x1xf32> to vector<4x16xf32>
    %261 = arith.addf %258, %260 : vector<4x16xf32>
    %262 = math.rsqrt %261 : vector<4x16xf32>
    %263 = arith.mulf %255, %262 : vector<4x16xf32>
    %cst_235 = arith.constant 0.000000e+00 : f32
    %264 = vector.broadcast %cst_235 : f32 to vector<4x16xf32>
    %265 = arith.maximumf %263, %264 : vector<4x16xf32>
    %c0_236 = arith.constant 0 : index
    %c0_237 = arith.constant 0 : index
    %266 = vector.load %arg15[%c0_236, %c0_237] : memref<4x1xf32, #tpu.memory_space<vmem>>, vector<4x1xf32>
    %cst_238 = arith.constant 0.000000e+00 : f32
    %267 = vector.broadcast %cst_238 : f32 to vector<4x16xf32>
    %268 = arith.minimumf %263, %267 : vector<4x16xf32>
    %269 = vector.broadcast %266 : vector<4x1xf32> to vector<4x16xf32>
    %270 = arith.mulf %269, %268 : vector<4x16xf32>
    %271 = arith.addf %265, %270 : vector<4x16xf32>
    %272 = arith.mulf %271, %271 : vector<4x16xf32>
    %cst_239 = arith.constant dense<0.000000e+00> : vector<4xf32>
    %273 = vector.multi_reduction <add>, %272, %cst_239 [1] : vector<4x16xf32> to vector<4xf32>
    %274 = vector.shape_cast %273 : vector<4xf32> to vector<4x1xf32>
    %cst_240 = arith.constant dense<0.000000e+00> : vector<1xf32>
    %275 = vector.multi_reduction <add>, %274, %cst_240 [0] : vector<4x1xf32> to vector<1xf32>
    %276 = vector.shape_cast %275 : vector<1xf32> to vector<1x1xf32>
    %cst_241 = arith.constant 8.000000e+00 : f32
    %277 = vector.broadcast %cst_241 : f32 to vector<4x16xf32>
    %278 = arith.mulf %277, %271 : vector<4x16xf32>
    %cst_242 = arith.constant 9.99999968E-21 : f32
    %279 = vector.broadcast %cst_242 : f32 to vector<1x1xf32>
    %280 = arith.maximumf %276, %279 : vector<1x1xf32>
    %281 = math.rsqrt %280 : vector<1x1xf32>
    %282 = vector.broadcast %281 : vector<1x1xf32> to vector<4x16xf32>
    %283 = arith.mulf %278, %282 : vector<4x16xf32>
    %c0_243 = arith.constant 0 : index
    %c0_244 = arith.constant 0 : index
    %c0_245 = arith.constant 0 : index
    %284 = vector.load %arg32[%c0_243, %c0_244, %c0_245] : memref<1x4x16xf32, #tpu.memory_space<vmem>>, vector<1x4x16xf32>
    %285 = vector.shape_cast %284 : vector<1x4x16xf32> to vector<4x16xf32>
    %cst_246 = arith.constant 0.316227764 : f32
    %286 = vector.broadcast %cst_246 : f32 to vector<4x16xf32>
    %287 = arith.mulf %286, %285 : vector<4x16xf32>
    %288 = arith.addf %283, %287 : vector<4x16xf32>
    %289 = arith.truncf %288 : vector<4x16xf32> to vector<4x16xbf16>
    %cst_247 = arith.constant 0.000000e+00 : f32
    %290 = vector.broadcast %cst_247 : f32 to vector<8x16xf32>
    %c0_248 = arith.constant 0 : index
    %c0_249 = arith.constant 0 : index
    %c0_250 = arith.constant 0 : index
    %291 = vector.load %arg16[%c0_248, %c0_249, %c0_250] : memref<9x8x4xbf16, #tpu.memory_space<vmem>>, vector<1x8x4xbf16>
    %292 = vector.shape_cast %291 : vector<1x8x4xbf16> to vector<8x4xbf16>
    %cst_251 = arith.constant dense<0.000000e+00> : vector<8x16xf32>
    %293 = tpu.matmul %292, %289, %cst_251 {dimension_numbers = #tpu.dot_dimension_numbers<[1], [0], [0], [1], [0, 0, 1, 1], [], []>} : vector<8x4xbf16>, vector<4x16xbf16>, vector<8x16xf32> -> vector<8x16xf32>
    %294 = arith.truncf %293 : vector<8x16xf32> to vector<8x16xbf16>
    %c0_252 = arith.constant 0 : index
    %c0_253 = arith.constant 0 : index
    %c0_254 = arith.constant 0 : index
    %295 = vector.load %arg17[%c0_252, %c0_253, %c0_254] : memref<9x16x16xbf16, #tpu.memory_space<vmem>>, vector<1x16x16xbf16>
    %296 = vector.shape_cast %295 : vector<1x16x16xbf16> to vector<16x16xbf16>
    %cst_255 = arith.constant dense<0.000000e+00> : vector<8x16xf32>
    %297 = tpu.matmul %294, %296, %cst_255 {dimension_numbers = #tpu.dot_dimension_numbers<[1], [0], [0], [1], [0, 0, 1, 1], [], []>} : vector<8x16xbf16>, vector<16x16xbf16>, vector<8x16xf32> -> vector<8x16xf32>
    %298 = arith.addf %290, %297 : vector<8x16xf32>
    %c1_256 = arith.constant 1 : index
    %c0_257 = arith.constant 0 : index
    %c0_258 = arith.constant 0 : index
    %299 = vector.load %arg16[%c1_256, %c0_257, %c0_258] : memref<9x8x4xbf16, #tpu.memory_space<vmem>>, vector<1x8x4xbf16>
    %300 = vector.shape_cast %299 : vector<1x8x4xbf16> to vector<8x4xbf16>
    %cst_259 = arith.constant dense<0.000000e+00> : vector<8x16xf32>
    %301 = tpu.matmul %300, %289, %cst_259 {dimension_numbers = #tpu.dot_dimension_numbers<[1], [0], [0], [1], [0, 0, 1, 1], [], []>} : vector<8x4xbf16>, vector<4x16xbf16>, vector<8x16xf32> -> vector<8x16xf32>
    %302 = arith.truncf %301 : vector<8x16xf32> to vector<8x16xbf16>
    %c1_260 = arith.constant 1 : index
    %c0_261 = arith.constant 0 : index
    %c0_262 = arith.constant 0 : index
    %303 = vector.load %arg17[%c1_260, %c0_261, %c0_262] : memref<9x16x16xbf16, #tpu.memory_space<vmem>>, vector<1x16x16xbf16>
    %304 = vector.shape_cast %303 : vector<1x16x16xbf16> to vector<16x16xbf16>
    %cst_263 = arith.constant dense<0.000000e+00> : vector<8x16xf32>
    %305 = tpu.matmul %302, %304, %cst_263 {dimension_numbers = #tpu.dot_dimension_numbers<[1], [0], [0], [1], [0, 0, 1, 1], [], []>} : vector<8x16xbf16>, vector<16x16xbf16>, vector<8x16xf32> -> vector<8x16xf32>
    %306 = arith.addf %298, %305 : vector<8x16xf32>
    %c2_264 = arith.constant 2 : index
    %c0_265 = arith.constant 0 : index
    %c0_266 = arith.constant 0 : index
    %307 = vector.load %arg16[%c2_264, %c0_265, %c0_266] : memref<9x8x4xbf16, #tpu.memory_space<vmem>>, vector<1x8x4xbf16>
    %308 = vector.shape_cast %307 : vector<1x8x4xbf16> to vector<8x4xbf16>
    %cst_267 = arith.constant dense<0.000000e+00> : vector<8x16xf32>
    %309 = tpu.matmul %308, %289, %cst_267 {dimension_numbers = #tpu.dot_dimension_numbers<[1], [0], [0], [1], [0, 0, 1, 1], [], []>} : vector<8x4xbf16>, vector<4x16xbf16>, vector<8x16xf32> -> vector<8x16xf32>
    %310 = arith.truncf %309 : vector<8x16xf32> to vector<8x16xbf16>
    %c2_268 = arith.constant 2 : index
    %c0_269 = arith.constant 0 : index
    %c0_270 = arith.constant 0 : index
    %311 = vector.load %arg17[%c2_268, %c0_269, %c0_270] : memref<9x16x16xbf16, #tpu.memory_space<vmem>>, vector<1x16x16xbf16>
    %312 = vector.shape_cast %311 : vector<1x16x16xbf16> to vector<16x16xbf16>
    %cst_271 = arith.constant dense<0.000000e+00> : vector<8x16xf32>
    %313 = tpu.matmul %310, %312, %cst_271 {dimension_numbers = #tpu.dot_dimension_numbers<[1], [0], [0], [1], [0, 0, 1, 1], [], []>} : vector<8x16xbf16>, vector<16x16xbf16>, vector<8x16xf32> -> vector<8x16xf32>
    %314 = arith.addf %306, %313 : vector<8x16xf32>
    %c3_272 = arith.constant 3 : index
    %c0_273 = arith.constant 0 : index
    %c0_274 = arith.constant 0 : index
    %315 = vector.load %arg16[%c3_272, %c0_273, %c0_274] : memref<9x8x4xbf16, #tpu.memory_space<vmem>>, vector<1x8x4xbf16>
    %316 = vector.shape_cast %315 : vector<1x8x4xbf16> to vector<8x4xbf16>
    %cst_275 = arith.constant dense<0.000000e+00> : vector<8x16xf32>
    %317 = tpu.matmul %316, %289, %cst_275 {dimension_numbers = #tpu.dot_dimension_numbers<[1], [0], [0], [1], [0, 0, 1, 1], [], []>} : vector<8x4xbf16>, vector<4x16xbf16>, vector<8x16xf32> -> vector<8x16xf32>
    %318 = arith.truncf %317 : vector<8x16xf32> to vector<8x16xbf16>
    %c3_276 = arith.constant 3 : index
    %c0_277 = arith.constant 0 : index
    %c0_278 = arith.constant 0 : index
    %319 = vector.load %arg17[%c3_276, %c0_277, %c0_278] : memref<9x16x16xbf16, #tpu.memory_space<vmem>>, vector<1x16x16xbf16>
    %320 = vector.shape_cast %319 : vector<1x16x16xbf16> to vector<16x16xbf16>
    %cst_279 = arith.constant dense<0.000000e+00> : vector<8x16xf32>
    %321 = tpu.matmul %318, %320, %cst_279 {dimension_numbers = #tpu.dot_dimension_numbers<[1], [0], [0], [1], [0, 0, 1, 1], [], []>} : vector<8x16xbf16>, vector<16x16xbf16>, vector<8x16xf32> -> vector<8x16xf32>
    %322 = arith.addf %314, %321 : vector<8x16xf32>
    %c4_280 = arith.constant 4 : index
    %c0_281 = arith.constant 0 : index
    %c0_282 = arith.constant 0 : index
    %323 = vector.load %arg16[%c4_280, %c0_281, %c0_282] : memref<9x8x4xbf16, #tpu.memory_space<vmem>>, vector<1x8x4xbf16>
    %324 = vector.shape_cast %323 : vector<1x8x4xbf16> to vector<8x4xbf16>
    %cst_283 = arith.constant dense<0.000000e+00> : vector<8x16xf32>
    %325 = tpu.matmul %324, %289, %cst_283 {dimension_numbers = #tpu.dot_dimension_numbers<[1], [0], [0], [1], [0, 0, 1, 1], [], []>} : vector<8x4xbf16>, vector<4x16xbf16>, vector<8x16xf32> -> vector<8x16xf32>
    %326 = arith.truncf %325 : vector<8x16xf32> to vector<8x16xbf16>
    %c4_284 = arith.constant 4 : index
    %c0_285 = arith.constant 0 : index
    %c0_286 = arith.constant 0 : index
    %327 = vector.load %arg17[%c4_284, %c0_285, %c0_286] : memref<9x16x16xbf16, #tpu.memory_space<vmem>>, vector<1x16x16xbf16>
    %328 = vector.shape_cast %327 : vector<1x16x16xbf16> to vector<16x16xbf16>
    %cst_287 = arith.constant dense<0.000000e+00> : vector<8x16xf32>
    %329 = tpu.matmul %326, %328, %cst_287 {dimension_numbers = #tpu.dot_dimension_numbers<[1], [0], [0], [1], [0, 0, 1, 1], [], []>} : vector<8x16xbf16>, vector<16x16xbf16>, vector<8x16xf32> -> vector<8x16xf32>
    %330 = arith.addf %322, %329 : vector<8x16xf32>
    %c5_288 = arith.constant 5 : index
    %c0_289 = arith.constant 0 : index
    %c0_290 = arith.constant 0 : index
    %331 = vector.load %arg16[%c5_288, %c0_289, %c0_290] : memref<9x8x4xbf16, #tpu.memory_space<vmem>>, vector<1x8x4xbf16>
    %332 = vector.shape_cast %331 : vector<1x8x4xbf16> to vector<8x4xbf16>
    %cst_291 = arith.constant dense<0.000000e+00> : vector<8x16xf32>
    %333 = tpu.matmul %332, %289, %cst_291 {dimension_numbers = #tpu.dot_dimension_numbers<[1], [0], [0], [1], [0, 0, 1, 1], [], []>} : vector<8x4xbf16>, vector<4x16xbf16>, vector<8x16xf32> -> vector<8x16xf32>
    %334 = arith.truncf %333 : vector<8x16xf32> to vector<8x16xbf16>
    %c5_292 = arith.constant 5 : index
    %c0_293 = arith.constant 0 : index
    %c0_294 = arith.constant 0 : index
    %335 = vector.load %arg17[%c5_292, %c0_293, %c0_294] : memref<9x16x16xbf16, #tpu.memory_space<vmem>>, vector<1x16x16xbf16>
    %336 = vector.shape_cast %335 : vector<1x16x16xbf16> to vector<16x16xbf16>
    %cst_295 = arith.constant dense<0.000000e+00> : vector<8x16xf32>
    %337 = tpu.matmul %334, %336, %cst_295 {dimension_numbers = #tpu.dot_dimension_numbers<[1], [0], [0], [1], [0, 0, 1, 1], [], []>} : vector<8x16xbf16>, vector<16x16xbf16>, vector<8x16xf32> -> vector<8x16xf32>
    %338 = arith.addf %330, %337 : vector<8x16xf32>
    %c6_296 = arith.constant 6 : index
    %c0_297 = arith.constant 0 : index
    %c0_298 = arith.constant 0 : index
    %339 = vector.load %arg16[%c6_296, %c0_297, %c0_298] : memref<9x8x4xbf16, #tpu.memory_space<vmem>>, vector<1x8x4xbf16>
    %340 = vector.shape_cast %339 : vector<1x8x4xbf16> to vector<8x4xbf16>
    %cst_299 = arith.constant dense<0.000000e+00> : vector<8x16xf32>
    %341 = tpu.matmul %340, %289, %cst_299 {dimension_numbers = #tpu.dot_dimension_numbers<[1], [0], [0], [1], [0, 0, 1, 1], [], []>} : vector<8x4xbf16>, vector<4x16xbf16>, vector<8x16xf32> -> vector<8x16xf32>
    %342 = arith.truncf %341 : vector<8x16xf32> to vector<8x16xbf16>
    %c6_300 = arith.constant 6 : index
    %c0_301 = arith.constant 0 : index
    %c0_302 = arith.constant 0 : index
    %343 = vector.load %arg17[%c6_300, %c0_301, %c0_302] : memref<9x16x16xbf16, #tpu.memory_space<vmem>>, vector<1x16x16xbf16>
    %344 = vector.shape_cast %343 : vector<1x16x16xbf16> to vector<16x16xbf16>
    %cst_303 = arith.constant dense<0.000000e+00> : vector<8x16xf32>
    %345 = tpu.matmul %342, %344, %cst_303 {dimension_numbers = #tpu.dot_dimension_numbers<[1], [0], [0], [1], [0, 0, 1, 1], [], []>} : vector<8x16xbf16>, vector<16x16xbf16>, vector<8x16xf32> -> vector<8x16xf32>
    %346 = arith.addf %338, %345 : vector<8x16xf32>
    %c7_304 = arith.constant 7 : index
    %c0_305 = arith.constant 0 : index
    %c0_306 = arith.constant 0 : index
    %347 = vector.load %arg16[%c7_304, %c0_305, %c0_306] : memref<9x8x4xbf16, #tpu.memory_space<vmem>>, vector<1x8x4xbf16>
    %348 = vector.shape_cast %347 : vector<1x8x4xbf16> to vector<8x4xbf16>
    %cst_307 = arith.constant dense<0.000000e+00> : vector<8x16xf32>
    %349 = tpu.matmul %348, %289, %cst_307 {dimension_numbers = #tpu.dot_dimension_numbers<[1], [0], [0], [1], [0, 0, 1, 1], [], []>} : vector<8x4xbf16>, vector<4x16xbf16>, vector<8x16xf32> -> vector<8x16xf32>
    %350 = arith.truncf %349 : vector<8x16xf32> to vector<8x16xbf16>
    %c7_308 = arith.constant 7 : index
    %c0_309 = arith.constant 0 : index
    %c0_310 = arith.constant 0 : index
    %351 = vector.load %arg17[%c7_308, %c0_309, %c0_310] : memref<9x16x16xbf16, #tpu.memory_space<vmem>>, vector<1x16x16xbf16>
    %352 = vector.shape_cast %351 : vector<1x16x16xbf16> to vector<16x16xbf16>
    %cst_311 = arith.constant dense<0.000000e+00> : vector<8x16xf32>
    %353 = tpu.matmul %350, %352, %cst_311 {dimension_numbers = #tpu.dot_dimension_numbers<[1], [0], [0], [1], [0, 0, 1, 1], [], []>} : vector<8x16xbf16>, vector<16x16xbf16>, vector<8x16xf32> -> vector<8x16xf32>
    %354 = arith.addf %346, %353 : vector<8x16xf32>
    %c8_312 = arith.constant 8 : index
    %c0_313 = arith.constant 0 : index
    %c0_314 = arith.constant 0 : index
    %355 = vector.load %arg16[%c8_312, %c0_313, %c0_314] : memref<9x8x4xbf16, #tpu.memory_space<vmem>>, vector<1x8x4xbf16>
    %356 = vector.shape_cast %355 : vector<1x8x4xbf16> to vector<8x4xbf16>
    %cst_315 = arith.constant dense<0.000000e+00> : vector<8x16xf32>
    %357 = tpu.matmul %356, %289, %cst_315 {dimension_numbers = #tpu.dot_dimension_numbers<[1], [0], [0], [1], [0, 0, 1, 1], [], []>} : vector<8x4xbf16>, vector<4x16xbf16>, vector<8x16xf32> -> vector<8x16xf32>
    %358 = arith.truncf %357 : vector<8x16xf32> to vector<8x16xbf16>
    %c8_316 = arith.constant 8 : index
    %c0_317 = arith.constant 0 : index
    %c0_318 = arith.constant 0 : index
    %359 = vector.load %arg17[%c8_316, %c0_317, %c0_318] : memref<9x16x16xbf16, #tpu.memory_space<vmem>>, vector<1x16x16xbf16>
    %360 = vector.shape_cast %359 : vector<1x16x16xbf16> to vector<16x16xbf16>
    %cst_319 = arith.constant dense<0.000000e+00> : vector<8x16xf32>
    %361 = tpu.matmul %358, %360, %cst_319 {dimension_numbers = #tpu.dot_dimension_numbers<[1], [0], [0], [1], [0, 0, 1, 1], [], []>} : vector<8x16xbf16>, vector<16x16xbf16>, vector<8x16xf32> -> vector<8x16xf32>
    %362 = arith.addf %354, %361 : vector<8x16xf32>
    %c0_320 = arith.constant 0 : index
    %c0_321 = arith.constant 0 : index
    %363 = vector.load %arg18[%c0_320, %c0_321] : memref<8x8xf32, #tpu.memory_space<vmem>>, vector<8x8xf32>
    %364 = arith.mulf %362, %362 : vector<8x16xf32>
    %cst_322 = arith.constant dense<0.000000e+00> : vector<8x16xf32>
    %365 = tpu.matmul %363, %364, %cst_322 {dimension_numbers = #tpu.dot_dimension_numbers<[1], [0], [0], [1], [0, 0, 1, 1], [], []>} : vector<8x8xf32>, vector<8x16xf32>, vector<8x16xf32> -> vector<8x16xf32>
    %c0_323 = arith.constant 0 : index
    %c0_324 = arith.constant 0 : index
    %366 = vector.load %arg19[%c0_323, %c0_324] : memref<8x1xf32, #tpu.memory_space<vmem>>, vector<8x1xf32>
    %367 = vector.broadcast %366 : vector<8x1xf32> to vector<8x16xf32>
    %368 = arith.addf %365, %367 : vector<8x16xf32>
    %369 = math.sqrt %368 : vector<8x16xf32>
    %370 = arith.mulf %362, %369 : vector<8x16xf32>
    %cst_325 = arith.constant 0.000000e+00 : f32
    %371 = vector.broadcast %cst_325 : f32 to vector<8x16xf32>
    %372 = arith.maximumf %370, %371 : vector<8x16xf32>
    %c0_326 = arith.constant 0 : index
    %c0_327 = arith.constant 0 : index
    %373 = vector.load %arg20[%c0_326, %c0_327] : memref<8x1xf32, #tpu.memory_space<vmem>>, vector<8x1xf32>
    %cst_328 = arith.constant 0.000000e+00 : f32
    %374 = vector.broadcast %cst_328 : f32 to vector<8x16xf32>
    %375 = arith.minimumf %370, %374 : vector<8x16xf32>
    %376 = vector.broadcast %373 : vector<8x1xf32> to vector<8x16xf32>
    %377 = arith.mulf %376, %375 : vector<8x16xf32>
    %378 = arith.addf %372, %377 : vector<8x16xf32>
    %379 = arith.truncf %378 : vector<8x16xf32> to vector<8x16xbf16>
    %cst_329 = arith.constant 0.000000e+00 : f32
    %380 = vector.broadcast %cst_329 : f32 to vector<8x64xf32>
    %c0_330 = arith.constant 0 : index
    %c0_331 = arith.constant 0 : index
    %c0_332 = arith.constant 0 : index
    %381 = vector.load %arg21[%c0_330, %c0_331, %c0_332] : memref<9x8x8xbf16, #tpu.memory_space<vmem>>, vector<1x8x8xbf16>
    %382 = vector.shape_cast %381 : vector<1x8x8xbf16> to vector<8x8xbf16>
    %cst_333 = arith.constant dense<0.000000e+00> : vector<8x16xf32>
    %383 = tpu.matmul %382, %379, %cst_333 {dimension_numbers = #tpu.dot_dimension_numbers<[1], [0], [0], [1], [0, 0, 1, 1], [], []>} : vector<8x8xbf16>, vector<8x16xbf16>, vector<8x16xf32> -> vector<8x16xf32>
    %384 = arith.truncf %383 : vector<8x16xf32> to vector<8x16xbf16>
    %c0_334 = arith.constant 0 : index
    %c0_335 = arith.constant 0 : index
    %c0_336 = arith.constant 0 : index
    %385 = vector.load %arg22[%c0_334, %c0_335, %c0_336] : memref<9x16x64xbf16, #tpu.memory_space<vmem>>, vector<1x16x64xbf16>
    %386 = vector.shape_cast %385 : vector<1x16x64xbf16> to vector<16x64xbf16>
    %cst_337 = arith.constant dense<0.000000e+00> : vector<8x64xf32>
    %387 = tpu.matmul %384, %386, %cst_337 {dimension_numbers = #tpu.dot_dimension_numbers<[1], [0], [0], [1], [0, 0, 1, 1], [], []>} : vector<8x16xbf16>, vector<16x64xbf16>, vector<8x64xf32> -> vector<8x64xf32>
    %388 = arith.addf %380, %387 : vector<8x64xf32>
    %c1_338 = arith.constant 1 : index
    %c0_339 = arith.constant 0 : index
    %c0_340 = arith.constant 0 : index
    %389 = vector.load %arg21[%c1_338, %c0_339, %c0_340] : memref<9x8x8xbf16, #tpu.memory_space<vmem>>, vector<1x8x8xbf16>
    %390 = vector.shape_cast %389 : vector<1x8x8xbf16> to vector<8x8xbf16>
    %cst_341 = arith.constant dense<0.000000e+00> : vector<8x16xf32>
    %391 = tpu.matmul %390, %379, %cst_341 {dimension_numbers = #tpu.dot_dimension_numbers<[1], [0], [0], [1], [0, 0, 1, 1], [], []>} : vector<8x8xbf16>, vector<8x16xbf16>, vector<8x16xf32> -> vector<8x16xf32>
    %392 = arith.truncf %391 : vector<8x16xf32> to vector<8x16xbf16>
    %c1_342 = arith.constant 1 : index
    %c0_343 = arith.constant 0 : index
    %c0_344 = arith.constant 0 : index
    %393 = vector.load %arg22[%c1_342, %c0_343, %c0_344] : memref<9x16x64xbf16, #tpu.memory_space<vmem>>, vector<1x16x64xbf16>
    %394 = vector.shape_cast %393 : vector<1x16x64xbf16> to vector<16x64xbf16>
    %cst_345 = arith.constant dense<0.000000e+00> : vector<8x64xf32>
    %395 = tpu.matmul %392, %394, %cst_345 {dimension_numbers = #tpu.dot_dimension_numbers<[1], [0], [0], [1], [0, 0, 1, 1], [], []>} : vector<8x16xbf16>, vector<16x64xbf16>, vector<8x64xf32> -> vector<8x64xf32>
    %396 = arith.addf %388, %395 : vector<8x64xf32>
    %c2_346 = arith.constant 2 : index
    %c0_347 = arith.constant 0 : index
    %c0_348 = arith.constant 0 : index
    %397 = vector.load %arg21[%c2_346, %c0_347, %c0_348] : memref<9x8x8xbf16, #tpu.memory_space<vmem>>, vector<1x8x8xbf16>
    %398 = vector.shape_cast %397 : vector<1x8x8xbf16> to vector<8x8xbf16>
    %cst_349 = arith.constant dense<0.000000e+00> : vector<8x16xf32>
    %399 = tpu.matmul %398, %379, %cst_349 {dimension_numbers = #tpu.dot_dimension_numbers<[1], [0], [0], [1], [0, 0, 1, 1], [], []>} : vector<8x8xbf16>, vector<8x16xbf16>, vector<8x16xf32> -> vector<8x16xf32>
    %400 = arith.truncf %399 : vector<8x16xf32> to vector<8x16xbf16>
    %c2_350 = arith.constant 2 : index
    %c0_351 = arith.constant 0 : index
    %c0_352 = arith.constant 0 : index
    %401 = vector.load %arg22[%c2_350, %c0_351, %c0_352] : memref<9x16x64xbf16, #tpu.memory_space<vmem>>, vector<1x16x64xbf16>
    %402 = vector.shape_cast %401 : vector<1x16x64xbf16> to vector<16x64xbf16>
    %cst_353 = arith.constant dense<0.000000e+00> : vector<8x64xf32>
    %403 = tpu.matmul %400, %402, %cst_353 {dimension_numbers = #tpu.dot_dimension_numbers<[1], [0], [0], [1], [0, 0, 1, 1], [], []>} : vector<8x16xbf16>, vector<16x64xbf16>, vector<8x64xf32> -> vector<8x64xf32>
    %404 = arith.addf %396, %403 : vector<8x64xf32>
    %c3_354 = arith.constant 3 : index
    %c0_355 = arith.constant 0 : index
    %c0_356 = arith.constant 0 : index
    %405 = vector.load %arg21[%c3_354, %c0_355, %c0_356] : memref<9x8x8xbf16, #tpu.memory_space<vmem>>, vector<1x8x8xbf16>
    %406 = vector.shape_cast %405 : vector<1x8x8xbf16> to vector<8x8xbf16>
    %cst_357 = arith.constant dense<0.000000e+00> : vector<8x16xf32>
    %407 = tpu.matmul %406, %379, %cst_357 {dimension_numbers = #tpu.dot_dimension_numbers<[1], [0], [0], [1], [0, 0, 1, 1], [], []>} : vector<8x8xbf16>, vector<8x16xbf16>, vector<8x16xf32> -> vector<8x16xf32>
    %408 = arith.truncf %407 : vector<8x16xf32> to vector<8x16xbf16>
    %c3_358 = arith.constant 3 : index
    %c0_359 = arith.constant 0 : index
    %c0_360 = arith.constant 0 : index
    %409 = vector.load %arg22[%c3_358, %c0_359, %c0_360] : memref<9x16x64xbf16, #tpu.memory_space<vmem>>, vector<1x16x64xbf16>
    %410 = vector.shape_cast %409 : vector<1x16x64xbf16> to vector<16x64xbf16>
    %cst_361 = arith.constant dense<0.000000e+00> : vector<8x64xf32>
    %411 = tpu.matmul %408, %410, %cst_361 {dimension_numbers = #tpu.dot_dimension_numbers<[1], [0], [0], [1], [0, 0, 1, 1], [], []>} : vector<8x16xbf16>, vector<16x64xbf16>, vector<8x64xf32> -> vector<8x64xf32>
    %412 = arith.addf %404, %411 : vector<8x64xf32>
    %c4_362 = arith.constant 4 : index
    %c0_363 = arith.constant 0 : index
    %c0_364 = arith.constant 0 : index
    %413 = vector.load %arg21[%c4_362, %c0_363, %c0_364] : memref<9x8x8xbf16, #tpu.memory_space<vmem>>, vector<1x8x8xbf16>
    %414 = vector.shape_cast %413 : vector<1x8x8xbf16> to vector<8x8xbf16>
    %cst_365 = arith.constant dense<0.000000e+00> : vector<8x16xf32>
    %415 = tpu.matmul %414, %379, %cst_365 {dimension_numbers = #tpu.dot_dimension_numbers<[1], [0], [0], [1], [0, 0, 1, 1], [], []>} : vector<8x8xbf16>, vector<8x16xbf16>, vector<8x16xf32> -> vector<8x16xf32>
    %416 = arith.truncf %415 : vector<8x16xf32> to vector<8x16xbf16>
    %c4_366 = arith.constant 4 : index
    %c0_367 = arith.constant 0 : index
    %c0_368 = arith.constant 0 : index
    %417 = vector.load %arg22[%c4_366, %c0_367, %c0_368] : memref<9x16x64xbf16, #tpu.memory_space<vmem>>, vector<1x16x64xbf16>
    %418 = vector.shape_cast %417 : vector<1x16x64xbf16> to vector<16x64xbf16>
    %cst_369 = arith.constant dense<0.000000e+00> : vector<8x64xf32>
    %419 = tpu.matmul %416, %418, %cst_369 {dimension_numbers = #tpu.dot_dimension_numbers<[1], [0], [0], [1], [0, 0, 1, 1], [], []>} : vector<8x16xbf16>, vector<16x64xbf16>, vector<8x64xf32> -> vector<8x64xf32>
    %420 = arith.addf %412, %419 : vector<8x64xf32>
    %c5_370 = arith.constant 5 : index
    %c0_371 = arith.constant 0 : index
    %c0_372 = arith.constant 0 : index
    %421 = vector.load %arg21[%c5_370, %c0_371, %c0_372] : memref<9x8x8xbf16, #tpu.memory_space<vmem>>, vector<1x8x8xbf16>
    %422 = vector.shape_cast %421 : vector<1x8x8xbf16> to vector<8x8xbf16>
    %cst_373 = arith.constant dense<0.000000e+00> : vector<8x16xf32>
    %423 = tpu.matmul %422, %379, %cst_373 {dimension_numbers = #tpu.dot_dimension_numbers<[1], [0], [0], [1], [0, 0, 1, 1], [], []>} : vector<8x8xbf16>, vector<8x16xbf16>, vector<8x16xf32> -> vector<8x16xf32>
    %424 = arith.truncf %423 : vector<8x16xf32> to vector<8x16xbf16>
    %c5_374 = arith.constant 5 : index
    %c0_375 = arith.constant 0 : index
    %c0_376 = arith.constant 0 : index
    %425 = vector.load %arg22[%c5_374, %c0_375, %c0_376] : memref<9x16x64xbf16, #tpu.memory_space<vmem>>, vector<1x16x64xbf16>
    %426 = vector.shape_cast %425 : vector<1x16x64xbf16> to vector<16x64xbf16>
    %cst_377 = arith.constant dense<0.000000e+00> : vector<8x64xf32>
    %427 = tpu.matmul %424, %426, %cst_377 {dimension_numbers = #tpu.dot_dimension_numbers<[1], [0], [0], [1], [0, 0, 1, 1], [], []>} : vector<8x16xbf16>, vector<16x64xbf16>, vector<8x64xf32> -> vector<8x64xf32>
    %428 = arith.addf %420, %427 : vector<8x64xf32>
    %c6_378 = arith.constant 6 : index
    %c0_379 = arith.constant 0 : index
    %c0_380 = arith.constant 0 : index
    %429 = vector.load %arg21[%c6_378, %c0_379, %c0_380] : memref<9x8x8xbf16, #tpu.memory_space<vmem>>, vector<1x8x8xbf16>
    %430 = vector.shape_cast %429 : vector<1x8x8xbf16> to vector<8x8xbf16>
    %cst_381 = arith.constant dense<0.000000e+00> : vector<8x16xf32>
    %431 = tpu.matmul %430, %379, %cst_381 {dimension_numbers = #tpu.dot_dimension_numbers<[1], [0], [0], [1], [0, 0, 1, 1], [], []>} : vector<8x8xbf16>, vector<8x16xbf16>, vector<8x16xf32> -> vector<8x16xf32>
    %432 = arith.truncf %431 : vector<8x16xf32> to vector<8x16xbf16>
    %c6_382 = arith.constant 6 : index
    %c0_383 = arith.constant 0 : index
    %c0_384 = arith.constant 0 : index
    %433 = vector.load %arg22[%c6_382, %c0_383, %c0_384] : memref<9x16x64xbf16, #tpu.memory_space<vmem>>, vector<1x16x64xbf16>
    %434 = vector.shape_cast %433 : vector<1x16x64xbf16> to vector<16x64xbf16>
    %cst_385 = arith.constant dense<0.000000e+00> : vector<8x64xf32>
    %435 = tpu.matmul %432, %434, %cst_385 {dimension_numbers = #tpu.dot_dimension_numbers<[1], [0], [0], [1], [0, 0, 1, 1], [], []>} : vector<8x16xbf16>, vector<16x64xbf16>, vector<8x64xf32> -> vector<8x64xf32>
    %436 = arith.addf %428, %435 : vector<8x64xf32>
    %c7_386 = arith.constant 7 : index
    %c0_387 = arith.constant 0 : index
    %c0_388 = arith.constant 0 : index
    %437 = vector.load %arg21[%c7_386, %c0_387, %c0_388] : memref<9x8x8xbf16, #tpu.memory_space<vmem>>, vector<1x8x8xbf16>
    %438 = vector.shape_cast %437 : vector<1x8x8xbf16> to vector<8x8xbf16>
    %cst_389 = arith.constant dense<0.000000e+00> : vector<8x16xf32>
    %439 = tpu.matmul %438, %379, %cst_389 {dimension_numbers = #tpu.dot_dimension_numbers<[1], [0], [0], [1], [0, 0, 1, 1], [], []>} : vector<8x8xbf16>, vector<8x16xbf16>, vector<8x16xf32> -> vector<8x16xf32>
    %440 = arith.truncf %439 : vector<8x16xf32> to vector<8x16xbf16>
    %c7_390 = arith.constant 7 : index
    %c0_391 = arith.constant 0 : index
    %c0_392 = arith.constant 0 : index
    %441 = vector.load %arg22[%c7_390, %c0_391, %c0_392] : memref<9x16x64xbf16, #tpu.memory_space<vmem>>, vector<1x16x64xbf16>
    %442 = vector.shape_cast %441 : vector<1x16x64xbf16> to vector<16x64xbf16>
    %cst_393 = arith.constant dense<0.000000e+00> : vector<8x64xf32>
    %443 = tpu.matmul %440, %442, %cst_393 {dimension_numbers = #tpu.dot_dimension_numbers<[1], [0], [0], [1], [0, 0, 1, 1], [], []>} : vector<8x16xbf16>, vector<16x64xbf16>, vector<8x64xf32> -> vector<8x64xf32>
    %444 = arith.addf %436, %443 : vector<8x64xf32>
    %c8_394 = arith.constant 8 : index
    %c0_395 = arith.constant 0 : index
    %c0_396 = arith.constant 0 : index
    %445 = vector.load %arg21[%c8_394, %c0_395, %c0_396] : memref<9x8x8xbf16, #tpu.memory_space<vmem>>, vector<1x8x8xbf16>
    %446 = vector.shape_cast %445 : vector<1x8x8xbf16> to vector<8x8xbf16>
    %cst_397 = arith.constant dense<0.000000e+00> : vector<8x16xf32>
    %447 = tpu.matmul %446, %379, %cst_397 {dimension_numbers = #tpu.dot_dimension_numbers<[1], [0], [0], [1], [0, 0, 1, 1], [], []>} : vector<8x8xbf16>, vector<8x16xbf16>, vector<8x16xf32> -> vector<8x16xf32>
    %448 = arith.truncf %447 : vector<8x16xf32> to vector<8x16xbf16>
    %c8_398 = arith.constant 8 : index
    %c0_399 = arith.constant 0 : index
    %c0_400 = arith.constant 0 : index
    %449 = vector.load %arg22[%c8_398, %c0_399, %c0_400] : memref<9x16x64xbf16, #tpu.memory_space<vmem>>, vector<1x16x64xbf16>
    %450 = vector.shape_cast %449 : vector<1x16x64xbf16> to vector<16x64xbf16>
    %cst_401 = arith.constant dense<0.000000e+00> : vector<8x64xf32>
    %451 = tpu.matmul %448, %450, %cst_401 {dimension_numbers = #tpu.dot_dimension_numbers<[1], [0], [0], [1], [0, 0, 1, 1], [], []>} : vector<8x16xbf16>, vector<16x64xbf16>, vector<8x64xf32> -> vector<8x64xf32>
    %452 = arith.addf %444, %451 : vector<8x64xf32>
    %c0_402 = arith.constant 0 : index
    %c0_403 = arith.constant 0 : index
    %453 = vector.load %arg23[%c0_402, %c0_403] : memref<8x8xf32, #tpu.memory_space<vmem>>, vector<8x8xf32>
    %454 = arith.mulf %452, %452 : vector<8x64xf32>
    %cst_404 = arith.constant dense<0.000000e+00> : vector<8x64xf32>
    %455 = tpu.matmul %453, %454, %cst_404 {dimension_numbers = #tpu.dot_dimension_numbers<[1], [0], [0], [1], [0, 0, 1, 1], [], []>} : vector<8x8xf32>, vector<8x64xf32>, vector<8x64xf32> -> vector<8x64xf32>
    %c0_405 = arith.constant 0 : index
    %c0_406 = arith.constant 0 : index
    %456 = vector.load %arg24[%c0_405, %c0_406] : memref<8x1xf32, #tpu.memory_space<vmem>>, vector<8x1xf32>
    %457 = vector.broadcast %456 : vector<8x1xf32> to vector<8x64xf32>
    %458 = arith.addf %455, %457 : vector<8x64xf32>
    %459 = math.sqrt %458 : vector<8x64xf32>
    %460 = arith.mulf %452, %459 : vector<8x64xf32>
    %cst_407 = arith.constant 0.000000e+00 : f32
    %461 = vector.broadcast %cst_407 : f32 to vector<8x64xf32>
    %462 = arith.maximumf %460, %461 : vector<8x64xf32>
    %c0_408 = arith.constant 0 : index
    %c0_409 = arith.constant 0 : index
    %463 = vector.load %arg25[%c0_408, %c0_409] : memref<8x1xf32, #tpu.memory_space<vmem>>, vector<8x1xf32>
    %cst_410 = arith.constant 0.000000e+00 : f32
    %464 = vector.broadcast %cst_410 : f32 to vector<8x64xf32>
    %465 = arith.minimumf %460, %464 : vector<8x64xf32>
    %466 = vector.broadcast %463 : vector<8x1xf32> to vector<8x64xf32>
    %467 = arith.mulf %466, %465 : vector<8x64xf32>
    %468 = arith.addf %462, %467 : vector<8x64xf32>
    %469 = arith.truncf %468 : vector<8x64xf32> to vector<8x64xbf16>
    %cst_411 = arith.constant 0.000000e+00 : f32
    %470 = vector.broadcast %cst_411 : f32 to vector<3x256xf32>
    %c0_412 = arith.constant 0 : index
    %c0_413 = arith.constant 0 : index
    %c0_414 = arith.constant 0 : index
    %471 = vector.load %arg26[%c0_412, %c0_413, %c0_414] : memref<9x3x8xbf16, #tpu.memory_space<vmem>>, vector<1x3x8xbf16>
    %472 = vector.shape_cast %471 : vector<1x3x8xbf16> to vector<3x8xbf16>
    %cst_415 = arith.constant dense<0.000000e+00> : vector<3x64xf32>
    %473 = tpu.matmul %472, %469, %cst_415 {dimension_numbers = #tpu.dot_dimension_numbers<[1], [0], [0], [1], [0, 0, 1, 1], [], []>} : vector<3x8xbf16>, vector<8x64xbf16>, vector<3x64xf32> -> vector<3x64xf32>
    %474 = arith.truncf %473 : vector<3x64xf32> to vector<3x64xbf16>
    %c0_416 = arith.constant 0 : index
    %c0_417 = arith.constant 0 : index
    %c0_418 = arith.constant 0 : index
    %475 = vector.load %arg27[%c0_416, %c0_417, %c0_418] : memref<9x64x256xbf16, #tpu.memory_space<vmem>>, vector<1x64x256xbf16>
    %476 = vector.shape_cast %475 : vector<1x64x256xbf16> to vector<64x256xbf16>
    %cst_419 = arith.constant dense<0.000000e+00> : vector<3x256xf32>
    %477 = tpu.matmul %474, %476, %cst_419 {dimension_numbers = #tpu.dot_dimension_numbers<[1], [0], [0], [1], [0, 0, 1, 1], [], []>} : vector<3x64xbf16>, vector<64x256xbf16>, vector<3x256xf32> -> vector<3x256xf32>
    %478 = arith.addf %470, %477 : vector<3x256xf32>
    %c1_420 = arith.constant 1 : index
    %c0_421 = arith.constant 0 : index
    %c0_422 = arith.constant 0 : index
    %479 = vector.load %arg26[%c1_420, %c0_421, %c0_422] : memref<9x3x8xbf16, #tpu.memory_space<vmem>>, vector<1x3x8xbf16>
    %480 = vector.shape_cast %479 : vector<1x3x8xbf16> to vector<3x8xbf16>
    %cst_423 = arith.constant dense<0.000000e+00> : vector<3x64xf32>
    %481 = tpu.matmul %480, %469, %cst_423 {dimension_numbers = #tpu.dot_dimension_numbers<[1], [0], [0], [1], [0, 0, 1, 1], [], []>} : vector<3x8xbf16>, vector<8x64xbf16>, vector<3x64xf32> -> vector<3x64xf32>
    %482 = arith.truncf %481 : vector<3x64xf32> to vector<3x64xbf16>
    %c1_424 = arith.constant 1 : index
    %c0_425 = arith.constant 0 : index
    %c0_426 = arith.constant 0 : index
    %483 = vector.load %arg27[%c1_424, %c0_425, %c0_426] : memref<9x64x256xbf16, #tpu.memory_space<vmem>>, vector<1x64x256xbf16>
    %484 = vector.shape_cast %483 : vector<1x64x256xbf16> to vector<64x256xbf16>
    %cst_427 = arith.constant dense<0.000000e+00> : vector<3x256xf32>
    %485 = tpu.matmul %482, %484, %cst_427 {dimension_numbers = #tpu.dot_dimension_numbers<[1], [0], [0], [1], [0, 0, 1, 1], [], []>} : vector<3x64xbf16>, vector<64x256xbf16>, vector<3x256xf32> -> vector<3x256xf32>
    %486 = arith.addf %478, %485 : vector<3x256xf32>
    %c2_428 = arith.constant 2 : index
    %c0_429 = arith.constant 0 : index
    %c0_430 = arith.constant 0 : index
    %487 = vector.load %arg26[%c2_428, %c0_429, %c0_430] : memref<9x3x8xbf16, #tpu.memory_space<vmem>>, vector<1x3x8xbf16>
    %488 = vector.shape_cast %487 : vector<1x3x8xbf16> to vector<3x8xbf16>
    %cst_431 = arith.constant dense<0.000000e+00> : vector<3x64xf32>
    %489 = tpu.matmul %488, %469, %cst_431 {dimension_numbers = #tpu.dot_dimension_numbers<[1], [0], [0], [1], [0, 0, 1, 1], [], []>} : vector<3x8xbf16>, vector<8x64xbf16>, vector<3x64xf32> -> vector<3x64xf32>
    %490 = arith.truncf %489 : vector<3x64xf32> to vector<3x64xbf16>
    %c2_432 = arith.constant 2 : index
    %c0_433 = arith.constant 0 : index
    %c0_434 = arith.constant 0 : index
    %491 = vector.load %arg27[%c2_432, %c0_433, %c0_434] : memref<9x64x256xbf16, #tpu.memory_space<vmem>>, vector<1x64x256xbf16>
    %492 = vector.shape_cast %491 : vector<1x64x256xbf16> to vector<64x256xbf16>
    %cst_435 = arith.constant dense<0.000000e+00> : vector<3x256xf32>
    %493 = tpu.matmul %490, %492, %cst_435 {dimension_numbers = #tpu.dot_dimension_numbers<[1], [0], [0], [1], [0, 0, 1, 1], [], []>} : vector<3x64xbf16>, vector<64x256xbf16>, vector<3x256xf32> -> vector<3x256xf32>
    %494 = arith.addf %486, %493 : vector<3x256xf32>
    %c3_436 = arith.constant 3 : index
    %c0_437 = arith.constant 0 : index
    %c0_438 = arith.constant 0 : index
    %495 = vector.load %arg26[%c3_436, %c0_437, %c0_438] : memref<9x3x8xbf16, #tpu.memory_space<vmem>>, vector<1x3x8xbf16>
    %496 = vector.shape_cast %495 : vector<1x3x8xbf16> to vector<3x8xbf16>
    %cst_439 = arith.constant dense<0.000000e+00> : vector<3x64xf32>
    %497 = tpu.matmul %496, %469, %cst_439 {dimension_numbers = #tpu.dot_dimension_numbers<[1], [0], [0], [1], [0, 0, 1, 1], [], []>} : vector<3x8xbf16>, vector<8x64xbf16>, vector<3x64xf32> -> vector<3x64xf32>
    %498 = arith.truncf %497 : vector<3x64xf32> to vector<3x64xbf16>
    %c3_440 = arith.constant 3 : index
    %c0_441 = arith.constant 0 : index
    %c0_442 = arith.constant 0 : index
    %499 = vector.load %arg27[%c3_440, %c0_441, %c0_442] : memref<9x64x256xbf16, #tpu.memory_space<vmem>>, vector<1x64x256xbf16>
    %500 = vector.shape_cast %499 : vector<1x64x256xbf16> to vector<64x256xbf16>
    %cst_443 = arith.constant dense<0.000000e+00> : vector<3x256xf32>
    %501 = tpu.matmul %498, %500, %cst_443 {dimension_numbers = #tpu.dot_dimension_numbers<[1], [0], [0], [1], [0, 0, 1, 1], [], []>} : vector<3x64xbf16>, vector<64x256xbf16>, vector<3x256xf32> -> vector<3x256xf32>
    %502 = arith.addf %494, %501 : vector<3x256xf32>
    %c4_444 = arith.constant 4 : index
    %c0_445 = arith.constant 0 : index
    %c0_446 = arith.constant 0 : index
    %503 = vector.load %arg26[%c4_444, %c0_445, %c0_446] : memref<9x3x8xbf16, #tpu.memory_space<vmem>>, vector<1x3x8xbf16>
    %504 = vector.shape_cast %503 : vector<1x3x8xbf16> to vector<3x8xbf16>
    %cst_447 = arith.constant dense<0.000000e+00> : vector<3x64xf32>
    %505 = tpu.matmul %504, %469, %cst_447 {dimension_numbers = #tpu.dot_dimension_numbers<[1], [0], [0], [1], [0, 0, 1, 1], [], []>} : vector<3x8xbf16>, vector<8x64xbf16>, vector<3x64xf32> -> vector<3x64xf32>
    %506 = arith.truncf %505 : vector<3x64xf32> to vector<3x64xbf16>
    %c4_448 = arith.constant 4 : index
    %c0_449 = arith.constant 0 : index
    %c0_450 = arith.constant 0 : index
    %507 = vector.load %arg27[%c4_448, %c0_449, %c0_450] : memref<9x64x256xbf16, #tpu.memory_space<vmem>>, vector<1x64x256xbf16>
    %508 = vector.shape_cast %507 : vector<1x64x256xbf16> to vector<64x256xbf16>
    %cst_451 = arith.constant dense<0.000000e+00> : vector<3x256xf32>
    %509 = tpu.matmul %506, %508, %cst_451 {dimension_numbers = #tpu.dot_dimension_numbers<[1], [0], [0], [1], [0, 0, 1, 1], [], []>} : vector<3x64xbf16>, vector<64x256xbf16>, vector<3x256xf32> -> vector<3x256xf32>
    %510 = arith.addf %502, %509 : vector<3x256xf32>
    %c5_452 = arith.constant 5 : index
    %c0_453 = arith.constant 0 : index
    %c0_454 = arith.constant 0 : index
    %511 = vector.load %arg26[%c5_452, %c0_453, %c0_454] : memref<9x3x8xbf16, #tpu.memory_space<vmem>>, vector<1x3x8xbf16>
    %512 = vector.shape_cast %511 : vector<1x3x8xbf16> to vector<3x8xbf16>
    %cst_455 = arith.constant dense<0.000000e+00> : vector<3x64xf32>
    %513 = tpu.matmul %512, %469, %cst_455 {dimension_numbers = #tpu.dot_dimension_numbers<[1], [0], [0], [1], [0, 0, 1, 1], [], []>} : vector<3x8xbf16>, vector<8x64xbf16>, vector<3x64xf32> -> vector<3x64xf32>
    %514 = arith.truncf %513 : vector<3x64xf32> to vector<3x64xbf16>
    %c5_456 = arith.constant 5 : index
    %c0_457 = arith.constant 0 : index
    %c0_458 = arith.constant 0 : index
    %515 = vector.load %arg27[%c5_456, %c0_457, %c0_458] : memref<9x64x256xbf16, #tpu.memory_space<vmem>>, vector<1x64x256xbf16>
    %516 = vector.shape_cast %515 : vector<1x64x256xbf16> to vector<64x256xbf16>
    %cst_459 = arith.constant dense<0.000000e+00> : vector<3x256xf32>
    %517 = tpu.matmul %514, %516, %cst_459 {dimension_numbers = #tpu.dot_dimension_numbers<[1], [0], [0], [1], [0, 0, 1, 1], [], []>} : vector<3x64xbf16>, vector<64x256xbf16>, vector<3x256xf32> -> vector<3x256xf32>
    %518 = arith.addf %510, %517 : vector<3x256xf32>
    %c6_460 = arith.constant 6 : index
    %c0_461 = arith.constant 0 : index
    %c0_462 = arith.constant 0 : index
    %519 = vector.load %arg26[%c6_460, %c0_461, %c0_462] : memref<9x3x8xbf16, #tpu.memory_space<vmem>>, vector<1x3x8xbf16>
    %520 = vector.shape_cast %519 : vector<1x3x8xbf16> to vector<3x8xbf16>
    %cst_463 = arith.constant dense<0.000000e+00> : vector<3x64xf32>
    %521 = tpu.matmul %520, %469, %cst_463 {dimension_numbers = #tpu.dot_dimension_numbers<[1], [0], [0], [1], [0, 0, 1, 1], [], []>} : vector<3x8xbf16>, vector<8x64xbf16>, vector<3x64xf32> -> vector<3x64xf32>
    %522 = arith.truncf %521 : vector<3x64xf32> to vector<3x64xbf16>
    %c6_464 = arith.constant 6 : index
    %c0_465 = arith.constant 0 : index
    %c0_466 = arith.constant 0 : index
    %523 = vector.load %arg27[%c6_464, %c0_465, %c0_466] : memref<9x64x256xbf16, #tpu.memory_space<vmem>>, vector<1x64x256xbf16>
    %524 = vector.shape_cast %523 : vector<1x64x256xbf16> to vector<64x256xbf16>
    %cst_467 = arith.constant dense<0.000000e+00> : vector<3x256xf32>
    %525 = tpu.matmul %522, %524, %cst_467 {dimension_numbers = #tpu.dot_dimension_numbers<[1], [0], [0], [1], [0, 0, 1, 1], [], []>} : vector<3x64xbf16>, vector<64x256xbf16>, vector<3x256xf32> -> vector<3x256xf32>
    %526 = arith.addf %518, %525 : vector<3x256xf32>
    %c7_468 = arith.constant 7 : index
    %c0_469 = arith.constant 0 : index
    %c0_470 = arith.constant 0 : index
    %527 = vector.load %arg26[%c7_468, %c0_469, %c0_470] : memref<9x3x8xbf16, #tpu.memory_space<vmem>>, vector<1x3x8xbf16>
    %528 = vector.shape_cast %527 : vector<1x3x8xbf16> to vector<3x8xbf16>
    %cst_471 = arith.constant dense<0.000000e+00> : vector<3x64xf32>
    %529 = tpu.matmul %528, %469, %cst_471 {dimension_numbers = #tpu.dot_dimension_numbers<[1], [0], [0], [1], [0, 0, 1, 1], [], []>} : vector<3x8xbf16>, vector<8x64xbf16>, vector<3x64xf32> -> vector<3x64xf32>
    %530 = arith.truncf %529 : vector<3x64xf32> to vector<3x64xbf16>
    %c7_472 = arith.constant 7 : index
    %c0_473 = arith.constant 0 : index
    %c0_474 = arith.constant 0 : index
    %531 = vector.load %arg27[%c7_472, %c0_473, %c0_474] : memref<9x64x256xbf16, #tpu.memory_space<vmem>>, vector<1x64x256xbf16>
    %532 = vector.shape_cast %531 : vector<1x64x256xbf16> to vector<64x256xbf16>
    %cst_475 = arith.constant dense<0.000000e+00> : vector<3x256xf32>
    %533 = tpu.matmul %530, %532, %cst_475 {dimension_numbers = #tpu.dot_dimension_numbers<[1], [0], [0], [1], [0, 0, 1, 1], [], []>} : vector<3x64xbf16>, vector<64x256xbf16>, vector<3x256xf32> -> vector<3x256xf32>
    %534 = arith.addf %526, %533 : vector<3x256xf32>
    %c8_476 = arith.constant 8 : index
    %c0_477 = arith.constant 0 : index
    %c0_478 = arith.constant 0 : index
    %535 = vector.load %arg26[%c8_476, %c0_477, %c0_478] : memref<9x3x8xbf16, #tpu.memory_space<vmem>>, vector<1x3x8xbf16>
    %536 = vector.shape_cast %535 : vector<1x3x8xbf16> to vector<3x8xbf16>
    %cst_479 = arith.constant dense<0.000000e+00> : vector<3x64xf32>
    %537 = tpu.matmul %536, %469, %cst_479 {dimension_numbers = #tpu.dot_dimension_numbers<[1], [0], [0], [1], [0, 0, 1, 1], [], []>} : vector<3x8xbf16>, vector<8x64xbf16>, vector<3x64xf32> -> vector<3x64xf32>
    %538 = arith.truncf %537 : vector<3x64xf32> to vector<3x64xbf16>
    %c8_480 = arith.constant 8 : index
    %c0_481 = arith.constant 0 : index
    %c0_482 = arith.constant 0 : index
    %539 = vector.load %arg27[%c8_480, %c0_481, %c0_482] : memref<9x64x256xbf16, #tpu.memory_space<vmem>>, vector<1x64x256xbf16>
    %540 = vector.shape_cast %539 : vector<1x64x256xbf16> to vector<64x256xbf16>
    %cst_483 = arith.constant dense<0.000000e+00> : vector<3x256xf32>
    %541 = tpu.matmul %538, %540, %cst_483 {dimension_numbers = #tpu.dot_dimension_numbers<[1], [0], [0], [1], [0, 0, 1, 1], [], []>} : vector<3x64xbf16>, vector<64x256xbf16>, vector<3x256xf32> -> vector<3x256xf32>
    %542 = arith.addf %534, %541 : vector<3x256xf32>
    %c0_484 = arith.constant 0 : index
    %c0_485 = arith.constant 0 : index
    %543 = vector.load %arg28[%c0_484, %c0_485] : memref<3x3xf32, #tpu.memory_space<vmem>>, vector<3x3xf32>
    %544 = arith.mulf %542, %542 : vector<3x256xf32>
    %cst_486 = arith.constant dense<0.000000e+00> : vector<3x256xf32>
    %545 = tpu.matmul %543, %544, %cst_486 {dimension_numbers = #tpu.dot_dimension_numbers<[1], [0], [0], [1], [0, 0, 1, 1], [], []>} : vector<3x3xf32>, vector<3x256xf32>, vector<3x256xf32> -> vector<3x256xf32>
    %c0_487 = arith.constant 0 : index
    %c0_488 = arith.constant 0 : index
    %546 = vector.load %arg29[%c0_487, %c0_488] : memref<3x1xf32, #tpu.memory_space<vmem>>, vector<3x1xf32>
    %547 = vector.broadcast %546 : vector<3x1xf32> to vector<3x256xf32>
    %548 = arith.addf %545, %547 : vector<3x256xf32>
    %549 = math.sqrt %548 : vector<3x256xf32>
    %550 = arith.mulf %542, %549 : vector<3x256xf32>
    %551 = arith.negf %550 : vector<3x256xf32>
    %552 = math.exp %551 : vector<3x256xf32>
    %cst_489 = arith.constant 1.000000e+00 : f32
    %553 = vector.broadcast %cst_489 : f32 to vector<3x256xf32>
    %554 = arith.addf %553, %552 : vector<3x256xf32>
    %555 = arith.divf %553, %554 : vector<3x256xf32>
    %c0_490 = arith.constant 0 : index
    %c0_491 = arith.constant 0 : index
    %c0_492 = arith.constant 0 : index
    %556 = vector.load %arg33[%c0_490, %c0_491, %c0_492] : memref<1x3x256xf32, #tpu.memory_space<vmem>>, vector<1x3x256xf32>
    %557 = vector.shape_cast %556 : vector<1x3x256xf32> to vector<3x256xf32>
    %558 = vector.shape_cast %555 : vector<3x256xf32> to vector<1x3x256xf32>
    tpu.vector_store %arg33[%c0_490, %c0_491, %c0_492], %558 {strides = array<i32>} : memref<1x3x256xf32, #tpu.memory_space<vmem>>, vector<1x3x256xf32>,
    return
  }
  func.func @transform_0(%arg0: i32) -> (i32, i32, i32) {
    %c0_i32 = arith.constant 0 : i32
    %c0_i32_0 = arith.constant 0 : i32
    %c0_i32_1 = arith.constant 0 : i32
    %c0_i32_2 = arith.constant 0 : i32
    return %c0_i32, %c0_i32_0, %c0_i32_1 : i32, i32, i32
  }
  func.func @transform_1(%arg0: i32) -> (i32, i32, i32) {
    %c0_i32 = arith.constant 0 : i32
    %c0_i32_0 = arith.constant 0 : i32
    %c0_i32_1 = arith.constant 0 : i32
    %c0_i32_2 = arith.constant 0 : i32
    return %c0_i32, %c0_i32_0, %c0_i32_1 : i32, i32, i32
  }
  func.func @transform_2(%arg0: i32) -> (i32, i32) {
    %c0_i32 = arith.constant 0 : i32
    %c0_i32_0 = arith.constant 0 : i32
    %c0_i32_1 = arith.constant 0 : i32
    return %c0_i32, %c0_i32_0 : i32, i32
  }
  func.func @transform_3(%arg0: i32) -> (i32, i32) {
    %c0_i32 = arith.constant 0 : i32
    %c0_i32_0 = arith.constant 0 : i32
    %c0_i32_1 = arith.constant 0 : i32
    return %c0_i32, %c0_i32_0 : i32, i32
  }
  func.func @transform_4(%arg0: i32) -> (i32, i32) {
    %c0_i32 = arith.constant 0 : i32
    %c0_i32_0 = arith.constant 0 : i32
    %c0_i32_1 = arith.constant 0 : i32
    return %c0_i32, %c0_i32_0 : i32, i32
  }
  func.func @transform_5(%arg0: i32) -> (i32, i32, i32) {
    %c0_i32 = arith.constant 0 : i32
    %c0_i32_0 = arith.constant 0 : i32
    %c0_i32_1 = arith.constant 0 : i32
    %c0_i32_2 = arith.constant 0 : i32
    return %c0_i32, %c0_i32_0, %c0_i32_1 : i32, i32, i32
  }
  func.func @transform_6(%arg0: i32) -> (i32, i32, i32) {
    %c0_i32 = arith.constant 0 : i32
    %c0_i32_0 = arith.constant 0 : i32
    %c0_i32_1 = arith.constant 0 : i32
    %c0_i32_2 = arith.constant 0 : i32
    return %c0_i32, %c0_i32_0, %c0_i32_1 : i32, i32, i32
  }
  func.func @transform_7(%arg0: i32) -> (i32, i32) {
    %c0_i32 = arith.constant 0 : i32
    %c0_i32_0 = arith.constant 0 : i32
    %c0_i32_1 = arith.constant 0 : i32
    return %c0_i32, %c0_i32_0 : i32, i32
  }
  func.func @transform_8(%arg0: i32) -> (i32, i32) {
    %c0_i32 = arith.constant 0 : i32
    %c0_i32_0 = arith.constant 0 : i32
    %c0_i32_1 = arith.constant 0 : i32
    return %c0_i32, %c0_i32_0 : i32, i32
  }
  func.func @transform_9(%arg0: i32) -> (i32, i32) {
    %c0_i32 = arith.constant 0 : i32
    %c0_i32_0 = arith.constant 0 : i32
    %c0_i32_1 = arith.constant 0 : i32
    return %c0_i32, %c0_i32_0 : i32, i32
  }
  func.func @transform_10(%arg0: i32) -> (i32, i32, i32) {
    %c0_i32 = arith.constant 0 : i32
    %c0_i32_0 = arith.constant 0 : i32
    %c0_i32_1 = arith.constant 0 : i32
    %c0_i32_2 = arith.constant 0 : i32
    return %c0_i32, %c0_i32_0, %c0_i32_1 : i32, i32, i32
  }
  func.func @transform_11(%arg0: i32) -> (i32, i32, i32) {
    %c0_i32 = arith.constant 0 : i32
    %c0_i32_0 = arith.constant 0 : i32
    %c0_i32_1 = arith.constant 0 : i32
    %c0_i32_2 = arith.constant 0 : i32
    return %c0_i32, %c0_i32_0, %c0_i32_1 : i32, i32, i32
  }
  func.func @transform_12(%arg0: i32) -> (i32, i32) {
    %c0_i32 = arith.constant 0 : i32
    %c0_i32_0 = arith.constant 0 : i32
    %c0_i32_1 = arith.constant 0 : i32
    return %c0_i32, %c0_i32_0 : i32, i32
  }
  func.func @transform_13(%arg0: i32) -> (i32, i32) {
    %c0_i32 = arith.constant 0 : i32
    %c0_i32_0 = arith.constant 0 : i32
    %c0_i32_1 = arith.constant 0 : i32
    return %c0_i32, %c0_i32_0 : i32, i32
  }
  func.func @transform_14(%arg0: i32) -> (i32, i32) {
    %c0_i32 = arith.constant 0 : i32
    %c0_i32_0 = arith.constant 0 : i32
    %c0_i32_1 = arith.constant 0 : i32
    return %c0_i32, %c0_i32_0 : i32, i32
  }
  func.func @transform_15(%arg0: i32) -> (i32, i32, i32) {
    %c0_i32 = arith.constant 0 : i32
    %c0_i32_0 = arith.constant 0 : i32
    %c0_i32_1 = arith.constant 0 : i32
    %c0_i32_2 = arith.constant 0 : i32
    return %c0_i32, %c0_i32_0, %c0_i32_1 : i32, i32, i32
  }
  func.func @transform_16(%arg0: i32) -> (i32, i32, i32) {
    %c0_i32 = arith.constant 0 : i32
    %c0_i32_0 = arith.constant 0 : i32
    %c0_i32_1 = arith.constant 0 : i32
    %c0_i32_2 = arith.constant 0 : i32
    return %c0_i32, %c0_i32_0, %c0_i32_1 : i32, i32, i32
  }
  func.func @transform_17(%arg0: i32) -> (i32, i32) {
    %c0_i32 = arith.constant 0 : i32
    %c0_i32_0 = arith.constant 0 : i32
    %c0_i32_1 = arith.constant 0 : i32
    return %c0_i32, %c0_i32_0 : i32, i32
  }
  func.func @transform_18(%arg0: i32) -> (i32, i32) {
    %c0_i32 = arith.constant 0 : i32
    %c0_i32_0 = arith.constant 0 : i32
    %c0_i32_1 = arith.constant 0 : i32
    return %c0_i32, %c0_i32_0 : i32, i32
  }
  func.func @transform_19(%arg0: i32) -> (i32, i32) {
    %c0_i32 = arith.constant 0 : i32
    %c0_i32_0 = arith.constant 0 : i32
    %c0_i32_1 = arith.constant 0 : i32
    return %c0_i32, %c0_i32_0 : i32, i32
  }
  func.func @transform_20(%arg0: i32) -> (i32, i32, i32) {
    %c0_i32 = arith.constant 0 : i32
    %c0_i32_0 = arith.constant 0 : i32
    %c0_i32_1 = arith.constant 0 : i32
    %c0_i32_2 = arith.constant 0 : i32
    return %c0_i32, %c0_i32_0, %c0_i32_1 : i32, i32, i32
  }
  func.func @transform_21(%arg0: i32) -> (i32, i32, i32) {
    %c0_i32 = arith.constant 0 : i32
    %c0_i32_0 = arith.constant 0 : i32
    %c0_i32_1 = arith.constant 0 : i32
    %c0_i32_2 = arith.constant 0 : i32
    return %c0_i32, %c0_i32_0, %c0_i32_1 : i32, i32, i32
  }
  func.func @transform_22(%arg0: i32) -> (i32, i32) {
    %c0_i32 = arith.constant 0 : i32
    %c0_i32_0 = arith.constant 0 : i32
    %c0_i32_1 = arith.constant 0 : i32
    return %c0_i32, %c0_i32_0 : i32, i32
  }
  func.func @transform_23(%arg0: i32) -> (i32, i32) {
    %c0_i32 = arith.constant 0 : i32
    %c0_i32_0 = arith.constant 0 : i32
    %c0_i32_1 = arith.constant 0 : i32
    return %c0_i32, %c0_i32_0 : i32, i32
  }
  func.func @transform_24(%arg0: i32) -> (i32, i32) {
    %c0_i32 = arith.constant 0 : i32
    %c0_i32_0 = arith.constant 0 : i32
    %c0_i32_1 = arith.constant 0 : i32
    return %c0_i32, %c0_i32_0 : i32, i32
  }
  func.func @transform_25(%arg0: i32) -> (i32, i32, i32) {
    %c0_i32 = arith.constant 0 : i32
    %c0_i32_0 = arith.constant 0 : i32
    %c0_i32_1 = arith.constant 0 : i32
    %c0_i32_2 = arith.constant 0 : i32
    return %c0_i32, %c0_i32_0, %c0_i32_1 : i32, i32, i32
  }
  func.func @transform_26(%arg0: i32) -> (i32, i32, i32) {
    %c0_i32 = arith.constant 0 : i32
    %c0_i32_0 = arith.constant 0 : i32
    %c0_i32_1 = arith.constant 0 : i32
    %c0_i32_2 = arith.constant 0 : i32
    return %c0_i32, %c0_i32_0, %c0_i32_1 : i32, i32, i32
  }
  func.func @transform_27(%arg0: i32) -> (i32, i32) {
    %c0_i32 = arith.constant 0 : i32
    %c0_i32_0 = arith.constant 0 : i32
    %c0_i32_1 = arith.constant 0 : i32
    return %c0_i32, %c0_i32_0 : i32, i32
  }
  func.func @transform_28(%arg0: i32) -> (i32, i32) {
    %c0_i32 = arith.constant 0 : i32
    %c0_i32_0 = arith.constant 0 : i32
    %c0_i32_1 = arith.constant 0 : i32
    return %c0_i32, %c0_i32_0 : i32, i32
  }
  func.func @transform_29(%arg0: i32) -> (i32, i32) {
    %c0_i32 = arith.constant 0 : i32
    %c0_i32_0 = arith.constant 0 : i32
    %c0_i32_1 = arith.constant 0 : i32
    return %c0_i32, %c0_i32_0 : i32, i32
  }
  func.func @transform_30(%arg0: i32) -> (i32, i32, i32) {
    %c0_i32 = arith.constant 0 : i32
    %c0_i32_0 = arith.constant 0 : i32
    %c0_i32_1 = arith.constant 0 : i32
    return %arg0, %c0_i32, %c0_i32_0 : i32, i32, i32
  }
  func.func @transform_31(%arg0: i32) -> (i32, i32, i32) {
    %c0_i32 = arith.constant 0 : i32
    %c0_i32_0 = arith.constant 0 : i32
    %c0_i32_1 = arith.constant 0 : i32
    return %arg0, %c0_i32, %c0_i32_0 : i32, i32, i32
  }
  func.func @transform_32(%arg0: i32) -> (i32, i32, i32) {
    %c0_i32 = arith.constant 0 : i32
    %c0_i32_0 = arith.constant 0 : i32
    %c0_i32_1 = arith.constant 0 : i32
    return %arg0, %c0_i32, %c0_i32_0 : i32, i32, i32
  }
}

</mosaic_0001>

<bundles_post_ra>
// kernel: deepjscc_forward.1
= control target key start
LH: loop header
LB: loop body
LE: loop exit
PB: predicated region body
PF: predicated region fallthrough
CT: control target
= control target key end

     0   :  { %s10990_s6 = smov 1   ;;  %s10991_s10 = smov 2   ;;  %s12046_s0 = inlined_call_operand.smem [shape: u32[33], index: -1, kind: input, shape index: {}] }
   0x1   :  { %s11033_s5 = sld [smem:[%s12046_s0]]   ;;  %s10992_s14 = smov 3  }
   0x2   :  { %s11038_s9 = sld [smem:[%s12046_s0 + %s10990_s6]]   ;;  %s10993_s18 = smov 4  }
   0x3   :  { %s11043_s13 = sld [smem:[%s12046_s0 + %s10991_s10]]   ;;  %s10994_s22 = smov 5  }
   0x4   :  { %s11048_s17 = sld [smem:[%s12046_s0 + %s10992_s14]]   ;;  %s10995_s26 = smov 6  }
   0x5   :  { %s11053_s21 = sld [smem:[%s12046_s0 + %s10993_s18]]   ;;  %s10996_s30 = smov 7  }
   0x6   :  { %s11058_s25 = sld [smem:[%s12046_s0 + %s10994_s22]]   ;;  %s10997_s4 = smov 8  }
   0x7   :  { %s11063_s29 = sld [smem:[%s12046_s0 + %s10995_s26]]   ;;  %s10998_s10 = smov 9  }
   0x8   :  { %s11068_s3 = sld [smem:[%s12046_s0 + %s10996_s30]]   ;;  %s10999_s15 = smov 10  }
   0x9   :  { %s11073_s8 = sld [smem:[%s12046_s0 + %s10997_s4]]   ;;  %s11000_s20 = smov 11  }
   0xa   :  { %s11078_s14 = sld [smem:[%s12046_s0 + %s10998_s10]]   ;;  %s11001_s26 = smov 12  }
   0xb   :  { %s11083_s19 = sld [smem:[%s12046_s0 + %s10999_s15]]   ;;  %s11002_s1 = smov 13  }
   0xc   :  { %s11088_s24 = sld [smem:[%s12046_s0 + %s11000_s20]]   ;;  %s11003_s7 = smov 14  }
   0xd   :  { %s11093_s30 = sld [smem:[%s12046_s0 + %s11001_s26]]   ;;  %s11004_s15 = smov 15  }
   0xe   :  { %12055 = sst [smem:[#allocation2_spill]] %s11068_s3  ;;  %s11005_s22 = smov 16  }
   0xf   :  { %s11098_s6 = sld [smem:[%s12046_s0 + %s11002_s1]]   ;;  %s11006_s28 = smov 17  }
  0x10   :  { %s11103_s12 = sld [smem:[%s12046_s0 + %s11003_s7]]   ;;  %s11007_s7 = smov 18  }
  0x11   :  { %12056 = sst [smem:[#allocation3_spill]] %s11083_s19 }
  0x12   :  { %12057 = sst [smem:[#allocation4_spill]] %s11088_s24 }
  0x13   :  { %12058 = sst [smem:[#allocation5_spill]] %s11093_s30 }
  0x14   :  { %s11108_s20 = sld [smem:[%s12046_s0 + %s11004_s15]]   ;;  %s11008_s15 = smov 19  }
  0x15   :  { %s11113_s27 = sld [smem:[%s12046_s0 + %s11005_s22]]   ;;  %s11009_s22 = smov 20  }
  0x16   :  { %s11118_s4 = sld [smem:[%s12046_s0 + %s11006_s28]]   ;;  %s11010_s28 = smov 21  }
  0x17   :  { %s11123_s30 = sld [smem:[%s12046_s0 + %s11007_s7]]   ;;  %s11011_s7 = smov 22  }
  0x18   :  { %s11143_s24 = sld [smem:[%s12046_s0 + %s11011_s7]]   ;;  %s11015_s7 = smov 26  }
  0x1a   :  { %12059 = sst [smem:[#allocation6_spill]] %s11108_s20 }
  0x1b   :  { %12060 = sst [smem:[#allocation7_spill]] %s11113_s27 }
  0x1c   :  { %12061 = sst [smem:[#allocation8_spill]] %s11118_s4 }
  0x1d   :  { %s11128_s20 = sld [smem:[%s12046_s0 + %s11008_s15]]   ;;  %s11012_s15 = smov 23  }
  0x1e   :  { %s11133_s27 = sld [smem:[%s12046_s0 + %s11009_s22]]   ;;  %s11013_s22 = smov 24  }
  0x1f   :  { %s11138_s4 = sld [smem:[%s12046_s0 + %s11010_s28]]   ;;  %s11014_s28 = smov 25  }
  0x20   :  { %12064 = sst [smem:[#allocation11_spill]] %s11143_s24 }
  0x21   :  { %s11148_s19 = sld [smem:[%s12046_s0 + %s11012_s15]]   ;;  %s11016_s15 = smov 27  }
  0x22   :  { %s11163_s24 = sld [smem:[%s12046_s0 + %s11015_s7]]   ;;  %s11019_s7 = smov 31  }
  0x23   :  { %s11168_s3 = sld [smem:[%s12046_s0 + %s11016_s15]]   ;;  %s11020_s15 = smov 32  }
  0x24   :  { %12062 = sst [smem:[#allocation9_spill]] %s11133_s27 }
  0x25   :  { %12063 = sst [smem:[#allocation10_spill]] %s11138_s4 }
  0x26   :  { %s11153_s27 = sld [smem:[%s12046_s0 + %s11013_s22]]   ;;  %s11017_s22 = smov 28  }
  0x27   :  { %s11158_s4 = sld [smem:[%s12046_s0 + %s11014_s28]]   ;;  %s11018_s28 = smov 30  }
  0x28   :  { %12067 = sst [smem:[#allocation14_spill]] %s11163_s24 }
  0x29   :  { %12068 = sst [smem:[#allocation15_spill]] %s11168_s3 }
  0x2a   :  { %s11183_s24 = sld [smem:[%s12046_s0 + %s11019_s7]]  }
  0x2b   :  { %s11188_s3 = sld [smem:[%s12046_s0 + %s11020_s15]]  }
  0x2c   :  { %12065 = sst [smem:[#allocation12_spill]] %s11153_s27 }
  0x2d   :  { %12066 = sst [smem:[#allocation13_spill]] %s11158_s4 }
  0x2e   :  { %s11173_s27 = sld [smem:[%s12046_s0 + %s11017_s22]]   ;;  %s11190_s22 = smov 0  }
  0x2f   :  { %s11178_s4 = sld [smem:[%s12046_s0 + %s11018_s28]]  }
  0x30 LB: > { %s8752_s23 = sadd.s32 4294967295, %s10988_s22   ;;  %p8756_p0 = scmp.ge.s32.totalorder %s10988_s22, 1  ;;  %s10988_s22 = sphi %s11190_s22, %s75_s22  }
  0x31   : > { %p904_p1 = scmp.lt.s32.totalorder %s10988_s22, 3 }
  0x33   : > { %p905_p2 = pnand %p8756_p0, %p904_p1 }
  0x34   : > { %p990_p3 = scmp.lt.s32.totalorder (!%p905_p2), %s8752_s23, 1  ;;  %s12069_s28 = sld [smem:[#allocation12_spill]] (!%p905_p2) }
  0x35   : > { %908 = sbr.rel (%p905_p2) target bundleno = 7206 (0x1c26), region = 148  ;;  %s12070_s1 = sld [smem:[#allocation2_spill]] (!%p905_p2) }
  0x36   : > { %s12071_s2 = sld [smem:[#allocation3_spill]] (!%p905_p2) }
  0x37   : > { %s12072_s7 = sld [smem:[#allocation4_spill]] (!%p905_p2) }
  0x38   : > { %s12073_s10 = sld [smem:[#allocation5_spill]] (!%p905_p2) }
  0x39   : > { %s12074_s11 = sld [smem:[#allocation6_spill]] (!%p905_p2) }
  0x3a   : > { %vm1016_vm0 = vcmask 1040384   ;;  %v11021_v0 = vmov 0   ;;  %s12084_s23 = smov (!%p990_p3, %s8752_s23), 1  ;;  %vm1017_vm1 = vcmask 1041408   ;;  %v11022_v1 = vmov 65535   ;;  %v10643_v9 = vld [vmem:[%s11038_s9 + $0xf8] sm:$0xff]  }
  0x3b   : > { %1058 = vmatprep.mubr.bf16.mxu0 %v11021_v0  ;;  %1138 = vmatprep.mubr.bf16.mxu1 %v11021_v0  ;;  %s9633_s0 = sshll.u32 %s12084_s23, 3  ;;  %v1018_v2 = vsel %vm1016_vm0, 4294967295, %v11022_v1  ;;  %v10644_v11 = vld [vmem:[%s11038_s9 + $0x78] sm:$0xff]   ;;  %v1011_v12 = vld [vmem:[%s11033_s5] sm:$0xf]  ;;  %vm1012_vm2 = vcmask 23552  }
  0x3c   : > { %10640 = vset.pattern.permute.xlu0 %v11021_v0  ;;  %10641 = vset.pattern.permute.xlu1 %v11021_v0  ;;  %s994_s26 = scalar_lea.vmem %s11178_s4, %s9633_s0  ;;  %v1019_v5 = vsel %vm1017_vm1, %v1018_v2, 0  ;;  %v8763_v13 = vld [vmem:[%s11033_s5 + $0x4] sm:$0xf]  ;;  %v10645_v14 = vld [vmem:[%s11038_s9 + $0xb8] sm:$0xff]   ;;  %v10647_v16 = vld [vmem:[%s11038_s9 + $0xf0] sm:$0xff]   ;;  %vm11024_vm3 = vmmov 0  }
  0x3d   : > { %v1005_v3 = vld [vmem:[%s994_s26] sm:$0x77]  ;;  %v10646_v15 = vld [vmem:[%s11038_s9 + $0x38] sm:$0xff]   ;;  %v10648_v17 = vld [vmem:[%s11038_s9 + $0x70] sm:$0xff]   ;;  %vm2988_vm4 = vcmask 64512   ;;  %vm3079_vm5 = vcmask 1043456  }
  0x3e   : > { %v1007_v4 = vcombine.high %v1005_v3, %v1005_v3  ;;  %v1009_v6 = vpack.c.bf16 %v1005_v3, %v1005_v3  ;;  %v10649_v18 = vld [vmem:[%s11038_s9 + $0xb0] sm:$0xff]   ;;  %v10651_v20 = vld [vmem:[%s11038_s9 + $0xe8] sm:$0xff]   ;;  %v10655_v24 = vld [vmem:[%s11038_s9 + $0xe0] sm:$0xff]   ;;  %vm3211_vm6 = vcmask 523264   ;;  %vm4382_vm7 = vcmask 130048   ;;  %s12075_s15 = sld [smem:[#allocation7_spill]] }
  0x3f   : > { %v10650_v19 = vld [vmem:[%s11038_s9 + $0x30] sm:$0xff]   ;;  %v10652_v21 = vld [vmem:[%s11038_s9 + $0x68] sm:$0xff]   ;;  %v10656_v25 = vld [vmem:[%s11038_s9 + $0x60] sm:$0xff]   ;;  %vm5176_vm8 = vcmask 31744   ;;  %vm5266_vm9 = vcmask 125952   ;;  %s8759_s16 = sshll.u32 %s12084_s23, 2 }
  0x40   : > { %v1010_v7 = vpack.c.bf16 %v1007_v4, %v1007_v4  ;;  %v11209_v8 = vand.u32 %v1019_v5, %v1009_v6  ;;  %v10653_v22 = vld [vmem:[%s11038_s9 + $0xa8] sm:$0xff]   ;;  %v10657_v26 = vld [vmem:[%s11038_s9 + $0xa0] sm:$0xff]   ;;  %v10659_v28 = vld [vmem:[%s11038_s9 + $0xd8] sm:$0xff]   ;;  %s998_s18 = scalar_lea.vmem %s11183_s24, %s8759_s16  ;;  %s12076_s26 = sld [smem:[#allocation8_spill]]  ;;  %vm8543_vm14 = vcmask 1042432  }
  0x41   : > { %v10654_v23 = vld [vmem:[%s11038_s9 + $0x28] sm:$0xff]   ;;  %v10658_v27 = vld [vmem:[%s11038_s9 + $0x20] sm:$0xff]   ;;  %v10660_v29 = vld [vmem:[%s11038_s9 + $0x58] sm:$0xff]   ;;  %s12080_s16 = sld [smem:[#allocation14_spill]] }
  0x42   : > { %v11212_v10 = vand.u32 %v1019_v5, %v1010_v7  ;;  %v10661_v30 = vld [vmem:[%s11038_s9 + $0x98] sm:$0xff]   ;;  %v10663_v32 = vld [vmem:[%s11038_s9 + $0xd0] sm:$0xff]   ;;  %v10667_v36 = vld [vmem:[%s11038_s9 + $0xc8] sm:$0xff]  }
  0x43   : > { %v10662_v31 = vld [vmem:[%s11038_s9 + $0x18] sm:$0xff]   ;;  %v10664_v33 = vld [vmem:[%s11038_s9 + $0x50] sm:$0xff]   ;;  %v10668_v37 = vld [vmem:[%s11038_s9 + $0x48] sm:$0xff]  }
  0x44   : > { %1040 = vmatprep.subr.bf16.mxu0 %v11212_v10  ;;  %1120 = vmatprep.subr.bf16.mxu1 %v11212_v10  ;;  %v10665_v34 = vld [vmem:[%s11038_s9 + $0x90] sm:$0xff]   ;;  %v10669_v38 = vld [vmem:[%s11038_s9 + $0x88] sm:$0xff]   ;;  %v10671_v40 = vld [vmem:[%s11038_s9 + $0xc0] sm:$0xff]  }
  0x45   : > { %1041 = vmatpush1.bf16.msra.mxu0 %v11209_v8  ;;  %1121 = vmatpush1.bf16.msra.mxu1 %v11209_v8  ;;  %v10666_v35 = vld [vmem:[%s11038_s9 + $0x10] sm:$0xff]   ;;  %v10670_v39 = vld [vmem:[%s11038_s9 + $0x8] sm:$0xff]   ;;  %v10672_v41 = vld [vmem:[%s11038_s9 + $0x40] sm:$0xff]  }
  0x46   : > { %9635 = vmatprep.subr.bf16.mxu0 %v10643_v9  ;;  %9657 = vmatprep.subr.bf16.mxu1 %v10644_v11  ;;  %v10673_v42 = vld [vmem:[%s11038_s9 + $0x80] sm:$0xff]   ;;  %v10675_v44 = vld [vmem:[%s11038_s9 + $0x178] sm:$0xff]   ;;  %v10677_v56 = vld [vmem:[%s11038_s9 + $0x170] sm:$0xff]  }
  0x47   : > { %v10674_v43 = vld [vmem:[%s11038_s9] sm:$0xff]   ;;  %v10676_v55 = vld [vmem:[%s11038_s9 + $0x138] sm:$0xff]   ;;  %v10678_v59 = vld [vmem:[%s11038_s9 + $0x130] sm:$0xff]  }
  0x48   : > { %8762 = vmatmul.mubr.msk.bf16.vlgmr.msra.gmra.mxu0 %vm1012_vm2, %v1011_v12  ;;  %8764 = vmatmul.mubr.msk.bf16.vlgmr.msra.gmra.mxu1 %vm1012_vm2, %v8763_v13  ;;  %v10679_v60 = vld [vmem:[%s11038_s9 + $0x168] sm:$0xff]   ;;  %v10680_v62 = vld [vmem:[%s11038_s9 + $0x1f8] sm:$0xff]   ;;  %v10683_v1 = vld [vmem:[%s11038_s9 + $0x160] sm:$0xff]  }
  0x49   : > { %9636 = vmatpush3.bf16.msra.mxu0 %v10645_v14  ;;  %9658 = vmatpush3.bf16.msra.mxu1 %v10646_v15  ;;  %v8829_v61 = vld [vmem:[%s11033_s5 + $0x8] sm:$0xf]  ;;  %v10685_v2 = vld [vmem:[%s11038_s9 + $0x120] sm:$0xff]   ;;  %v10687_v3 = vld [vmem:[%s11038_s9 + $0x158] sm:$0xff]  }
  0x4a   : > { %9637 = vmatprep.subr.bf16.mxu0 %v10647_v16  ;;  %9659 = vmatprep.subr.bf16.mxu1 %v10648_v17  ;;  %v10681_v63 = vld [vmem:[%s11038_s9 + $0x128] sm:$0xff]   ;;  %v10682_v5 = vld [vmem:[%s11038_s9 + $0x1b8] sm:$0xff]   ;;  %v10684_v6 = vld [vmem:[%s11038_s9 + $0x1f0] sm:$0xff]  }
  0x4b   : > { %v8879_v4 = vld [vmem:[%s11033_s5 + $0xc] sm:$0xf]  ;;  %v10689_v7 = vld [vmem:[%s11038_s9 + $0x118] sm:$0xff]   ;;  %v10686_v9 = vld [vmem:[%s11038_s9 + $0x1b0] sm:$0xff]  }
  0x4c   : > { %v10688_v11 = vld [vmem:[%s11038_s9 + $0x1e8] sm:$0xff]   ;;  %v10691_v13 = vld [vmem:[%s11038_s9 + $0x150] sm:$0xff]   ;;  %v10692_v14 = vld [vmem:[%s11038_s9 + $0x1e0] sm:$0xff]  }
  0x4d   : > { %9638 = vmatpush3.bf16.msra.mxu0 %v10649_v18  ;;  %9660 = vmatpush3.bf16.msra.mxu1 %v10650_v19  ;;  %v10690_v12 = vld [vmem:[%s11038_s9 + $0x1a8] sm:$0xff]   ;;  %v10693_v15 = vld [vmem:[%s11038_s9 + $0x110] sm:$0xff]   ;;  %v10694_v16 = vld [vmem:[%s11038_s9 + $0x1a0] sm:$0xff]  }
  0x4e   : > { %9639 = vmatprep.subr.bf16.mxu0 %v10651_v20  ;;  %9661 = vmatprep.subr.bf16.mxu1 %v10652_v21  ;;  %v10695_v17 = vld [vmem:[%s11038_s9 + $0x148] sm:$0xff]   ;;  %v10696_v18 = vld [vmem:[%s11038_s9 + $0x1d8] sm:$0xff]   ;;  %v10699_v21 = vld [vmem:[%s11038_s9 + $0x140] sm:$0xff]  }
  0x4f   : > { %v10697_v19 = vld [vmem:[%s11038_s9 + $0x108] sm:$0xff]   ;;  %v10698_v20 = vld [vmem:[%s11038_s9 + $0x198] sm:$0xff]  }
  0x51   : > { %9640 = vmatpush3.bf16.msra.mxu0 %v10653_v22  ;;  %9662 = vmatpush3.bf16.msra.mxu1 %v10654_v23  ;;  %v10700_v22 = vld [vmem:[%s11038_s9 + $0x1d0] sm:$0xff]   ;;  %v10701_v23 = vld [vmem:[%s11038_s9 + $0x100] sm:$0xff]  }
  0x52   : > { %9641 = vmatprep.subr.bf16.mxu0 %v10655_v24  ;;  %9663 = vmatprep.subr.bf16.mxu1 %v10656_v25  ;;  %v10702_v24 = vld [vmem:[%s11038_s9 + $0x190] sm:$0xff]   ;;  %v10703_v25 = vld [vmem:[%s11038_s9 + $0x1c8] sm:$0xff]  }
  0x55   : > { %9642 = vmatpush3.bf16.msra.mxu0 %v10657_v26  ;;  %9664 = vmatpush3.bf16.msra.mxu1 %v10658_v27  ;;  %v10704_v26 = vld [vmem:[%s11038_s9 + $0x188] sm:$0xff]   ;;  %v10705_v27 = vld [vmem:[%s11038_s9 + $0x1c0] sm:$0xff]  }
  0x56   : > { %9643 = vmatprep.subr.bf16.mxu0 %v10659_v28  ;;  %9665 = vmatprep.subr.bf16.mxu1 %v10660_v29  ;;  %v10706_v28 = vld [vmem:[%s11038_s9 + $0x180] sm:$0xff]  }
  0x59   : > { %9644 = vmatpush3.bf16.msra.mxu0 %v10661_v30  ;;  %9666 = vmatpush3.bf16.msra.mxu1 %v10662_v31 }
  0x5a   : > { %9645 = vmatprep.subr.bf16.mxu0 %v10663_v32  ;;  %9667 = vmatprep.subr.bf16.mxu1 %v10664_v33 }
  0x5d   : > { %9646 = vmatpush3.bf16.msra.mxu0 %v10665_v34  ;;  %9668 = vmatpush3.bf16.msra.mxu1 %v10666_v35 }
  0x5e   : > { %9647 = vmatprep.subr.bf16.mxu0 %v10667_v36  ;;  %9669 = vmatprep.subr.bf16.mxu1 %v10668_v37 }
  0x61   : > { %9648 = vmatpush3.bf16.msra.mxu0 %v10669_v38  ;;  %9670 = vmatpush3.bf16.msra.mxu1 %v10670_v39 }
  0x62   : > { %9649 = vmatprep.subr.bf16.mxu0 %v10671_v40  ;;  %9671 = vmatprep.subr.bf16.mxu1 %v10672_v41 }
  0x65   : > { %9650 = vmatpush3.bf16.msra.mxu0 %v10673_v42  ;;  %9672 = vmatpush3.bf16.msra.mxu1 %v10674_v43 }
  0x66   : > { %1473 = vmatprep.subr.bf16.mxu0 %v11212_v10  ;;  %9679 = vmatprep.subr.bf16.mxu1 %v10675_v44 }
 0x108   : > { %v1060_v45 = vpop.f32.mrf.mxu0  ;;  %v1140_v46 = vpop.f32.mrf.mxu1 }
 0x109   : > { %v1067_v47 = vpack.c.bf16 %v1060_v45, %v1060_v45  ;;  %v1147_v52 = vpack.c.bf16 %v1140_v46, %v1140_v46  ;;  %v10707_v45 = vld [vmem:[%s11038_s9 + $0x278] sm:$0xff]  }
 0x10a   : > { %v1062_v48 = vpop.f32.mrf.mxu0  ;;  %v1142_v49 = vpop.f32.mrf.mxu1 }
 0x10b   : > { %v1068_v50 = vpack.c.bf16 %v1062_v48, %v1062_v48  ;;  %v1148_v51 = vpack.c.bf16 %v1142_v49, %v1142_v49 }
 0x10c   : > { %v1144_v53 = vpop.f32.mrf.mxu1  ;;  %v1064_v54 = vpop.f32.mrf.mxu0 }
 0x10d   : > { %1310 = vmatprep.mubr.bf16.mxu0 %v1148_v51  ;;  %1446 = vmatprep.mubr.bf16.mxu1 %v1068_v50  ;;  %v8929_v51 = vld [vmem:[%s11033_s5 + $0x10] sm:$0xf]  ;;  %v10712_v53 = vld [vmem:[%s11038_s9 + $0x2f8] sm:$0xff]  }
 0x10e   : > { %v1145_v57 = vpop.f32.mrf.mxu1  ;;  %1311 = vmatmul.mubr.bf16.vlgmr.msra.gmra.mxu0 %v1147_v52  ;;  %1447 = vmatmul.mubr.bf16.vlgmr.msra.gmra.mxu1 %v1067_v47  ;;  %v1065_v58 = vpop.f32.mrf.mxu0  ;;  %v10708_v52 = vld [vmem:[%s11038_s9 + $0x238] sm:$0xff]  }
 0x10f   : > { %1474 = vmatpush1.bf16.msra.mxu0 %v11209_v8  ;;  %1491 = vmatprep.mubr.bf16.mxu0 %v11021_v0  ;;  %v10710_v57 = vld [vmem:[%s11038_s9 + $0x230] sm:$0xff]   ;;  %v10711_v58 = vld [vmem:[%s11038_s9 + $0x268] sm:$0xff]  }
 0x110   : > { %1691 = vmatprep.subr.bf16.mxu0 %v11212_v10  ;;  %9680 = vmatpush3.bf16.msra.mxu1 %v10676_v55  ;;  %v10709_v55 = vld [vmem:[%s11038_s9 + $0x270] sm:$0xff]  }
 0x111   : > { %9681 = vmatprep.subr.bf16.mxu1 %v10677_v56 }
 0x114   : > { %9682 = vmatpush3.bf16.msra.mxu1 %v10678_v59  ;;  %v8979_v59 = vld [vmem:[%s11033_s5 + $0x14] sm:$0xf] }
 0x115   : > { %9683 = vmatprep.subr.bf16.mxu1 %v10679_v60  ;;  %v10714_v60 = vld [vmem:[%s11038_s9 + $0x2b8] sm:$0xff]  }
 0x116   : > { %8830 = vmatmul.mubr.msk.bf16.vlgmr.msra.gmra.mxu0 %vm1012_vm2, %v8829_v61  ;;  %v10713_v61 = vld [vmem:[%s11038_s9 + $0x228] sm:$0xff]  }
 0x117   : > { %1692 = vmatpush1.bf16.msra.mxu0 %v11209_v8  ;;  %1709 = vmatprep.mubr.bf16.mxu0 %v11021_v0 }
 0x118   : > { %9701 = vmatprep.subr.bf16.mxu0 %v10680_v62  ;;  %9684 = vmatpush3.bf16.msra.mxu1 %v10681_v63  ;;  %v10716_v62 = vld [vmem:[%s11038_s9 + $0x2f0] sm:$0xff]   ;;  %v10715_v63 = vld [vmem:[%s11038_s9 + $0x260] sm:$0xff]  }
 0x119   : > { %9685 = vmatprep.subr.bf16.mxu1 %v10683_v1  ;;  %v10718_v1 = vld [vmem:[%s11038_s9 + $0x2b0] sm:$0xff]  }
 0x11c   : > { %9686 = vmatpush3.bf16.msra.mxu1 %v10685_v2  ;;  %v10717_v2 = vld [vmem:[%s11038_s9 + $0x220] sm:$0xff]  }
 0x11d   : > { %9687 = vmatprep.subr.bf16.mxu1 %v10687_v3  ;;  %v10720_v3 = vld [vmem:[%s11038_s9 + $0x2e8] sm:$0xff]  }
 0x11e   : > { %8880 = vmatmul.mubr.msk.bf16.vlgmr.msra.gmra.mxu0 %vm1012_vm2, %v8879_v4  ;;  %v10719_v4 = vld [vmem:[%s11038_s9 + $0x258] sm:$0xff]  }
 0x11f   : > { %9702 = vmatpush3.bf16.msra.mxu0 %v10682_v5  ;;  %v10722_v5 = vld [vmem:[%s11038_s9 + $0x2a8] sm:$0xff]  }
 0x120   : > { %9703 = vmatprep.subr.bf16.mxu0 %v10684_v6  ;;  %9688 = vmatpush3.bf16.msra.mxu1 %v10689_v7  ;;  %v10721_v6 = vld [vmem:[%s11038_s9 + $0x218] sm:$0xff]   ;;  %v10723_v7 = vld [vmem:[%s11038_s9 + $0x250] sm:$0xff]  }
 0x121   : > { %9689 = vmatprep.subr.bf16.mxu1 %v10691_v13  ;;  %v10727_v13 = vld [vmem:[%s11038_s9 + $0x248] sm:$0xff]  }
 0x123   : > { %9704 = vmatpush3.bf16.msra.mxu0 %v10686_v9  ;;  %v10724_v9 = vld [vmem:[%s11038_s9 + $0x2e0] sm:$0xff]  }
 0x124   : > { %9705 = vmatprep.subr.bf16.mxu0 %v10688_v11  ;;  %9690 = vmatpush3.bf16.msra.mxu1 %v10693_v15  ;;  %v10725_v11 = vld [vmem:[%s11038_s9 + $0x210] sm:$0xff]   ;;  %v10729_v15 = vld [vmem:[%s11038_s9 + $0x208] sm:$0xff]  }
 0x125   : > { %9691 = vmatprep.subr.bf16.mxu1 %v10695_v17  ;;  %v10731_v17 = vld [vmem:[%s11038_s9 + $0x240] sm:$0xff]  }
 0x127   : > { %9706 = vmatpush3.bf16.msra.mxu0 %v10690_v12  ;;  %v10726_v12 = vld [vmem:[%s11038_s9 + $0x2a0] sm:$0xff]  }
 0x128   : > { %9707 = vmatprep.subr.bf16.mxu0 %v10692_v14  ;;  %9692 = vmatpush3.bf16.msra.mxu1 %v10697_v19  ;;  %v10728_v14 = vld [vmem:[%s11038_s9 + $0x2d8] sm:$0xff]   ;;  %v10733_v19 = vld [vmem:[%s11038_s9 + $0x200] sm:$0xff]  }
 0x129   : > { %9693 = vmatprep.subr.bf16.mxu1 %v10699_v21  ;;  %v10735_v21 = vld [vmem:[%s11038_s9 + $0x2c8] sm:$0xff]  }
 0x12b   : > { %9708 = vmatpush3.bf16.msra.mxu0 %v10694_v16  ;;  %v10730_v16 = vld [vmem:[%s11038_s9 + $0x298] sm:$0xff]  }
 0x12c   : > { %9709 = vmatprep.subr.bf16.mxu0 %v10696_v18  ;;  %9694 = vmatpush3.bf16.msra.mxu1 %v10701_v23  ;;  %v10732_v18 = vld [vmem:[%s11038_s9 + $0x2d0] sm:$0xff]   ;;  %v10737_v23 = vld [vmem:[%s11038_s9 + $0x2c0] sm:$0xff]  }
 0x12d   : > { %1909 = vmatprep.subr.bf16.mxu1 %v11212_v10 }
 0x12f   : > { %9710 = vmatpush3.bf16.msra.mxu0 %v10698_v20  ;;  %v10734_v20 = vld [vmem:[%s11038_s9 + $0x290] sm:$0xff]  }
 0x130   : > { %9711 = vmatprep.subr.bf16.mxu0 %v10700_v22  ;;  %v10736_v22 = vld [vmem:[%s11038_s9 + $0x288] sm:$0xff]  }
 0x133   : > { %9712 = vmatpush3.bf16.msra.mxu0 %v10702_v24  ;;  %v10738_v24 = vld [vmem:[%s11038_s9 + $0x280] sm:$0xff]  }
 0x134   : > { %9713 = vmatprep.subr.bf16.mxu0 %v10703_v25 }
 0x137   : > { %9714 = vmatpush3.bf16.msra.mxu0 %v10704_v26 }
 0x138   : > { %9715 = vmatprep.subr.bf16.mxu0 %v10705_v27 }
 0x13b   : > { %9716 = vmatpush3.bf16.msra.mxu0 %v10706_v28 }
 0x13c   : > { %2127 = vmatprep.subr.bf16.mxu0 %v11212_v10 }
 0x1ce   : > { %v9651_v29 = vpop.f32.mrf.mxu0  ;;  %v9673_v30 = vpop.f32.mrf.mxu1 }
 0x1d0   : > { %v9652_v31 = vpop.f32.mrf.mxu0  ;;  %v9674_v32 = vpop.f32.mrf.mxu1 }
 0x1d1   : > { %v9653_v33 = vadd.f32 %v9652_v31, %v9651_v29  ;;  %v9675_v34 = vadd.f32 %v9674_v32, %v9673_v30 }
 0x1d2   : > { %v9654_v35 = vpop.f32.mrf.mxu0  ;;  %v9676_v36 = vpop.f32.mrf.mxu1 }
 0x1d3   : > { %v11297_v37 = vadd.f32 %v9675_v34, %v9653_v33 }
 0x1d4   : > { %v9655_v38 = vpop.f32.mrf.mxu0  ;;  %v9677_v39 = vpop.f32.mrf.mxu1 }
 0x1d6   : > { %v1493_v40 = vpop.f32.mrf.mxu0 }
 0x1d7   : > { %v1500_v43 = vpack.c.bf16 %v1493_v40, %v1493_v40 }
 0x1d8   : > { %v1495_v41 = vpop.f32.mrf.mxu0 }
 0x1d9   : > { %v1501_v42 = vpack.c.bf16 %v1495_v41, %v1495_v41  ;;  %v10739_v41 = vld [vmem:[%s11038_s9 + $0x378] sm:$0xff]  }
 0x1da   : > { %v1497_v44 = vpop.f32.mrf.mxu0 }
 0x1db   : > { %1663 = vmatprep.mubr.bf16.mxu1 %v1501_v42 }
 0x1dc   : > { %v1498_v46 = vpop.f32.mrf.mxu0  ;;  %1664 = vmatmul.mubr.bf16.vlgmr.msra.gmra.mxu1 %v1500_v43 }
 0x1dd   : > { %1910 = vmatpush1.bf16.msra.mxu1 %v11209_v8  ;;  %1927 = vmatprep.mubr.bf16.mxu1 %v11021_v0 }
 0x1de   : > { %v1711_v47 = vpop.f32.mrf.mxu0  ;;  %9723 = vmatprep.subr.bf16.mxu1 %v10707_v45 }
 0x1df   : > { %v1718_v48 = vpack.c.bf16 %v1711_v47, %v1711_v47 }
 0x1e0   : > { %v1713_v49 = vpop.f32.mrf.mxu0 }
 0x1e1   : > { %v1719_v50 = vpack.c.bf16 %v1713_v49, %v1713_v49  ;;  %v10740_v49 = vld [vmem:[%s11038_s9 + $0x338] sm:$0xff]  }
 0x1e2   : > { %v1715_v54 = vpop.f32.mrf.mxu0 }
 0x1e3   : > { %1881 = vmatprep.mubr.bf16.mxu0 %v1719_v50  ;;  %v10744_v50 = vld [vmem:[%s11038_s9 + $0x3f8] sm:$0xff]   ;;  %v10742_v54 = vld [vmem:[%s11038_s9 + $0x330] sm:$0xff]  }
 0x1e4   : > { %1882 = vmatmul.mubr.bf16.vlgmr.msra.gmra.mxu0 %v1718_v48  ;;  %8930 = vmatmul.mubr.msk.bf16.vlgmr.msra.gmra.mxu1 %vm1012_vm2, %v8929_v51  ;;  %v1716_v56 = vpop.f32.mrf.mxu0  ;;  %v9029_v48 = vld [vmem:[%s11033_s5 + $0x18] sm:$0xf] }
 0x1e5   : > { %2128 = vmatpush1.bf16.msra.mxu0 %v11209_v8  ;;  %2145 = vmatprep.mubr.bf16.mxu0 %v11021_v0  ;;  %v9079_v56 = vld [vmem:[%s11033_s5 + $0x1c] sm:$0xf] }
 0x1e6   : > { %9724 = vmatpush3.bf16.msra.mxu1 %v10708_v52  ;;  %9745 = vmatprep.subr.bf16.mxu0 %v10712_v53  ;;  %v10741_v52 = vld [vmem:[%s11038_s9 + $0x370] sm:$0xff]  }
 0x1e7   : > { %9725 = vmatprep.subr.bf16.mxu1 %v10709_v55  ;;  %v10743_v55 = vld [vmem:[%s11038_s9 + $0x368] sm:$0xff]  }
 0x1ea   : > { %9726 = vmatpush3.bf16.msra.mxu1 %v10710_v57  ;;  %v10746_v57 = vld [vmem:[%s11038_s9 + $0x3b8] sm:$0xff]  }
 0x1eb   : > { %9727 = vmatprep.subr.bf16.mxu1 %v10711_v58  ;;  %v10745_v58 = vld [vmem:[%s11038_s9 + $0x328] sm:$0xff]  }
 0x1ec   : > { %8980 = vmatmul.mubr.msk.bf16.vlgmr.msra.gmra.mxu0 %vm1012_vm2, %v8979_v59  ;;  %v10748_v59 = vld [vmem:[%s11038_s9 + $0x3f0] sm:$0xff]  }
 0x1ed   : > { %9746 = vmatpush3.bf16.msra.mxu0 %v10714_v60  ;;  %v10747_v60 = vld [vmem:[%s11038_s9 + $0x360] sm:$0xff]  }
 0x1ee   : > { %9728 = vmatpush3.bf16.msra.mxu1 %v10713_v61  ;;  %9747 = vmatprep.subr.bf16.mxu0 %v10716_v62  ;;  %v10750_v61 = vld [vmem:[%s11038_s9 + $0x3b0] sm:$0xff]   ;;  %v10749_v62 = vld [vmem:[%s11038_s9 + $0x320] sm:$0xff]  }
 0x1ef   : > { %9729 = vmatprep.subr.bf16.mxu1 %v10715_v63  ;;  %v10752_v63 = vld [vmem:[%s11038_s9 + $0x3e8] sm:$0xff]  }
 0x1f1   : > { %9748 = vmatpush3.bf16.msra.mxu0 %v10718_v1  ;;  %v10751_v1 = vld [vmem:[%s11038_s9 + $0x358] sm:$0xff]  }
 0x1f2   : > { %9730 = vmatpush3.bf16.msra.mxu1 %v10717_v2  ;;  %9749 = vmatprep.subr.bf16.mxu0 %v10720_v3  ;;  %v10754_v2 = vld [vmem:[%s11038_s9 + $0x3a8] sm:$0xff]   ;;  %v10753_v3 = vld [vmem:[%s11038_s9 + $0x318] sm:$0xff]  }
 0x1f3   : > { %9731 = vmatprep.subr.bf16.mxu1 %v10719_v4  ;;  %v10755_v4 = vld [vmem:[%s11038_s9 + $0x350] sm:$0xff]  }
 0x1f5   : > { %9750 = vmatpush3.bf16.msra.mxu0 %v10722_v5  ;;  %v10756_v5 = vld [vmem:[%s11038_s9 + $0x3e0] sm:$0xff]  }
 0x1f6   : > { %9732 = vmatpush3.bf16.msra.mxu1 %v10721_v6  ;;  %9751 = vmatprep.subr.bf16.mxu0 %v10724_v9  ;;  %v10757_v6 = vld [vmem:[%s11038_s9 + $0x310] sm:$0xff]   ;;  %v10759_v9 = vld [vmem:[%s11038_s9 + $0x348] sm:$0xff]  }
 0x1f7   : > { %9733 = vmatprep.subr.bf16.mxu1 %v10723_v7  ;;  %v10758_v7 = vld [vmem:[%s11038_s9 + $0x3a0] sm:$0xff]  }
 0x1f9   : > { %9752 = vmatpush3.bf16.msra.mxu0 %v10726_v12  ;;  %v10761_v12 = vld [vmem:[%s11038_s9 + $0x308] sm:$0xff]  }
 0x1fa   : > { %9734 = vmatpush3.bf16.msra.mxu1 %v10725_v11  ;;  %9753 = vmatprep.subr.bf16.mxu0 %v10728_v14  ;;  %v10760_v11 = vld [vmem:[%s11038_s9 + $0x3d8] sm:$0xff]   ;;  %v10763_v14 = vld [vmem:[%s11038_s9 + $0x340] sm:$0xff]  }
 0x1fb   : > { %9735 = vmatprep.subr.bf16.mxu1 %v10727_v13  ;;  %v10762_v13 = vld [vmem:[%s11038_s9 + $0x398] sm:$0xff]  }
 0x1fd   : > { %9754 = vmatpush3.bf16.msra.mxu0 %v10730_v16  ;;  %v10765_v16 = vld [vmem:[%s11038_s9 + $0x300] sm:$0xff]  }
 0x1fe   : > { %9736 = vmatpush3.bf16.msra.mxu1 %v10729_v15  ;;  %9755 = vmatprep.subr.bf16.mxu0 %v10732_v18  ;;  %v10764_v15 = vld [vmem:[%s11038_s9 + $0x3d0] sm:$0xff]   ;;  %v10767_v18 = vld [vmem:[%s11038_s9 + $0x3c8] sm:$0xff]  }
 0x1ff   : > { %9737 = vmatprep.subr.bf16.mxu1 %v10731_v17  ;;  %v10766_v17 = vld [vmem:[%s11038_s9 + $0x390] sm:$0xff]  }
 0x201   : > { %9756 = vmatpush3.bf16.msra.mxu0 %v10734_v20  ;;  %v10769_v20 = vld [vmem:[%s11038_s9 + $0x3c0] sm:$0xff]  }
 0x202   : > { %9738 = vmatpush3.bf16.msra.mxu1 %v10733_v19  ;;  %9757 = vmatprep.subr.bf16.mxu0 %v10735_v21  ;;  %v10768_v19 = vld [vmem:[%s11038_s9 + $0x388] sm:$0xff]   ;;  %v10770_v21 = vld [vmem:[%s11038_s9 + $0x380] sm:$0xff]  }
 0x203   : > { %2345 = vmatprep.subr.bf16.mxu1 %v11212_v10 }
 0x205   : > { %9758 = vmatpush3.bf16.msra.mxu0 %v10736_v22 }
 0x206   : > { %9759 = vmatprep.subr.bf16.mxu0 %v10737_v23 }
 0x209   : > { %9760 = vmatpush3.bf16.msra.mxu0 %v10738_v24 }
 0x20a   : > { %2563 = vmatprep.subr.bf16.mxu0 %v11212_v10 }
 0x29c   : > { %v9695_v25 = vpop.f32.mrf.mxu1 }
 0x29e   : > { %v9696_v26 = vpop.f32.mrf.mxu1 }
 0x29f   : > { %v9697_v27 = vadd.f32 %v9696_v26, %v9695_v25 }
 0x2a0   : > { %v9698_v28 = vpop.f32.mrf.mxu1 }
 0x2a1   : > { %v1671_v29 = vadd.f32 %v9697_v27, %v11297_v37 }
 0x2a2   : > { %v9699_v30 = vpop.f32.mrf.mxu1 }
 0x2a4   : > { %v9717_v31 = vpop.f32.mrf.mxu0  ;;  %v1929_v32 = vpop.f32.mrf.mxu1 }
 0x2a5   : > { %v1936_v38 = vpack.c.bf16 %v1929_v32, %v1929_v32 }
 0x2a6   : > { %v9718_v33 = vpop.f32.mrf.mxu0  ;;  %v1931_v34 = vpop.f32.mrf.mxu1 }
 0x2a7   : > { %v9719_v35 = vadd.f32 %v9718_v33, %v9717_v31  ;;  %v1937_v36 = vpack.c.bf16 %v1931_v34, %v1931_v34 }
 0x2a8   : > { %v9720_v39 = vpop.f32.mrf.mxu0  ;;  %v1933_v40 = vpop.f32.mrf.mxu1 }
 0x2a9   : > { %v11343_v42 = vadd.f32 %v9719_v35, %v1671_v29  ;;  %2099 = vmatprep.mubr.bf16.mxu1 %v1937_v36  ;;  %v10771_v36 = vld [vmem:[%s11038_s9 + $0x478] sm:$0xff]  }
 0x2aa   : > { %v9721_v43 = vpop.f32.mrf.mxu0  ;;  %v1934_v37 = vpop.f32.mrf.mxu1  ;;  %2100 = vmatmul.mubr.bf16.vlgmr.msra.gmra.mxu1 %v1936_v38 }
 0x2ab   : > { %2346 = vmatpush1.bf16.msra.mxu1 %v11209_v8  ;;  %2363 = vmatprep.mubr.bf16.mxu1 %v11021_v0 }
 0x2ac   : > { %v2147_v44 = vpop.f32.mrf.mxu0  ;;  %9767 = vmatprep.subr.bf16.mxu1 %v10739_v41 }
 0x2ad   : > { %v2154_v45 = vpack.c.bf16 %v2147_v44, %v2147_v44  ;;  %v9129_v44 = vld [vmem:[%s11033_s5 + $0x20] sm:$0xf] }
 0x2ae   : > { %v2149_v46 = vpop.f32.mrf.mxu0 }
 0x2af   : > { %v2155_v47 = vpack.c.bf16 %v2149_v46, %v2149_v46  ;;  %v10773_v46 = vld [vmem:[%s11038_s9 + $0x470] sm:$0xff]  }
 0x2b0   : > { %v2151_v51 = vpop.f32.mrf.mxu0 }
 0x2b1   : > { %2317 = vmatprep.mubr.bf16.mxu0 %v2155_v47  ;;  %v10777_v51 = vld [vmem:[%s11038_s9 + $0x460] sm:$0xff]  }
 0x2b2   : > { %2318 = vmatmul.mubr.bf16.vlgmr.msra.gmra.mxu0 %v2154_v45  ;;  %9030 = vmatmul.mubr.msk.bf16.vlgmr.msra.gmra.mxu1 %vm1012_vm2, %v9029_v48  ;;  %v2152_v53 = vpop.f32.mrf.mxu0  ;;  %v10772_v45 = vld [vmem:[%s11038_s9 + $0x438] sm:$0xff]   ;;  %v10774_v48 = vld [vmem:[%s11038_s9 + $0x430] sm:$0xff]  }
 0x2b3   : > { %2564 = vmatpush1.bf16.msra.mxu0 %v11209_v8  ;;  %2581 = vmatprep.mubr.bf16.mxu0 %v11021_v0  ;;  %v10779_v53 = vld [vmem:[%s11038_s9 + $0x458] sm:$0xff]  }
 0x2b4   : > { %9768 = vmatpush3.bf16.msra.mxu1 %v10740_v49  ;;  %9789 = vmatprep.subr.bf16.mxu0 %v10744_v50  ;;  %v10775_v49 = vld [vmem:[%s11038_s9 + $0x468] sm:$0xff]  }
 0x2b5   : > { %9769 = vmatprep.subr.bf16.mxu1 %v10741_v52  ;;  %v10776_v50 = vld [vmem:[%s11038_s9 + $0x428] sm:$0xff]   ;;  %v10778_v52 = vld [vmem:[%s11038_s9 + $0x420] sm:$0xff]  }
 0x2b8   : > { %9770 = vmatpush3.bf16.msra.mxu1 %v10742_v54  ;;  %v10780_v54 = vld [vmem:[%s11038_s9 + $0x418] sm:$0xff]  }
 0x2b9   : > { %9771 = vmatprep.subr.bf16.mxu1 %v10743_v55  ;;  %v10781_v55 = vld [vmem:[%s11038_s9 + $0x450] sm:$0xff]  }
 0x2ba   : > { %9080 = vmatmul.mubr.msk.bf16.vlgmr.msra.gmra.mxu0 %vm1012_vm2, %v9079_v56  ;;  %v10782_v56 = vld [vmem:[%s11038_s9 + $0x410] sm:$0xff]  }
 0x2bb   : > { %9790 = vmatpush3.bf16.msra.mxu0 %v10746_v57  ;;  %v10783_v57 = vld [vmem:[%s11038_s9 + $0x448] sm:$0xff]  }
 0x2bc   : > { %9772 = vmatpush3.bf16.msra.mxu1 %v10745_v58  ;;  %9791 = vmatprep.subr.bf16.mxu0 %v10748_v59  ;;  %v10784_v58 = vld [vmem:[%s11038_s9 + $0x408] sm:$0xff]   ;;  %v10785_v59 = vld [vmem:[%s11038_s9 + $0x440] sm:$0xff]  }
 0x2bd   : > { %9773 = vmatprep.subr.bf16.mxu1 %v10747_v60  ;;  %v10786_v60 = vld [vmem:[%s11038_s9 + $0x400] sm:$0xff]  }
 0x2bf   : > { %9792 = vmatpush3.bf16.msra.mxu0 %v10750_v61 }
 0x2c0   : > { %9774 = vmatpush3.bf16.msra.mxu1 %v10749_v62  ;;  %9793 = vmatprep.subr.bf16.mxu0 %v10752_v63 }
 0x2c1   : > { %9775 = vmatprep.subr.bf16.mxu1 %v10751_v1 }
 0x2c3   : > { %9794 = vmatpush3.bf16.msra.mxu0 %v10754_v2 }
 0x2c4   : > { %9776 = vmatpush3.bf16.msra.mxu1 %v10753_v3  ;;  %9795 = vmatprep.subr.bf16.mxu0 %v10756_v5 }
 0x2c5   : > { %9777 = vmatprep.subr.bf16.mxu1 %v10755_v4 }
 0x2c7   : > { %9796 = vmatpush3.bf16.msra.mxu0 %v10758_v7 }
 0x2c8   : > { %9778 = vmatpush3.bf16.msra.mxu1 %v10757_v6  ;;  %9797 = vmatprep.subr.bf16.mxu0 %v10760_v11 }
 0x2c9   : > { %9779 = vmatprep.subr.bf16.mxu1 %v10759_v9 }
 0x2cb   : > { %9798 = vmatpush3.bf16.msra.mxu0 %v10762_v13 }
 0x2cc   : > { %9780 = vmatpush3.bf16.msra.mxu1 %v10761_v12  ;;  %9799 = vmatprep.subr.bf16.mxu0 %v10764_v15 }
 0x2cd   : > { %9781 = vmatprep.subr.bf16.mxu1 %v10763_v14 }
 0x2cf   : > { %9800 = vmatpush3.bf16.msra.mxu0 %v10766_v17 }
 0x2d0   : > { %9782 = vmatpush3.bf16.msra.mxu1 %v10765_v16  ;;  %9801 = vmatprep.subr.bf16.mxu0 %v10767_v18  ;;  %v11023_v18 = vmov 0.0  }
 0x2d1   : > { %2781 = vmatprep.subr.bf16.mxu1 %v11212_v10 }
 0x2d3   : > { %9802 = vmatpush3.bf16.msra.mxu0 %v10768_v19  ;;  %v2982_v19 = vld [vmem:[%s11048_s17] sm:$0xff] }
 0x2d4   : > { %9803 = vmatprep.subr.bf16.mxu0 %v10769_v20  ;;  %2985 = vperm.xlu0 %10640, %v2982_v19   ;;  %v3065_v20 = vld [vmem:[%s11053_s21] sm:$0xff] }
 0x2d7   : > { %9804 = vmatpush3.bf16.msra.mxu0 %v10770_v21  ;;  %v5170_v21 = vld [vmem:[%s11098_s6] sm:$0xf] }
 0x2d8   : > { %10032 = vmatprep.subr.mxu0 %v11023_v18  ;;  %3069 = vperm.xlu0 %10640, %v3065_v20  }
 0x2dc   : > { %5173 = vperm.xlu0 %10640, %v5170_v21  }
 0x36a   : > { %v9739_v22 = vpop.f32.mrf.mxu1 }
 0x36c   : > { %v9740_v23 = vpop.f32.mrf.mxu1 }
 0x36d   : > { %v9741_v24 = vadd.f32 %v9740_v23, %v9739_v22 }
 0x36e   : > { %v9742_v25 = vpop.f32.mrf.mxu1 }
 0x36f   : > { %v2107_v26 = vadd.f32 %v9741_v24, %v11343_v42 }
 0x370   : > { %v9743_v27 = vpop.f32.mrf.mxu1 }
 0x372   : > { %v9761_v28 = vpop.f32.mrf.mxu0  ;;  %v2365_v29 = vpop.f32.mrf.mxu1 }
 0x373   : > { %v2372_v33 = vpack.c.bf16 %v2365_v29, %v2365_v29  ;;  %v2980_v29 = vld [vmem:[%s11043_s13] sm:$0xff] }
 0x374   : > { %v9762_v30 = vpop.f32.mrf.mxu0  ;;  %v2367_v31 = vpop.f32.mrf.mxu1 }
 0x375   : > { %v9763_v10 = vadd.f32 %v9762_v30, %v9761_v28  ;;  %v2373_v32 = vpack.c.bf16 %v2367_v31, %v2367_v31  ;;  %v10787_v30 = vld [vmem:[%s11063_s29 + $0x18] sm:$0xff]   ;;  %v10788_v31 = vld [vmem:[%s11063_s29 + $0x10] sm:$0xff]  }
 0x376   : > { %v9764_v34 = vpop.f32.mrf.mxu0  ;;  %v2369_v35 = vpop.f32.mrf.mxu1 }
 0x377   : > { %v2325_v38 = vadd.f32 %v9763_v10, %v2107_v26  ;;  %2535 = vmatprep.mubr.bf16.mxu1 %v2373_v32  ;;  %v10790_v10 = vld [vmem:[%s11063_s29 + $0x8] sm:$0xff]   ;;  %v2986_v32 = vpop.permute.xlu0 %2985 }
 0x378   : > { %v9765_v39 = vpop.f32.mrf.mxu0  ;;  %v2370_v40 = vpop.f32.mrf.mxu1  ;;  %2536 = vmatmul.mubr.bf16.vlgmr.msra.gmra.mxu1 %v2372_v33 }
 0x379   : > { %2782 = vmatpush1.bf16.msra.mxu1 %v11209_v8  ;;  %2799 = vmatprep.mubr.bf16.mxu1 %v11021_v0 }
 0x37a   : > { %v2583_v41 = vpop.f32.mrf.mxu0  ;;  %9811 = vmatprep.subr.bf16.mxu1 %v10771_v36 }
 0x37b   : > { %v2590_v42 = vpack.c.bf16 %v2583_v41, %v2583_v41  ;;  %v3070_v40 = vpop.permute.xlu0 %3069 }
 0x37c   : > { %v2585_v43 = vpop.f32.mrf.mxu0 }
 0x37d   : > { %v2591_v37 = vpack.c.bf16 %v2585_v43, %v2585_v43 }
 0x37e   : > { %v2587_v47 = vpop.f32.mrf.mxu0 }
 0x37f   : > { %2753 = vmatprep.mubr.bf16.mxu0 %v2591_v37  ;;  %v10789_v47 = vld [vmem:[%s11063_s29 + $0x38] sm:$0xff]  }
 0x380   : > { %2754 = vmatmul.mubr.bf16.vlgmr.msra.gmra.mxu0 %v2590_v42  ;;  %9130 = vmatmul.mubr.msk.bf16.vlgmr.msra.gmra.mxu1 %vm1012_vm2, %v9129_v44  ;;  %v2588_v8 = vpop.f32.mrf.mxu0 }
 0x381   : > { %9812 = vmatpush3.bf16.msra.mxu1 %v10772_v45  ;;  %10034 = vmatprep.mubr.msk.f32.mxu0 %vm11024_vm3, %v11023_v18  ;;  %v3075_v45 = vld [vmem:[%s11058_s25] sm:$0xf]  ;;  %v10791_v8 = vld [vmem:[%s11063_s29 + $0x30] sm:$0xff]  }
 0x382   : > { %9813 = vmatprep.subr.bf16.mxu1 %v10773_v46  ;;  %v9181_v46 = vld [vmem:[%s11058_s25 + $0x4] sm:$0xf] }
 0x385   : > { %9814 = vmatpush3.bf16.msra.mxu1 %v10774_v48  ;;  %v10792_v48 = vld [vmem:[%s11063_s29] sm:$0xff]  }
 0x386   : > { %9815 = vmatprep.subr.bf16.mxu1 %v10775_v49  ;;  %v10793_v49 = vld [vmem:[%s11063_s29 + $0x28] sm:$0xff]  }
 0x389   : > { %9816 = vmatpush3.bf16.msra.mxu1 %v10776_v50  ;;  %v10794_v50 = vld [vmem:[%s11063_s29 + $0x20] sm:$0xff]  }
 0x38a   : > { %9817 = vmatprep.subr.bf16.mxu1 %v10777_v51 }
 0x38d   : > { %9818 = vmatpush3.bf16.msra.mxu1 %v10778_v52 }
 0x38e   : > { %9819 = vmatprep.subr.bf16.mxu1 %v10779_v53 }
 0x391   : > { %9820 = vmatpush3.bf16.msra.mxu1 %v10780_v54 }
 0x392   : > { %9821 = vmatprep.subr.bf16.mxu1 %v10781_v55 }
 0x395   : > { %9822 = vmatpush3.bf16.msra.mxu1 %v10782_v56 }
 0x396   : > { %9823 = vmatprep.subr.bf16.mxu1 %v10783_v57 }
 0x399   : > { %9824 = vmatpush3.bf16.msra.mxu1 %v10784_v58 }
 0x39a   : > { %9825 = vmatprep.subr.bf16.mxu1 %v10785_v59 }
 0x39d   : > { %9826 = vmatpush3.bf16.msra.mxu1 %v10786_v60 }
 0x39e   : > { %10061 = vmatprep.subr.bf16.mxu1 %v11023_v18 }
 0x438   : > { %v9783_v61 = vpop.f32.mrf.mxu1 }
 0x43a   : > { %v9784_v62 = vpop.f32.mrf.mxu1 }
 0x43b   : > { %v9785_v63 = vadd.f32 %v9784_v62, %v9783_v61  ;;  %v9201_v61 = vld [vmem:[%s11058_s25 + $0x8] sm:$0xf]  ;;  %v9216_v62 = vld [vmem:[%s11058_s25 + $0xc] sm:$0xf] }
 0x43c   : > { %v9786_v1 = vpop.f32.mrf.mxu1 }
 0x43d   : > { %v2543_v2 = vadd.f32 %v9785_v63, %v2325_v38  ;;  %v10795_v63 = vld [vmem:[%s11063_s29 + $0x58] sm:$0xff]   ;;  %v10796_v1 = vld [vmem:[%s11063_s29 + $0x50] sm:$0xff]  }
 0x43e   : > { %v9787_v3 = vpop.f32.mrf.mxu1 }
 0x43f   : > { %v10798_v3 = vld [vmem:[%s11063_s29 + $0x78] sm:$0xff]  }
 0x440   : > { %v9805_v4 = vpop.f32.mrf.mxu0  ;;  %v2801_v5 = vpop.f32.mrf.mxu1 }
 0x441   : > { %v2808_v12 = vpack.c.bf16 %v2801_v5, %v2801_v5  ;;  %v10800_v5 = vld [vmem:[%s11063_s29 + $0x70] sm:$0xff]  }
 0x442   : > { %v9806_v6 = vpop.f32.mrf.mxu0  ;;  %v2803_v7 = vpop.f32.mrf.mxu1 }
 0x443   : > { %v9807_v9 = vadd.f32 %v9806_v6, %v9805_v4  ;;  %v2809_v11 = vpack.c.bf16 %v2803_v7, %v2803_v7  ;;  %v10799_v4 = vld [vmem:[%s11063_s29 + $0x40] sm:$0xff]   ;;  %v10801_v6 = vld [vmem:[%s11063_s29 + $0x68] sm:$0xff]  }
 0x444   : > { %v2805_v13 = vpop.f32.mrf.mxu1  ;;  %v9808_v14 = vpop.f32.mrf.mxu0  ;;  %v10802_v7 = vld [vmem:[%s11063_s29 + $0x60] sm:$0xff]  }
 0x445   : > { %v2761_v15 = vadd.f32 %v9807_v9, %v2543_v2  ;;  %2971 = vmatprep.mubr.bf16.mxu1 %v2809_v11  ;;  %v10797_v2 = vld [vmem:[%s11063_s29 + $0x48] sm:$0xff]  }
 0x446   : > { %v2806_v16 = vpop.f32.mrf.mxu1  ;;  %2972 = vmatmul.mubr.bf16.vlgmr.msra.gmra.mxu1 %v2808_v12  ;;  %v9809_v17 = vpop.f32.mrf.mxu0 }
 0x447   : > { %10069 = vmatprep.mubr.msk.bf16.mxu1 %vm11024_vm3, %v11023_v18  ;;  %10062 = vmatpush3.bf16.msra.mxu1 %v10787_v30 }
 0x448   : > { %10063 = vmatprep.subr.bf16.mxu1 %v11023_v18 }
 0x44b   : > { %10064 = vmatpush3.bf16.msra.mxu1 %v10788_v31  ;;  %v10804_v31 = vld [vmem:[%s11063_s29 + $0x90] sm:$0xff]  }
 0x44c   : > { %10065 = vmatprep.subr.bf16.mxu1 %v11023_v18 }
 0x44f   : > { %10066 = vmatpush3.bf16.msra.mxu1 %v10790_v10 }
 0x450   : > { %10067 = vmatprep.subr.bf16.mxu1 %v11023_v18 }
 0x453   : > { %10068 = vmatpush3.bf16.msra.mxu1 %v10792_v48 }
 0x454   : > { %10079 = vmatprep.subr.bf16.mxu1 %v11023_v18 }
 0x506   : > { %v9827_v22 = vpop.f32.mrf.mxu1 }
 0x508   : > { %v9828_v23 = vpop.f32.mrf.mxu1 }
 0x509   : > { %v9829_v24 = vadd.f32 %v9828_v23, %v9827_v22 }
 0x50a   : > { %v9830_v25 = vpop.f32.mrf.mxu1 }
 0x50b   : > { %v2979_v26 = vadd.f32 %v9829_v24, %v2761_v15 }
 0x50c   : > { %v9831_v27 = vpop.f32.mrf.mxu1 }
 0x50d   : > { %v2981_v28 = vmul.f32 %v2979_v26, %v2979_v26 }
 0x50f   : > { %10033 = vmatpush3.msra.mxu0 %v2981_v28  ;;  %v10803_v28 = vld [vmem:[%s11063_s29 + $0x98] sm:$0xff]  }
 0x510   : > { %10035 = vmatmul.mubr.msk.f32.vlgmr.msra.gmra.mxu0 %vm2988_vm4, %v2980_v29  ;;  %10037 = vmatprep.subr.bf16.mxu0 %v11023_v18 }
 0x511   : > { %10039 = vmatprep.mubr.msk.bf16.mxu0 %vm11024_vm3, %v11023_v18 }
 0x5d0   : > { %v3058_v33 = vpop.f32.mrf.mxu0 }
 0x5d1   : > { %v3059_v34 = vadd.f32 %v3058_v33, %v2986_v32  ;;  %v9246_v32 = vld [vmem:[%s11058_s25 + $0x14] sm:$0xf]  ;;  %v10805_v33 = vld [vmem:[%s11063_s29 + $0x88] sm:$0xff]  }
 0x5d2   : > { %v10036_v35 = vpop.f32.mrf.mxu0 }
 0x5d3   : > { %10958 = vrsqrt.f32 %v3059_v34  ;;  %v10806_v34 = vld [vmem:[%s11063_s29 + $0xb8] sm:$0xff]   ;;  %v10807_v35 = vld [vmem:[%s11063_s29 + $0x80] sm:$0xff]  }
 0x5e0   : > { %v10959_v36 = vpop.eup %10958 }
 0x5e1   : > { %v3063_v38 = vmul.f32 %v10959_v36, %v2979_v26  ;;  %v9231_v26 = vld [vmem:[%s11058_s25 + $0x10] sm:$0xf] }
 0x5e2   : > { %v10808_v36 = vld [vmem:[%s11063_s29 + $0xb0] sm:$0xff]  }
 0x5e3   : > { %v3066_v39 = vmin.f32 %v3063_v38, 0.0  ;;  %v3064_v41 = vmax.f32 %v3063_v38, 0.0  ;;  %v10809_v38 = vld [vmem:[%s11063_s29 + $0xa8] sm:$0xff]  }
 0x5e5   : > { %v3072_v42 = vmul.f32 %v3070_v40, %v3066_v39  ;;  %v10810_v39 = vld [vmem:[%s11063_s29 + $0xa0] sm:$0xff]  }
 0x5e7   : > { %v3073_v43 = vadd.f32 %v3072_v42, %v3064_v41 }
 0x5e9   : > { %v3074_v37 = vpack.c.bf16 %v3073_v43, %v3073_v43 }
 0x5eb   : > { %v11427_v44 = vsel %vm3079_vm5, %v3074_v37, 0 }
 0x5ec   : > { %10038 = vmatpush3.bf16.msra.mxu0 %v11427_v44 }
 0x5ed   : > { %10043 = vmatprep.subr.bf16.mxu0 %v11023_v18 }
 0x5ef   : > { %10040 = vmatmul.mubr.msk.bf16.vlgmr.msra.gmra.mxu0 %vm2988_vm4, %v3075_v45 }
 0x5f0   : > { %10044 = vmatpush3.bf16.msra.mxu0 %v11427_v44  ;;  %10045 = vmatprep.mubr.msk.bf16.mxu0 %vm11024_vm3, %v11023_v18 }
 0x5f1   : > { %10049 = vmatprep.subr.bf16.mxu0 %v11023_v18 }
 0x5f7   : > { %10046 = vmatmul.mubr.msk.bf16.vlgmr.msra.gmra.mxu0 %vm2988_vm4, %v9181_v46 }
 0x5f8   : > { %10050 = vmatpush3.bf16.msra.mxu0 %v10789_v47  ;;  %10057 = vmatprep.mubr.msk.bf16.mxu0 %vm11024_vm3, %v11023_v18 }
 0x5f9   : > { %10051 = vmatprep.subr.bf16.mxu0 %v11023_v18 }
 0x5fc   : > { %10052 = vmatpush3.bf16.msra.mxu0 %v10791_v8 }
 0x5fd   : > { %10053 = vmatprep.subr.bf16.mxu0 %v11023_v18 }
 0x600   : > { %10054 = vmatpush3.bf16.msra.mxu0 %v10793_v49 }
 0x601   : > { %10055 = vmatprep.subr.bf16.mxu0 %v11023_v18 }
 0x604   : > { %10056 = vmatpush3.bf16.msra.mxu0 %v10794_v50 }
 0x605   : > { %10073 = vmatprep.subr.bf16.mxu0 %v11023_v18 }
 0x6af   : > { %v3117_v51 = vpop.f32.mrf.mxu0 }
 0x6b0   : > { %v3123_v52 = vpack.c.bf16 %v3117_v51, %v3117_v51 }
 0x6b1   : > { %v10041_v53 = vpop.f32.mrf.mxu0 }
 0x6b2   : > { %10070 = vmatmul.mubr.msk.bf16.vlgmr.msra.gmra.mxu1 %vm3211_vm6, %v3123_v52 }
 0x6b3   : > { %v3120_v54 = vpop.f32.mrf.mxu0  ;;  %10087 = vmatprep.mubr.msk.bf16.mxu1 %vm11024_vm3, %v11023_v18  ;;  %10080 = vmatpush3.bf16.msra.mxu1 %v10795_v63  ;;  %v10813_v63 = vld [vmem:[%s11063_s29 + $0xc8] sm:$0xff]  }
 0x6b4   : > { %10081 = vmatprep.subr.bf16.mxu1 %v11023_v18 }
 0x6b5   : > { %v10042_v55 = vpop.f32.mrf.mxu0 }
 0x6b6   : > { %v9261_v55 = vld [vmem:[%s11058_s25 + $0x18] sm:$0xf] }
 0x6b7   : > { %v3171_v56 = vpop.f32.mrf.mxu0  ;;  %10082 = vmatpush3.bf16.msra.mxu1 %v10796_v1  ;;  %v10814_v1 = vld [vmem:[%s11063_s29 + $0xf8] sm:$0xff]  }
 0x6b8   : > { %v3177_v57 = vpack.c.bf16 %v3171_v56, %v3171_v56  ;;  %10083 = vmatprep.subr.bf16.mxu1 %v11023_v18 }
 0x6b9   : > { %v10047_v58 = vpop.f32.mrf.mxu0 }
 0x6ba   : > { %10058 = vmatmul.mubr.msk.bf16.vlgmr.msra.gmra.mxu0 %vm3211_vm6, %v3177_v57  ;;  %v10811_v57 = vld [vmem:[%s11063_s29 + $0xd8] sm:$0xff]  }
 0x6bb   : > { %10074 = vmatpush3.bf16.msra.mxu0 %v11427_v44  ;;  %v3174_v59 = vpop.f32.mrf.mxu0  ;;  %10075 = vmatprep.mubr.msk.bf16.mxu0 %vm11024_vm3, %v11023_v18 }
 0x6bc   : > { %10091 = vmatprep.subr.bf16.mxu0 %v11023_v18  ;;  %10084 = vmatpush3.bf16.msra.mxu1 %v10797_v2  ;;  %v10815_v2 = vld [vmem:[%s11063_s29 + $0xc0] sm:$0xff]  }
 0x6bd   : > { %v10048_v60 = vpop.f32.mrf.mxu0  ;;  %10085 = vmatprep.subr.bf16.mxu1 %v11023_v18 }
 0x6be   : > { %v10812_v60 = vld [vmem:[%s11063_s29 + $0xd0] sm:$0xff]  }
 0x6c0   : > { %10086 = vmatpush3.bf16.msra.mxu1 %v10799_v4  ;;  %v10817_v4 = vld [vmem:[%s11063_s29 + $0xe8] sm:$0xff]  }
 0x6c1   : > { %10109 = vmatprep.subr.bf16.mxu1 %v11023_v18 }
 0x6c2   : > { %10076 = vmatmul.mubr.msk.bf16.vlgmr.msra.gmra.mxu0 %vm2988_vm4, %v9201_v61 }
 0x6c3   : > { %10092 = vmatpush3.bf16.msra.mxu0 %v11427_v44  ;;  %10093 = vmatprep.mubr.msk.bf16.mxu0 %vm11024_vm3, %v11023_v18 }
 0x6c4   : > { %10097 = vmatprep.subr.bf16.mxu0 %v11023_v18 }
 0x6ca   : > { %10094 = vmatmul.mubr.msk.bf16.vlgmr.msra.gmra.mxu0 %vm2988_vm4, %v9216_v62  ;;  %v9276_v62 = vld [vmem:[%s11058_s25 + $0x1c] sm:$0xf] }
 0x6cb   : > { %10105 = vmatprep.mubr.msk.bf16.mxu0 %vm11024_vm3, %v11023_v18  ;;  %10098 = vmatpush3.bf16.msra.mxu0 %v10798_v3  ;;  %v10816_v3 = vld [vmem:[%s11063_s29 + $0xf0] sm:$0xff]  }
 0x6cc   : > { %10099 = vmatprep.subr.bf16.mxu0 %v11023_v18 }
 0x6cf   : > { %10100 = vmatpush3.bf16.msra.mxu0 %v10800_v5  ;;  %v10818_v5 = vld [vmem:[%s11063_s29 + $0xe0] sm:$0xff]  }
 0x6d0   : > { %10101 = vmatprep.subr.bf16.mxu0 %v11023_v18 }
 0x6d3   : > { %10102 = vmatpush3.bf16.msra.mxu0 %v10801_v6 }
 0x6d4   : > { %10103 = vmatprep.subr.bf16.mxu0 %v11023_v18 }
 0x6d7   : > { %10104 = vmatpush3.bf16.msra.mxu0 %v10802_v7 }
 0x6d8   : > { %10127 = vmatprep.subr.bf16.mxu0 %v11023_v18 }
 0x772   : > { %v3316_v9 = vpop.f32.mrf.mxu1 }
 0x774   : > { %v10071_v11 = vpop.f32.mrf.mxu1 }
 0x776   : > { %v3319_v12 = vpop.f32.mrf.mxu1 }
 0x778   : > { %v10072_v13 = vpop.f32.mrf.mxu1 }
 0x77a   : > { %v3249_v14 = vpop.f32.mrf.mxu0 }
 0x77b   : > { %v3317_v15 = vadd.f32 %v3316_v9, %v3249_v14 }
 0x77c   : > { %v10059_v16 = vpop.f32.mrf.mxu0 }
 0x77e   : > { %v3252_v17 = vpop.f32.mrf.mxu0 }
 0x780   : > { %v10060_v19 = vpop.f32.mrf.mxu0 }
 0x782   : > { %v3361_v20 = vpop.f32.mrf.mxu0 }
 0x783   : > { %v3367_v21 = vpack.c.bf16 %v3361_v20, %v3361_v20 }
 0x784   : > { %v10077_v22 = vpop.f32.mrf.mxu0 }
 0x785   : > { %10088 = vmatmul.mubr.msk.bf16.vlgmr.msra.gmra.mxu1 %vm3211_vm6, %v3367_v21 }
 0x786   : > { %10110 = vmatpush3.bf16.msra.mxu1 %v11427_v44  ;;  %v3364_v23 = vpop.f32.mrf.mxu0  ;;  %10111 = vmatprep.mubr.msk.bf16.mxu1 %vm11024_vm3, %v11023_v18 }
 0x787   : > { %10115 = vmatprep.subr.bf16.mxu1 %v11023_v18 }
 0x788   : > { %v10078_v24 = vpop.f32.mrf.mxu0 }
 0x78a   : > { %v3484_v25 = vpop.f32.mrf.mxu0 }
 0x78b   : > { %v3490_v27 = vpack.c.bf16 %v3484_v25, %v3484_v25  ;;  %v9291_v25 = vld [vmem:[%s11058_s25 + $0x20] sm:$0xf] }
 0x78c   : > { %v10095_v29 = vpop.f32.mrf.mxu0 }
 0x78d   : > { %10106 = vmatmul.mubr.msk.bf16.vlgmr.msra.gmra.mxu0 %vm3211_vm6, %v3490_v27  ;;  %10112 = vmatmul.mubr.msk.bf16.vlgmr.msra.gmra.mxu1 %vm2988_vm4, %v9231_v26  ;;  %v10819_v26 = vld [vmem:[%s11063_s29 + $0x118] sm:$0xff]  }
 0x78e   : > { %10128 = vmatpush3.bf16.msra.mxu0 %v11427_v44  ;;  %10129 = vmatprep.mubr.msk.bf16.mxu0 %vm11024_vm3, %v11023_v18  ;;  %v3487_v30 = vpop.f32.mrf.mxu0 }
 0x78f   : > { %10116 = vmatpush3.bf16.msra.mxu1 %v10803_v28  ;;  %10133 = vmatprep.subr.bf16.mxu0 %v11023_v18  ;;  %v10820_v30 = vld [vmem:[%s11063_s29 + $0x110] sm:$0xff]  }
 0x790   : > { %10117 = vmatprep.subr.bf16.mxu1 %v11023_v18  ;;  %v10096_v10 = vpop.f32.mrf.mxu0  ;;  %10123 = vmatprep.mubr.msk.bf16.mxu1 %vm11024_vm3, %v11023_v18 }
 0x791   : > { %v10822_v10 = vld [vmem:[%s11063_s29 + $0x100] sm:$0xff]  }
 0x793   : > { %10118 = vmatpush3.bf16.msra.mxu1 %v10804_v31  ;;  %v10821_v31 = vld [vmem:[%s11063_s29 + $0x108] sm:$0xff]  }
 0x794   : > { %10119 = vmatprep.subr.bf16.mxu1 %v11023_v18 }
 0x795   : > { %10130 = vmatmul.mubr.msk.bf16.vlgmr.msra.gmra.mxu0 %vm2988_vm4, %v9246_v32 }
 0x796   : > { %10141 = vmatprep.mubr.msk.bf16.mxu0 %vm11024_vm3, %v11023_v18  ;;  %10134 = vmatpush3.bf16.msra.mxu0 %v10806_v34 }
 0x797   : > { %10120 = vmatpush3.bf16.msra.mxu1 %v10805_v33  ;;  %10135 = vmatprep.subr.bf16.mxu0 %v11023_v18 }
 0x798   : > { %10121 = vmatprep.subr.bf16.mxu1 %v11023_v18 }
 0x79a   : > { %10136 = vmatpush3.bf16.msra.mxu0 %v10808_v36 }
 0x79b   : > { %10122 = vmatpush3.bf16.msra.mxu1 %v10807_v35  ;;  %10137 = vmatprep.subr.bf16.mxu0 %v11023_v18 }
 0x79c   : > { %10145 = vmatprep.subr.bf16.mxu1 %v11023_v18 }
 0x79e   : > { %10138 = vmatpush3.bf16.msra.mxu0 %v10809_v38 }
 0x79f   : > { %10139 = vmatprep.subr.bf16.mxu0 %v11023_v18 }
 0x7a2   : > { %10140 = vmatpush3.bf16.msra.mxu0 %v10810_v39 }
 0x7a3   : > { %10163 = vmatprep.subr.bf16.mxu0 %v11023_v18 }
 0x845   : > { %v3438_v40 = vpop.f32.mrf.mxu1 }
 0x846   : > { %v3444_v41 = vadd.f32 %v3438_v40, %v3317_v15 }
 0x847   : > { %v10089_v42 = vpop.f32.mrf.mxu1 }
 0x849   : > { %v3441_v43 = vpop.f32.mrf.mxu1 }
 0x84b   : > { %v10090_v37 = vpop.f32.mrf.mxu1 }
 0x84d   : > { %v3561_v45 = vpop.f32.mrf.mxu0  ;;  %v3607_v46 = vpop.f32.mrf.mxu1 }
 0x84e   : > { %v3567_v47 = vadd.f32 %v3561_v45, %v3444_v41  ;;  %v3613_v8 = vpack.c.bf16 %v3607_v46, %v3607_v46 }
 0x84f   : > { %v10107_v48 = vpop.f32.mrf.mxu0  ;;  %v10113_v49 = vpop.f32.mrf.mxu1 }
 0x850   : > { %10124 = vmatmul.mubr.msk.bf16.vlgmr.msra.gmra.mxu1 %vm3211_vm6, %v3613_v8  ;;  %v4185_v8 = vld [vmem:[%s11073_s8] sm:$0xff] }
 0x851   : > { %10146 = vmatpush3.bf16.msra.mxu1 %v11427_v44  ;;  %v3564_v50 = vpop.f32.mrf.mxu0  ;;  %v3610_v51 = vpop.f32.mrf.mxu1  ;;  %10147 = vmatprep.mubr.msk.bf16.mxu1 %vm11024_vm3, %v11023_v18  ;;  %v4267_v48 = vld [vmem:[%s11078_s14] sm:$0xff] }
 0x852   : > { %10151 = vmatprep.subr.bf16.mxu1 %v11023_v18  ;;  %4188 = vperm.xlu1 %10641, %v4185_v8   ;;  %v5256_v49 = vld [vmem:[%s11103_s12] sm:$0xf] }
 0x853   : > { %v10108_v52 = vpop.f32.mrf.mxu0  ;;  %v10114_v53 = vpop.f32.mrf.mxu1  ;;  %v6177_v50 = vld [vmem:[%s11123_s30] sm:$0xff] }
 0x854   : > { %v6265_v51 = vld [vmem:[%s11128_s20] sm:$0xff] }
 0x855   : > { %v3730_v54 = vpop.f32.mrf.mxu0  ;;  %v7167_v52 = vld [vmem:[%s11148_s19] sm:$0xff] }
 0x856   : > { %v3736_v56 = vpack.c.bf16 %v3730_v54, %v3730_v54  ;;  %4271 = vperm.xlu1 %10641, %v4267_v48   ;;  %v7255_v53 = vld [vmem:[%s12069_s28] sm:$0xff]  ;;  %s12077_s28 = sld [smem:[#allocation9_spill]] }
 0x857   : > { %v10131_v58 = vpop.f32.mrf.mxu0  ;;  %v8534_v54 = vld [vmem:[%s11173_s27] sm:$0x7] }
 0x858   : > { %10142 = vmatmul.mubr.msk.bf16.vlgmr.msra.gmra.mxu0 %vm3211_vm6, %v3736_v56  ;;  %10148 = vmatmul.mubr.msk.bf16.vlgmr.msra.gmra.mxu1 %vm2988_vm4, %v9261_v55 }
 0x859   : > { %10164 = vmatpush3.bf16.msra.mxu0 %v11427_v44  ;;  %10165 = vmatprep.mubr.msk.bf16.mxu0 %vm11024_vm3, %v11023_v18  ;;  %v3733_v59 = vpop.f32.mrf.mxu0 }
 0x85a   : > { %10152 = vmatpush3.bf16.msra.mxu1 %v10811_v57  ;;  %10169 = vmatprep.subr.bf16.mxu0 %v11023_v18  ;;  %v4183_v59 = vld [vmem:[%s12070_s1] sm:$0xff]  ;;  %s12078_s1 = sld [smem:[#allocation10_spill]] }
 0x85b   : > { %10153 = vmatprep.subr.bf16.mxu1 %v11023_v18  ;;  %v10132_v61 = vpop.f32.mrf.mxu0  ;;  %10159 = vmatprep.mubr.msk.bf16.mxu1 %vm11024_vm3, %v11023_v18 }
 0x85c   : > { %5260 = vperm.xlu1 %10641, %v5256_v49  }
 0x85e   : > { %10154 = vmatpush3.bf16.msra.mxu1 %v10812_v60 }
 0x85f   : > { %10155 = vmatprep.subr.bf16.mxu1 %v11023_v18 }
 0x860   : > { %10166 = vmatmul.mubr.msk.bf16.vlgmr.msra.gmra.mxu0 %vm2988_vm4, %v9276_v62  ;;  %6180 = vperm.xlu1 %10641, %v6177_v50  }
 0x861   : > { %10177 = vmatprep.mubr.msk.bf16.mxu0 %vm11024_vm3, %v11023_v18  ;;  %10170 = vmatpush3.bf16.msra.mxu0 %v10814_v1 }
 0x862   : > { %10156 = vmatpush3.bf16.msra.mxu1 %v10813_v63  ;;  %10171 = vmatprep.subr.bf16.mxu0 %v11023_v18 }
 0x863   : > { %10157 = vmatprep.subr.bf16.mxu1 %v11023_v18 }
 0x864   : > { %6269 = vperm.xlu1 %10641, %v6265_v51   ;;  %v10827_v51 = vld [vmem:[%s12072_s7 + $0x20] sm:$0xff]  }
 0x865   : > { %10172 = vmatpush3.bf16.msra.mxu0 %v10816_v3 }
 0x866   : > { %10158 = vmatpush3.bf16.msra.mxu1 %v10815_v2  ;;  %10173 = vmatprep.subr.bf16.mxu0 %v11023_v18 }
 0x867   : > { %10181 = vmatprep.subr.bf16.mxu1 %v11023_v18 }
 0x868   : > { %7170 = vperm.xlu1 %10641, %v7167_v52  }
 0x869   : > { %10174 = vmatpush3.bf16.msra.mxu0 %v10817_v4 }
 0x86a   : > { %10175 = vmatprep.subr.bf16.mxu0 %v11023_v18 }
 0x86c   : > { %7259 = vperm.xlu1 %10641, %v7255_v53  }
 0x86d   : > { %10176 = vmatpush3.bf16.msra.mxu0 %v10818_v5 }
 0x86e   : > { %10204 = vmatprep.subr.bf16.mxu0 %v11023_v18 }
 0x870   : > { %8537 = vperm.xlu1 %10641, %v8534_v54  }
 0x8cd   : > { %v4189_v62 = vpop.permute.xlu1 %4188 }
 0x910   : > { %v3684_v6 = vpop.f32.mrf.mxu1 }
 0x911   : > { %v3690_v7 = vadd.f32 %v3684_v6, %v3567_v47  ;;  %v4272_v6 = vpop.permute.xlu1 %4271 }
 0x912   : > { %v10125_v9 = vpop.f32.mrf.mxu1 }
 0x914   : > { %v3687_v11 = vpop.f32.mrf.mxu1 }
 0x916   : > { %v10126_v12 = vpop.f32.mrf.mxu1 }
 0x918   : > { %v3807_v13 = vpop.f32.mrf.mxu0  ;;  %v3853_v14 = vpop.f32.mrf.mxu1 }
 0x919   : > { %v3813_v15 = vadd.f32 %v3807_v13, %v3690_v7  ;;  %v3859_v16 = vpack.c.bf16 %v3853_v14, %v3853_v14  ;;  %v4277_v14 = vld [vmem:[%s12071_s2] sm:$0x3] }
 0x91a   : > { %v10143_v17 = vpop.f32.mrf.mxu0  ;;  %v10149_v19 = vpop.f32.mrf.mxu1 }
 0x91b   : > { %10160 = vmatmul.mubr.msk.bf16.vlgmr.msra.gmra.mxu1 %vm3211_vm6, %v3859_v16  ;;  %v10823_v16 = vld [vmem:[%s12072_s7] sm:$0xff]   ;;  %v10824_v17 = vld [vmem:[%s12072_s7 + $0x8] sm:$0xff]  }
 0x91c   : > { %10182 = vmatpush3.bf16.msra.mxu1 %v11427_v44  ;;  %v3810_v20 = vpop.f32.mrf.mxu0  ;;  %v3856_v21 = vpop.f32.mrf.mxu1  ;;  %10183 = vmatprep.mubr.msk.bf16.mxu1 %vm11024_vm3, %v11023_v18 }
 0x91d   : > { %10187 = vmatprep.subr.bf16.mxu1 %v11023_v18 }
 0x91e   : > { %v10144_v22 = vpop.f32.mrf.mxu0  ;;  %v10150_v23 = vpop.f32.mrf.mxu1 }
 0x920   : > { %v3976_v24 = vpop.f32.mrf.mxu0 }
 0x921   : > { %v3982_v27 = vpack.c.bf16 %v3976_v24, %v3976_v24 }
 0x922   : > { %v10167_v28 = vpop.f32.mrf.mxu0 }
 0x923   : > { %10178 = vmatmul.mubr.msk.bf16.vlgmr.msra.gmra.mxu0 %vm3211_vm6, %v3982_v27  ;;  %10184 = vmatmul.mubr.msk.bf16.vlgmr.msra.gmra.mxu1 %vm2988_vm4, %v9291_v25 }
 0x924   : > { %10188 = vmatpush3.bf16.msra.mxu1 %v10819_v26  ;;  %v3979_v44 = vpop.f32.mrf.mxu0  ;;  %10195 = vmatprep.mubr.msk.bf16.mxu1 %vm11024_vm3, %v11023_v18 }
 0x925   : > { %10189 = vmatprep.subr.bf16.mxu1 %v11023_v18  ;;  %10206 = vmatprep.mubr.msk.bf16.mxu0 %vm11024_vm3, %v11023_v18  ;;  %v9316_v44 = vld [vmem:[%s12071_s2 + $0x4] sm:$0x3] }
 0x926   : > { %v10168_v29 = vpop.f32.mrf.mxu0 }
 0x927   : > { %v9322_v29 = vld [vmem:[%s12071_s2 + $0x6] sm:$0x3] }
 0x928   : > { %10190 = vmatpush3.bf16.msra.mxu1 %v10820_v30  ;;  %v9328_v30 = vld [vmem:[%s12071_s2 + $0x8] sm:$0x3] }
 0x929   : > { %10191 = vmatprep.subr.bf16.mxu1 %v11023_v18 }
 0x92c   : > { %10192 = vmatpush3.bf16.msra.mxu1 %v10821_v31  ;;  %v9334_v31 = vld [vmem:[%s12071_s2 + $0xa] sm:$0x3] }
 0x92d   : > { %10193 = vmatprep.subr.bf16.mxu1 %v11023_v18 }
 0x930   : > { %10194 = vmatpush3.bf16.msra.mxu1 %v10822_v10  ;;  %v9340_v10 = vld [vmem:[%s12071_s2 + $0xc] sm:$0x3] }
 0x931   : > { %10199 = vmatprep.subr.mxu1 %v11023_v18 }
 0x9db   : > { %v3930_v32 = vpop.f32.mrf.mxu1 }
 0x9dc   : > { %v3936_v33 = vadd.f32 %v3930_v32, %v3813_v15  ;;  %v9308_v15 = vld [vmem:[%s12071_s2 + $0x2] sm:$0x3]  ;;  %v9346_v32 = vld [vmem:[%s12071_s2 + $0xe] sm:$0x3] }
 0x9dd   : > { %v10161_v34 = vpop.f32.mrf.mxu1 }
 0x9de   : > { %v10825_v34 = vld [vmem:[%s12072_s7 + $0x10] sm:$0xff]  }
 0x9df   : > { %v3933_v35 = vpop.f32.mrf.mxu1 }
 0x9e1   : > { %v10162_v36 = vpop.f32.mrf.mxu1 }
 0x9e3   : > { %v4053_v38 = vpop.f32.mrf.mxu0  ;;  %v4099_v39 = vpop.f32.mrf.mxu1 }
 0x9e4   : > { %v4059_v40 = vadd.f32 %v4053_v38, %v3936_v33  ;;  %v4105_v41 = vpack.c.bf16 %v4099_v39, %v4099_v39  ;;  %v9352_v33 = vld [vmem:[%s12071_s2 + $0x10] sm:$0x3] }
 0x9e5   : > { %v10185_v42 = vpop.f32.mrf.mxu1  ;;  %v10179_v43 = vpop.f32.mrf.mxu0 }
 0x9e6   : > { %10196 = vmatmul.mubr.msk.bf16.vlgmr.msra.gmra.mxu1 %vm3211_vm6, %v4105_v41 }
 0x9e7   : > { %v4102_v37 = vpop.f32.mrf.mxu1  ;;  %v4056_v45 = vpop.f32.mrf.mxu0  ;;  %10201 = vmatprep.mubr.msk.f32.mxu1 %vm11024_vm3, %v11023_v18 }
 0x9e9   : > { %v10186_v46 = vpop.f32.mrf.mxu1  ;;  %v10180_v47 = vpop.f32.mrf.mxu0 }
 0x9ea   : > { %v10826_v46 = vld [vmem:[%s12072_s7 + $0x18] sm:$0xff]  }
 0xaa6   : > { %v4176_v55 = vpop.f32.mrf.mxu1 }
 0xaa7   : > { %v4182_v56 = vadd.f32 %v4176_v55, %v4059_v40 }
 0xaa8   : > { %v10197_v57 = vpop.f32.mrf.mxu1 }
 0xaa9   : > { %v4184_v58 = vmul.f32 %v4182_v56, %v4182_v56  ;;  %v10828_v57 = vld [vmem:[%s12072_s7 + $0x28] sm:$0xff]  }
 0xaaa   : > { %v4179_v60 = vpop.f32.mrf.mxu1 }
 0xaab   : > { %10200 = vmatpush3.msra.mxu1 %v4184_v58 }
 0xaac   : > { %v10198_v61 = vpop.f32.mrf.mxu1  ;;  %10202 = vmatmul.mubr.msk.f32.vlgmr.msra.gmra.mxu1 %vm2988_vm4, %v4183_v59  ;;  %10216 = vmatprep.subr.bf16.mxu1 %v11023_v18 }
 0xaad   : > { %10218 = vmatprep.mubr.msk.bf16.mxu1 %vm11024_vm3, %v11023_v18  ;;  %10217 = vmatpush3.bf16.msra.mxu1 %v10824_v17 }
 0xaae   : > { %10228 = vmatprep.subr.bf16.mxu1 %v11023_v18 }
 0xb6c   : > { %v4260_v63 = vpop.f32.mrf.mxu1 }
 0xb6d   : > { %v4261_v1 = vadd.f32 %v4260_v63, %v4189_v62  ;;  %v10829_v63 = vld [vmem:[%s12072_s7 + $0x30] sm:$0xff]  }
 0xb6e   : > { %v10203_v2 = vpop.f32.mrf.mxu1 }
 0xb6f   : > { %10960 = vrsqrt.f32 %v4261_v1 }
 0xb7c   : > { %v10961_v3 = vpop.eup %10960 }
 0xb7d   : > { %v4265_v4 = vmul.f32 %v10961_v3, %v4182_v56 }
 0xb7f   : > { %v4268_v5 = vmin.f32 %v4265_v4, 0.0  ;;  %v4266_v7 = vmax.f32 %v4265_v4, 0.0 }
 0xb81   : > { %v4274_v9 = vmul.f32 %v4272_v6, %v4268_v5  ;;  %v10830_v6 = vld [vmem:[%s12072_s7 + $0x38] sm:$0xff]  }
 0xb83   : > { %v4275_v11 = vadd.f32 %v4274_v9, %v4266_v7 }
 0xb85   : > { %v4276_v12 = vpack.c.bf16 %v4275_v11, %v4275_v11 }
 0xb87   : > { %v4282_v13 = vsel %vm3079_vm5, %v4276_v12, 0 }
 0xb88   : > { %10205 = vmatpush3.bf16.msra.mxu0 %v4282_v13 }
 0xb89   : > { %10210 = vmatprep.subr.bf16.mxu0 %v11023_v18 }
 0xb8b   : > { %10207 = vmatmul.mubr.msk.bf16.vlgmr.msra.gmra.mxu0 %vm2988_vm4, %v4277_v14  ;;  %v10831_v14 = vld [vmem:[%s12072_s7 + $0x40] sm:$0xff]  }
 0xb8c   : > { %10211 = vmatpush3.bf16.msra.mxu0 %v4282_v13  ;;  %10212 = vmatprep.mubr.msk.bf16.mxu0 %vm11024_vm3, %v11023_v18 }
 0xb8d   : > { %10222 = vmatprep.subr.bf16.mxu0 %v11023_v18 }
 0xb93   : > { %10213 = vmatmul.mubr.msk.bf16.vlgmr.msra.gmra.mxu0 %vm2988_vm4, %v9308_v15 }
 0xb94   : > { %10224 = vmatprep.mubr.msk.bf16.mxu0 %vm11024_vm3, %v11023_v18  ;;  %10223 = vmatpush3.bf16.msra.mxu0 %v10823_v16 }
 0xb95   : > { %10234 = vmatprep.subr.bf16.mxu0 %v11023_v18 }
 0xc4b   : > { %v4318_v19 = vpop.f32.mrf.mxu0 }
 0xc4c   : > { %v4324_v20 = vpack.c.bf16 %v4318_v19, %v4318_v19 }
 0xc4d   : > { %v10208_v21 = vpop.f32.mrf.mxu0 }
 0xc4e   : > { %10225 = vmatmul.mubr.msk.bf16.vlgmr.msra.gmra.mxu0 %vm4382_vm7, %v4324_v20 }
 0xc4f   : > { %v4321_v22 = vpop.f32.mrf.mxu0  ;;  %10236 = vmatprep.mubr.msk.bf16.mxu0 %vm11024_vm3, %v11023_v18  ;;  %10235 = vmatpush3.bf16.msra.mxu0 %v10825_v34 }
 0xc50   : > { %10246 = vmatprep.subr.bf16.mxu0 %v11023_v18 }
 0xc51   : > { %v10209_v23 = vpop.f32.mrf.mxu0 }
 0xc53   : > { %v4366_v24 = vpop.f32.mrf.mxu0 }
 0xc54   : > { %v4372_v25 = vpack.c.bf16 %v4366_v24, %v4366_v24 }
 0xc55   : > { %v10214_v26 = vpop.f32.mrf.mxu0 }
 0xc56   : > { %10219 = vmatmul.mubr.msk.bf16.vlgmr.msra.gmra.mxu1 %vm4382_vm7, %v4372_v25 }
 0xc57   : > { %10229 = vmatpush3.bf16.msra.mxu1 %v4282_v13  ;;  %v4369_v27 = vpop.f32.mrf.mxu0  ;;  %10230 = vmatprep.mubr.msk.bf16.mxu1 %vm11024_vm3, %v11023_v18 }
 0xc58   : > { %10240 = vmatprep.subr.bf16.mxu1 %v11023_v18 }
 0xc59   : > { %v10215_v28 = vpop.f32.mrf.mxu0 }
 0xc5e   : > { %10231 = vmatmul.mubr.msk.bf16.vlgmr.msra.gmra.mxu1 %vm2988_vm4, %v9316_v44 }
 0xc5f   : > { %10241 = vmatpush3.bf16.msra.mxu1 %v4282_v13  ;;  %10242 = vmatprep.mubr.msk.bf16.mxu1 %vm11024_vm3, %v11023_v18 }
 0xc60   : > { %10252 = vmatprep.subr.bf16.mxu1 %v11023_v18 }
 0xc66   : > { %10243 = vmatmul.mubr.msk.bf16.vlgmr.msra.gmra.mxu1 %vm2988_vm4, %v9322_v29 }
 0xc67   : > { %10253 = vmatpush3.bf16.msra.mxu1 %v4282_v13  ;;  %10254 = vmatprep.mubr.msk.bf16.mxu1 %vm11024_vm3, %v11023_v18 }
 0xc68   : > { %10264 = vmatprep.subr.bf16.mxu1 %v11023_v18 }
 0xc6e   : > { %10255 = vmatmul.mubr.msk.bf16.vlgmr.msra.gmra.mxu1 %vm2988_vm4, %v9328_v30 }
 0xc6f   : > { %10265 = vmatpush3.bf16.msra.mxu1 %v4282_v13  ;;  %10266 = vmatprep.mubr.msk.bf16.mxu1 %vm11024_vm3, %v11023_v18 }
 0xc70   : > { %10276 = vmatprep.subr.bf16.mxu1 %v11023_v18 }
 0xc76   : > { %10267 = vmatmul.mubr.msk.bf16.vlgmr.msra.gmra.mxu1 %vm2988_vm4, %v9334_v31 }
 0xc77   : > { %10277 = vmatpush3.bf16.msra.mxu1 %v4282_v13  ;;  %10278 = vmatprep.mubr.msk.bf16.mxu1 %vm11024_vm3, %v11023_v18 }
 0xc78   : > { %10288 = vmatprep.subr.bf16.mxu1 %v11023_v18 }
 0xc7e   : > { %10279 = vmatmul.mubr.msk.bf16.vlgmr.msra.gmra.mxu1 %vm2988_vm4, %v9340_v10 }
 0xc7f   : > { %10289 = vmatpush3.bf16.msra.mxu1 %v4282_v13  ;;  %10290 = vmatprep.mubr.msk.bf16.mxu1 %vm11024_vm3, %v11023_v18 }
 0xc80   : > { %10300 = vmatprep.subr.bf16.mxu1 %v11023_v18 }
 0xc86   : > { %10291 = vmatmul.mubr.msk.bf16.vlgmr.msra.gmra.mxu1 %vm2988_vm4, %v9346_v32 }
 0xc87   : > { %10301 = vmatpush3.bf16.msra.mxu1 %v4282_v13  ;;  %10302 = vmatprep.mubr.msk.bf16.mxu1 %vm11024_vm3, %v11023_v18 }
 0xc88   : > { %10312 = vmatprep.subr.mxu1 %v11023_v18 }
 0xc8e   : > { %10303 = vmatmul.mubr.msk.bf16.vlgmr.msra.gmra.mxu1 %vm2988_vm4, %v9352_v33 }
 0xc8f   : > { %10314 = vmatprep.mubr.msk.f32.mxu1 %vm11024_vm3, %v11023_v18 }
 0xd0e   : > { %v4469_v35 = vpop.f32.mrf.mxu0 }
 0xd10   : > { %v10226_v36 = vpop.f32.mrf.mxu0 }
 0xd12   : > { %v4472_v38 = vpop.f32.mrf.mxu0 }
 0xd14   : > { %v10227_v39 = vpop.f32.mrf.mxu0 }
 0xd16   : > { %v4420_v40 = vpop.f32.mrf.mxu1 }
 0xd17   : > { %v11647_v41 = vadd.f32 %v4469_v35, %v4420_v40 }
 0xd18   : > { %v10220_v42 = vpop.f32.mrf.mxu1 }
 0xd1a   : > { %v4423_v43 = vpop.f32.mrf.mxu1 }
 0xd1c   : > { %v10221_v37 = vpop.f32.mrf.mxu1 }
 0xd1e   : > { %v4514_v45 = vpop.f32.mrf.mxu1 }
 0xd1f   : > { %v4520_v47 = vpack.c.bf16 %v4514_v45, %v4514_v45 }
 0xd20   : > { %v10232_v8 = vpop.f32.mrf.mxu1 }
 0xd21   : > { %10237 = vmatmul.mubr.msk.bf16.vlgmr.msra.gmra.mxu0 %vm4382_vm7, %v4520_v47 }
 0xd22   : > { %v4517_v48 = vpop.f32.mrf.mxu1  ;;  %10247 = vmatpush3.bf16.msra.mxu0 %v10826_v46  ;;  %10248 = vmatprep.mubr.msk.bf16.mxu0 %vm11024_vm3, %v11023_v18 }
 0xd23   : > { %10258 = vmatprep.subr.bf16.mxu0 %v11023_v18 }
 0xd24   : > { %v10233_v49 = vpop.f32.mrf.mxu1 }
 0xd26   : > { %v4613_v50 = vpop.f32.mrf.mxu1 }
 0xd27   : > { %v4619_v52 = vpack.c.bf16 %v4613_v50, %v4613_v50 }
 0xd28   : > { %v10244_v53 = vpop.f32.mrf.mxu1 }
 0xd29   : > { %10249 = vmatmul.mubr.msk.bf16.vlgmr.msra.gmra.mxu0 %vm4382_vm7, %v4619_v52 }
 0xd2a   : > { %v4616_v54 = vpop.f32.mrf.mxu1  ;;  %10259 = vmatpush3.bf16.msra.mxu0 %v10827_v51  ;;  %10260 = vmatprep.mubr.msk.bf16.mxu0 %vm11024_vm3, %v11023_v18 }
 0xd2b   : > { %10270 = vmatprep.subr.bf16.mxu0 %v11023_v18 }
 0xd2c   : > { %v10245_v55 = vpop.f32.mrf.mxu1 }
 0xd2e   : > { %v4712_v56 = vpop.f32.mrf.mxu1 }
 0xd2f   : > { %v4718_v58 = vpack.c.bf16 %v4712_v56, %v4712_v56 }
 0xd30   : > { %v10256_v59 = vpop.f32.mrf.mxu1 }
 0xd31   : > { %10261 = vmatmul.mubr.msk.bf16.vlgmr.msra.gmra.mxu0 %vm4382_vm7, %v4718_v58  ;;  %v5168_v58 = vld [vmem:[%s12073_s10] sm:$0xf]  ;;  %s12079_s10 = sld [smem:[#allocation11_spill]] }
 0xd32   : > { %v4715_v60 = vpop.f32.mrf.mxu1  ;;  %10271 = vmatpush3.bf16.msra.mxu0 %v10828_v57  ;;  %10272 = vmatprep.mubr.msk.bf16.mxu0 %vm11024_vm3, %v11023_v18 }
 0xd33   : > { %10282 = vmatprep.subr.bf16.mxu0 %v11023_v18  ;;  %v5174_v60 = vpop.permute.xlu0 %5173 }
 0xd34   : > { %v10257_v61 = vpop.f32.mrf.mxu1 }
 0xd36   : > { %v4811_v62 = vpop.f32.mrf.mxu1 }
 0xd37   : > { %v4817_v1 = vpack.c.bf16 %v4811_v62, %v4811_v62 }
 0xd38   : > { %v10268_v2 = vpop.f32.mrf.mxu1 }
 0xd39   : > { %10273 = vmatmul.mubr.msk.bf16.vlgmr.msra.gmra.mxu0 %vm4382_vm7, %v4817_v1 }
 0xd3a   : > { %v4814_v3 = vpop.f32.mrf.mxu1  ;;  %10283 = vmatpush3.bf16.msra.mxu0 %v10829_v63  ;;  %10284 = vmatprep.mubr.msk.bf16.mxu0 %vm11024_vm3, %v11023_v18 }
 0xd3b   : > { %10294 = vmatprep.subr.bf16.mxu0 %v11023_v18 }
 0xd3c   : > { %v10269_v4 = vpop.f32.mrf.mxu1 }
 0xd3d   : > { %v5261_v4 = vpop.permute.xlu1 %5260 }
 0xd3e   : > { %v4910_v5 = vpop.f32.mrf.mxu1 }
 0xd3f   : > { %v4916_v7 = vpack.c.bf16 %v4910_v5, %v4910_v5 }
 0xd40   : > { %v10280_v9 = vpop.f32.mrf.mxu1 }
 0xd41   : > { %10285 = vmatmul.mubr.msk.bf16.vlgmr.msra.gmra.mxu0 %vm4382_vm7, %v4916_v7 }
 0xd42   : > { %v4913_v11 = vpop.f32.mrf.mxu1  ;;  %10295 = vmatpush3.bf16.msra.mxu0 %v10830_v6  ;;  %10296 = vmatprep.mubr.msk.bf16.mxu0 %vm11024_vm3, %v11023_v18 }
 0xd43   : > { %10306 = vmatprep.subr.bf16.mxu0 %v11023_v18 }
 0xd44   : > { %v10281_v12 = vpop.f32.mrf.mxu1 }
 0xd46   : > { %v5009_v13 = vpop.f32.mrf.mxu1 }
 0xd47   : > { %v5015_v15 = vpack.c.bf16 %v5009_v13, %v5009_v13 }
 0xd48   : > { %v10292_v16 = vpop.f32.mrf.mxu1 }
 0xd49   : > { %10297 = vmatmul.mubr.msk.bf16.vlgmr.msra.gmra.mxu0 %vm4382_vm7, %v5015_v15 }
 0xd4a   : > { %v5012_v17 = vpop.f32.mrf.mxu1  ;;  %10307 = vmatpush3.bf16.msra.mxu0 %v10831_v14  ;;  %10308 = vmatprep.mubr.msk.bf16.mxu0 %vm11024_vm3, %v11023_v18 }
 0xd4b   : > { %10323 = vmatprep.subr.bf16.mxu0 %v11023_v18 }
 0xd4c   : > { %v10293_v19 = vpop.f32.mrf.mxu1 }
 0xd4e   : > { %v5108_v20 = vpop.f32.mrf.mxu1 }
 0xd4f   : > { %v5114_v21 = vpack.c.bf16 %v5108_v20, %v5108_v20 }
 0xd50   : > { %v10304_v22 = vpop.f32.mrf.mxu1 }
 0xd51   : > { %10309 = vmatmul.mubr.msk.bf16.vlgmr.msra.gmra.mxu0 %vm4382_vm7, %v5114_v21  ;;  %v5281_v22 = vld [vmem:[%s998_s18] sm:$0xf]  ;;  %s12081_s18 = sld [smem:[#allocation13_spill]] }
 0xd52   : > { %v5111_v23 = vpop.f32.mrf.mxu1  ;;  %10325 = vmatprep.mubr.msk.bf16.mxu0 %vm11024_vm3, %v11023_v18 }
 0xd54   : > { %v10305_v24 = vpop.f32.mrf.mxu1 }
 0xd55   : > { %v5282_v24 = vmul.f32 0.31622776, %v5281_v22 }
 0xde1   : > { %v4567_v25 = vpop.f32.mrf.mxu0 }
 0xde2   : > { %v4573_v37 = vadd.f32 %v4567_v25, %v11647_v41 }
 0xde3   : > { %v10238_v26 = vpop.f32.mrf.mxu0 }
 0xde5   : > { %v4570_v27 = vpop.f32.mrf.mxu0 }
 0xde7   : > { %v10239_v28 = vpop.f32.mrf.mxu0 }
 0xde9   : > { %v4666_v44 = vpop.f32.mrf.mxu0 }
 0xdea   : > { %v4672_v46 = vadd.f32 %v4666_v44, %v4573_v37  ;;  %v9369_v37 = vld [vmem:[%s12074_s11 + $0x8] sm:$0xf] }
 0xdeb   : > { %v10250_v29 = vpop.f32.mrf.mxu0 }
 0xdec   : > { %v5285_v29 = vld [vmem:[%s12074_s11] sm:$0xf] }
 0xded   : > { %v4669_v30 = vpop.f32.mrf.mxu0 }
 0xdee   : > { %v9361_v30 = vld [vmem:[%s12074_s11 + $0x4] sm:$0xf] }
 0xdef   : > { %v10251_v31 = vpop.f32.mrf.mxu0 }
 0xdf0   : > { %v10832_v31 = vld [vmem:[%s12075_s15 + $0x8] sm:$0xff]  }
 0xdf1   : > { %v4765_v10 = vpop.f32.mrf.mxu0 }
 0xdf2   : > { %v4771_v8 = vadd.f32 %v4765_v10, %v4672_v46  ;;  %v10833_v10 = vld [vmem:[%s12075_s15] sm:$0xff]   ;;  %v9381_v46 = vld [vmem:[%s12074_s11 + $0x10] sm:$0xf] }
 0xdf3   : > { %v10262_v32 = vpop.f32.mrf.mxu0 }
 0xdf5   : > { %v4768_v33 = vpop.f32.mrf.mxu0 }
 0xdf7   : > { %v10263_v34 = vpop.f32.mrf.mxu0 }
 0xdf9   : > { %v4864_v35 = vpop.f32.mrf.mxu0 }
 0xdfa   : > { %v4870_v49 = vadd.f32 %v4864_v35, %v4771_v8  ;;  %v9393_v8 = vld [vmem:[%s12074_s11 + $0x18] sm:$0xf] }
 0xdfb   : > { %v10274_v36 = vpop.f32.mrf.mxu0 }
 0xdfd   : > { %v4867_v38 = vpop.f32.mrf.mxu0 }
 0xdff   : > { %v10275_v39 = vpop.f32.mrf.mxu0 }
 0xe01   : > { %v4963_v40 = vpop.f32.mrf.mxu0 }
 0xe02   : > { %v4969_v51 = vadd.f32 %v4963_v40, %v4870_v49  ;;  %v9405_v49 = vld [vmem:[%s12074_s11 + $0x20] sm:$0xf] }
 0xe03   : > { %v10286_v42 = vpop.f32.mrf.mxu0 }
 0xe05   : > { %v4966_v43 = vpop.f32.mrf.mxu0 }
 0xe07   : > { %v10287_v45 = vpop.f32.mrf.mxu0 }
 0xe08   : > { %v9375_v45 = vld [vmem:[%s12074_s11 + $0xc] sm:$0xf] }
 0xe09   : > { %v5062_v47 = vpop.f32.mrf.mxu0 }
 0xe0a   : > { %v5068_v53 = vadd.f32 %v5062_v47, %v4969_v51  ;;  %v9387_v47 = vld [vmem:[%s12074_s11 + $0x14] sm:$0xf] }
 0xe0b   : > { %v10298_v48 = vpop.f32.mrf.mxu0 }
 0xe0c   : > { %v9399_v48 = vld [vmem:[%s12074_s11 + $0x1c] sm:$0xf] }
 0xe0d   : > { %v5065_v50 = vpop.f32.mrf.mxu0 }
 0xe0e   : > { %v10834_v50 = vld [vmem:[%s12075_s15 + $0x10] sm:$0xff]  }
 0xe0f   : > { %v10299_v52 = vpop.f32.mrf.mxu0 }
 0xe11   : > { %v5161_v54 = vpop.f32.mrf.mxu0 }
 0xe12   : > { %v5167_v55 = vadd.f32 %v5161_v54, %v5068_v53 }
 0xe13   : > { %v10310_v56 = vpop.f32.mrf.mxu0 }
 0xe14   : > { %v5169_v57 = vmul.f32 %v5167_v55, %v5167_v55 }
 0xe15   : > { %v5164_v59 = vpop.f32.mrf.mxu0 }
 0xe16   : > { %10313 = vmatpush3.msk.msra.mxu1 %vm3079_vm5, %v5169_v57 }
 0xe17   : > { %v10311_v41 = vpop.f32.mrf.mxu0  ;;  %10315 = vmatmul.mubr.msk.f32.vlgmr.msra.gmra.mxu1 %vm5176_vm8, %v5168_v58  ;;  %10317 = vmatprep.subr.bf16.mxu1 %v11023_v18 }
 0xe18   : > { %10319 = vmatprep.mubr.msk.bf16.mxu1 %vm11024_vm3, %v11023_v18 }
 0xed7   : > { %v5249_v61 = vpop.f32.mrf.mxu1 }
 0xed8   : > { %v5250_v62 = vadd.f32 %v5249_v61, %v5174_v60  ;;  %v10835_v60 = vld [vmem:[%s12075_s15 + $0x18] sm:$0xff]  }
 0xed9   : > { %v10316_v63 = vpop.f32.mrf.mxu1 }
 0xeda   : > { %10962 = vrsqrt.f32 %v5250_v62 }
 0xee7   : > { %v10963_v1 = vpop.eup %10962 }
 0xee8   : > { %v5254_v2 = vmul.f32 %v10963_v1, %v5167_v55 }
 0xeea   : > { %v5257_v3 = vmin.f32 %v5254_v2, 0.0  ;;  %v5255_v5 = vmax.f32 %v5254_v2, 0.0 }
 0xeec   : > { %v5263_v6 = vmul.f32 %v5261_v4, %v5257_v3  ;;  %v10836_v3 = vld [vmem:[%s12075_s15 + $0x20] sm:$0xff]  }
 0xeee   : > { %v5264_v7 = vadd.f32 %v5263_v6, %v5255_v5 }
 0xef0   : > { %v5265_v9 = vmul.f32 %v5264_v7, %v5264_v7  ;;  %v5277_v23 = vmul.f32 8.0, %v5264_v7 }
 0xef2   : > { %v5267_v11 = vsel %vm5266_vm9, %v5265_v9, 0.0 }
 0xef3   : > { %5268 = vadd.xlane.f32.xlu0 %v5267_v11  ;;  %v10837_v11 = vld [vmem:[%s12075_s15 + $0x28] sm:$0xff]  }
 0xf7c   : > { %v5269_v12 = vpop.xlane.xlu0 %5268 }
 0xf7d   : > { %v5270_v13 = vsel %vm3079_vm5, %v5269_v12, 0.0 }
 0xf7e   : > { %v5271_v14 = vrot.slane %v5270_v13, 4 }
 0xf80   : > { %v5272_v15 = vadd.f32 %v5271_v14, %v5270_v13 }
 0xf82   : > { %v5273_v16 = vrot.slane %v5272_v15, 2 }
 0xf84   : > { %v5274_v17 = vadd.f32 %v5273_v16, %v5272_v15 }
 0xf86   : > { %v5275_v19 = vrot.slane %v5274_v17, 1 }
 0xf88   : > { %v5276_v20 = vadd.f32 %v5275_v19, %v5274_v17  ;;  %v10838_v17 = vld [vmem:[%s12075_s15 + $0x30] sm:$0xff]  }
 0xf8a   : > { %v5278_v21 = vmax.f32 %v5276_v20, 1e-20 }
 0xf8c   : > { %10964 = vrsqrt.f32 %v5278_v21 }
 0xf99   : > { %v10965_v25 = vpop.eup %10964 }
 0xf9a   : > { %v5280_v26 = vmul.f32 %v10965_v25, %v5277_v23 }
 0xf9c   : > { %v5283_v27 = vadd.f32 %v5282_v24, %v5280_v26  ;;  %v10839_v24 = vld [vmem:[%s12075_s15 + $0x38] sm:$0xff]  }
 0xf9e   : > { %v5284_v28 = vpack.c.bf16 %v5283_v27, %v5283_v27 }
 0xfa0   : > { %v5290_v44 = vsel %vm1017_vm1, %v5284_v28, 0 }
 0xfa1   : > { %10318 = vmatpush3.bf16.msra.mxu1 %v5290_v44  ;;  %10324 = vmatpush3.bf16.msra.mxu0 %v5290_v44 }
 0xfa2   : > { %10329 = vmatprep.subr.bf16.mxu1 %v11023_v18  ;;  %10335 = vmatprep.subr.bf16.mxu0 %v11023_v18 }
 0xfa4   : > { %10320 = vmatmul.mubr.msk.bf16.vlgmr.msra.gmra.mxu1 %vm5176_vm8, %v5285_v29  ;;  %10326 = vmatmul.mubr.msk.bf16.vlgmr.msra.gmra.mxu0 %vm5176_vm8, %v9361_v30  ;;  %v10840_v29 = vld [vmem:[%s12075_s15 + $0x40] sm:$0xff]  }
 0xfa5   : > { %10330 = vmatpush3.bf16.msra.mxu1 %v10832_v31  ;;  %10331 = vmatprep.mubr.msk.bf16.mxu1 %vm11024_vm3, %v11023_v18 }
 0xfa6   : > { %10337 = vmatprep.mubr.msk.bf16.mxu0 %vm11024_vm3, %v11023_v18  ;;  %10341 = vmatprep.subr.bf16.mxu1 %v11023_v18 }
 0xfa7   : > { %10336 = vmatpush3.bf16.msra.mxu0 %v10833_v10 }
 0xfa8   : > { %10347 = vmatprep.subr.bf16.mxu0 %v11023_v18 }
0x1064   : > { %v5326_v32 = vpop.f32.mrf.mxu1  ;;  %v5374_v33 = vpop.f32.mrf.mxu0 }
0x1065   : > { %v5332_v34 = vpack.c.bf16 %v5326_v32, %v5326_v32  ;;  %v5380_v35 = vpack.c.bf16 %v5374_v33, %v5374_v33 }
0x1066   : > { %v10327_v36 = vpop.f32.mrf.mxu0  ;;  %v10321_v38 = vpop.f32.mrf.mxu1 }
0x1067   : > { %10332 = vmatmul.mubr.msk.bf16.vlgmr.msra.gmra.mxu1 %vm4382_vm7, %v5380_v35  ;;  %10338 = vmatmul.mubr.msk.bf16.vlgmr.msra.gmra.mxu0 %vm4382_vm7, %v5332_v34 }
0x1068   : > { %10342 = vmatpush3.bf16.msra.mxu1 %v5290_v44  ;;  %v5377_v39 = vpop.f32.mrf.mxu0  ;;  %10343 = vmatprep.mubr.msk.bf16.mxu1 %vm11024_vm3, %v11023_v18  ;;  %v5329_v40 = vpop.f32.mrf.mxu1 }
0x1069   : > { %10353 = vmatprep.subr.bf16.mxu1 %v11023_v18  ;;  %10349 = vmatprep.mubr.msk.bf16.mxu0 %vm11024_vm3, %v11023_v18 }
0x106a   : > { %v10328_v42 = vpop.f32.mrf.mxu0  ;;  %v10322_v43 = vpop.f32.mrf.mxu1  ;;  %10348 = vmatpush3.bf16.msra.mxu0 %v10834_v50 }
0x106b   : > { %10359 = vmatprep.subr.bf16.mxu0 %v11023_v18 }
0x106f   : > { %10344 = vmatmul.mubr.msk.bf16.vlgmr.msra.gmra.mxu1 %vm5176_vm8, %v9369_v37 }
0x1070   : > { %10354 = vmatpush3.bf16.msra.mxu1 %v5290_v44  ;;  %10355 = vmatprep.mubr.msk.bf16.mxu1 %vm11024_vm3, %v11023_v18 }
0x1071   : > { %10365 = vmatprep.subr.bf16.mxu1 %v11023_v18 }
0x1077   : > { %10356 = vmatmul.mubr.msk.bf16.vlgmr.msra.gmra.mxu1 %vm5176_vm8, %v9375_v45 }
0x1078   : > { %10366 = vmatpush3.bf16.msra.mxu1 %v5290_v44  ;;  %10367 = vmatprep.mubr.msk.bf16.mxu1 %vm11024_vm3, %v11023_v18 }
0x1079   : > { %10377 = vmatprep.subr.bf16.mxu1 %v11023_v18 }
0x107f   : > { %10368 = vmatmul.mubr.msk.bf16.vlgmr.msra.gmra.mxu1 %vm5176_vm8, %v9381_v46 }
0x1080   : > { %10378 = vmatpush3.bf16.msra.mxu1 %v5290_v44  ;;  %10379 = vmatprep.mubr.msk.bf16.mxu1 %vm11024_vm3, %v11023_v18 }
0x1081   : > { %10389 = vmatprep.subr.bf16.mxu1 %v11023_v18 }
0x1087   : > { %10380 = vmatmul.mubr.msk.bf16.vlgmr.msra.gmra.mxu1 %vm5176_vm8, %v9387_v47 }
0x1088   : > { %10390 = vmatpush3.bf16.msra.mxu1 %v5290_v44  ;;  %10391 = vmatprep.mubr.msk.bf16.mxu1 %vm11024_vm3, %v11023_v18 }
0x1089   : > { %10401 = vmatprep.subr.bf16.mxu1 %v11023_v18 }
0x108f   : > { %10392 = vmatmul.mubr.msk.bf16.vlgmr.msra.gmra.mxu1 %vm5176_vm8, %v9393_v8 }
0x1090   : > { %10402 = vmatpush3.bf16.msra.mxu1 %v5290_v44  ;;  %10403 = vmatprep.mubr.msk.bf16.mxu1 %vm11024_vm3, %v11023_v18 }
0x1091   : > { %10413 = vmatprep.subr.bf16.mxu1 %v11023_v18 }
0x1097   : > { %10404 = vmatmul.mubr.msk.bf16.vlgmr.msra.gmra.mxu1 %vm5176_vm8, %v9399_v48 }
0x1098   : > { %10414 = vmatpush3.bf16.msra.mxu1 %v5290_v44  ;;  %10415 = vmatprep.mubr.msk.bf16.mxu1 %vm11024_vm3, %v11023_v18 }
0x1099   : > { %10425 = vmatprep.subr.mxu1 %v11023_v18 }
0x109f   : > { %10416 = vmatmul.mubr.msk.bf16.vlgmr.msra.gmra.mxu1 %vm5176_vm8, %v9405_v49 }
0x10a0   : > { %10427 = vmatprep.mubr.msk.f32.mxu1 %vm11024_vm3, %v11023_v18 }
0x1127   : > { %v5427_v51 = vpop.f32.mrf.mxu1  ;;  %v5476_v52 = vpop.f32.mrf.mxu0 }
0x1128   : > { %v11750_v53 = vadd.f32 %v5476_v52, %v5427_v51 }
0x1129   : > { %v10333_v54 = vpop.f32.mrf.mxu1  ;;  %v10339_v55 = vpop.f32.mrf.mxu0 }
0x112b   : > { %v5430_v56 = vpop.f32.mrf.mxu1  ;;  %v5479_v57 = vpop.f32.mrf.mxu0 }
0x112d   : > { %v10334_v58 = vpop.f32.mrf.mxu1  ;;  %v10340_v59 = vpop.f32.mrf.mxu0 }
0x112f   : > { %v5521_v41 = vpop.f32.mrf.mxu1 }
0x1130   : > { %v5527_v61 = vpack.c.bf16 %v5521_v41, %v5521_v41 }
0x1131   : > { %v10345_v62 = vpop.f32.mrf.mxu1 }
0x1132   : > { %10350 = vmatmul.mubr.msk.bf16.vlgmr.msra.gmra.mxu0 %vm4382_vm7, %v5527_v61 }
0x1133   : > { %v5524_v63 = vpop.f32.mrf.mxu1  ;;  %10360 = vmatpush3.bf16.msra.mxu0 %v10835_v60  ;;  %10361 = vmatprep.mubr.msk.bf16.mxu0 %vm11024_vm3, %v11023_v18 }
0x1134   : > { %10371 = vmatprep.subr.bf16.mxu0 %v11023_v18 }
0x1135   : > { %v10346_v1 = vpop.f32.mrf.mxu1 }
0x1137   : > { %v5620_v2 = vpop.f32.mrf.mxu1 }
0x1138   : > { %v5626_v4 = vpack.c.bf16 %v5620_v2, %v5620_v2 }
0x1139   : > { %v10357_v5 = vpop.f32.mrf.mxu1 }
0x113a   : > { %10362 = vmatmul.mubr.msk.bf16.vlgmr.msra.gmra.mxu0 %vm4382_vm7, %v5626_v4 }
0x113b   : > { %v5623_v6 = vpop.f32.mrf.mxu1  ;;  %10372 = vmatpush3.bf16.msra.mxu0 %v10836_v3  ;;  %10373 = vmatprep.mubr.msk.bf16.mxu0 %vm11024_vm3, %v11023_v18 }
0x113c   : > { %10383 = vmatprep.subr.bf16.mxu0 %v11023_v18 }
0x113d   : > { %v10358_v7 = vpop.f32.mrf.mxu1 }
0x113f   : > { %v5719_v9 = vpop.f32.mrf.mxu1 }
0x1140   : > { %v5725_v12 = vpack.c.bf16 %v5719_v9, %v5719_v9 }
0x1141   : > { %v10369_v13 = vpop.f32.mrf.mxu1 }
0x1142   : > { %10374 = vmatmul.mubr.msk.bf16.vlgmr.msra.gmra.mxu0 %vm4382_vm7, %v5725_v12  ;;  %v6175_v12 = vld [vmem:[%s12076_s26] sm:$0xff]  ;;  %s12082_s26 = sld [smem:[#allocation15_spill]] }
0x1143   : > { %v5722_v14 = vpop.f32.mrf.mxu1  ;;  %10384 = vmatpush3.bf16.msra.mxu0 %v10837_v11  ;;  %10385 = vmatprep.mubr.msk.bf16.mxu0 %vm11024_vm3, %v11023_v18 }
0x1144   : > { %10395 = vmatprep.subr.bf16.mxu0 %v11023_v18 }
0x1145   : > { %v10370_v15 = vpop.f32.mrf.mxu1 }
0x1147   : > { %v5818_v16 = vpop.f32.mrf.mxu1 }
0x1148   : > { %v5824_v19 = vpack.c.bf16 %v5818_v16, %v5818_v16 }
0x1149   : > { %v10381_v20 = vpop.f32.mrf.mxu1 }
0x114a   : > { %10386 = vmatmul.mubr.msk.bf16.vlgmr.msra.gmra.mxu0 %vm4382_vm7, %v5824_v19 }
0x114b   : > { %v5821_v21 = vpop.f32.mrf.mxu1  ;;  %10396 = vmatpush3.bf16.msra.mxu0 %v10838_v17  ;;  %10397 = vmatprep.mubr.msk.bf16.mxu0 %vm11024_vm3, %v11023_v18 }
0x114c   : > { %10407 = vmatprep.subr.bf16.mxu0 %v11023_v18 }
0x114d   : > { %v10382_v22 = vpop.f32.mrf.mxu1 }
0x114f   : > { %v5917_v23 = vpop.f32.mrf.mxu1 }
0x1150   : > { %v5923_v25 = vpack.c.bf16 %v5917_v23, %v5917_v23 }
0x1151   : > { %v10393_v26 = vpop.f32.mrf.mxu1 }
0x1152   : > { %10398 = vmatmul.mubr.msk.bf16.vlgmr.msra.gmra.mxu0 %vm4382_vm7, %v5923_v25 }
0x1153   : > { %v5920_v27 = vpop.f32.mrf.mxu1  ;;  %10408 = vmatpush3.bf16.msra.mxu0 %v10839_v24  ;;  %10409 = vmatprep.mubr.msk.bf16.mxu0 %vm11024_vm3, %v11023_v18 }
0x1154   : > { %10419 = vmatprep.subr.bf16.mxu0 %v11023_v18 }
0x1155   : > { %v10394_v28 = vpop.f32.mrf.mxu1 }
0x1157   : > { %v6016_v44 = vpop.f32.mrf.mxu1 }
0x1158   : > { %v6022_v30 = vpack.c.bf16 %v6016_v44, %v6016_v44 }
0x1159   : > { %v10405_v31 = vpop.f32.mrf.mxu1 }
0x115a   : > { %10410 = vmatmul.mubr.msk.bf16.vlgmr.msra.gmra.mxu0 %vm4382_vm7, %v6022_v30  ;;  %v6275_v31 = vld [vmem:[%s12077_s28] sm:$0xf] }
0x115b   : > { %v6019_v10 = vpop.f32.mrf.mxu1  ;;  %10420 = vmatpush3.bf16.msra.mxu0 %v10840_v29  ;;  %10421 = vmatprep.mubr.msk.bf16.mxu0 %vm11024_vm3, %v11023_v18 }
0x115c   : > { %10430 = vmatprep.subr.bf16.mxu0 %v11023_v18  ;;  %v9413_v10 = vld [vmem:[%s12077_s28 + $0x4] sm:$0xf] }
0x115d   : > { %v10406_v32 = vpop.f32.mrf.mxu1 }
0x115e   : > { %v10841_v32 = vld [vmem:[%s12078_s1 + $0x8] sm:$0xff]  }
0x115f   : > { %v6115_v33 = vpop.f32.mrf.mxu1 }
0x1160   : > { %v6121_v34 = vpack.c.bf16 %v6115_v33, %v6115_v33  ;;  %v10842_v33 = vld [vmem:[%s12078_s1] sm:$0xff]  }
0x1161   : > { %v10417_v35 = vpop.f32.mrf.mxu1 }
0x1162   : > { %10422 = vmatmul.mubr.msk.bf16.vlgmr.msra.gmra.mxu0 %vm4382_vm7, %v6121_v34 }
0x1163   : > { %v6118_v36 = vpop.f32.mrf.mxu1  ;;  %10432 = vmatprep.mubr.msk.bf16.mxu0 %vm11024_vm3, %v11023_v18 }
0x1165   : > { %v10418_v38 = vpop.f32.mrf.mxu1 }
0x11f2   : > { %v5574_v39 = vpop.f32.mrf.mxu0 }
0x11f3   : > { %v5580_v59 = vadd.f32 %v5574_v39, %v11750_v53  ;;  %v6181_v53 = vpop.permute.xlu1 %6180 }
0x11f4   : > { %v10351_v40 = vpop.f32.mrf.mxu0 }
0x11f6   : > { %v5577_v42 = vpop.f32.mrf.mxu0 }
0x11f7   : > { %v6270_v26 = vpop.permute.xlu1 %6269 }
0x11f8   : > { %v10352_v43 = vpop.f32.mrf.mxu0 }
0x11fa   : > { %v5673_v37 = vpop.f32.mrf.mxu0 }
0x11fb   : > { %v5679_v60 = vadd.f32 %v5673_v37, %v5580_v59 }
0x11fc   : > { %v10363_v45 = vpop.f32.mrf.mxu0 }
0x11fe   : > { %v5676_v46 = vpop.f32.mrf.mxu0 }
0x11ff   : > { %v9421_v46 = vld [vmem:[%s12077_s28 + $0x8] sm:$0xf] }
0x1200   : > { %v10364_v47 = vpop.f32.mrf.mxu0 }
0x1201   : > { %v9427_v47 = vld [vmem:[%s12077_s28 + $0xc] sm:$0xf] }
0x1202   : > { %v5772_v8 = vpop.f32.mrf.mxu0 }
0x1203   : > { %v5778_v62 = vadd.f32 %v5772_v8, %v5679_v60  ;;  %v9433_v8 = vld [vmem:[%s12077_s28 + $0x10] sm:$0xf] }
0x1204   : > { %v10375_v48 = vpop.f32.mrf.mxu0 }
0x1205   : > { %v9439_v48 = vld [vmem:[%s12077_s28 + $0x14] sm:$0xf] }
0x1206   : > { %v5775_v49 = vpop.f32.mrf.mxu0 }
0x1207   : > { %v9445_v49 = vld [vmem:[%s12077_s28 + $0x18] sm:$0xf] }
0x1208   : > { %v10376_v50 = vpop.f32.mrf.mxu0 }
0x1209   : > { %v9451_v50 = vld [vmem:[%s12077_s28 + $0x1c] sm:$0xf] }
0x120a   : > { %v5871_v51 = vpop.f32.mrf.mxu0 }
0x120b   : > { %v5877_v1 = vadd.f32 %v5871_v51, %v5778_v62  ;;  %v9457_v51 = vld [vmem:[%s12077_s28 + $0x20] sm:$0xf] }
0x120c   : > { %v10387_v52 = vpop.f32.mrf.mxu0 }
0x120d   : > { %v10843_v52 = vld [vmem:[%s12078_s1 + $0x10] sm:$0xff]  }
0x120e   : > { %v5874_v54 = vpop.f32.mrf.mxu0 }
0x1210   : > { %v10388_v55 = vpop.f32.mrf.mxu0 }
0x1212   : > { %v5970_v56 = vpop.f32.mrf.mxu0 }
0x1213   : > { %v5976_v3 = vadd.f32 %v5970_v56, %v5877_v1 }
0x1214   : > { %v10399_v57 = vpop.f32.mrf.mxu0 }
0x1216   : > { %v5973_v58 = vpop.f32.mrf.mxu0 }
0x1218   : > { %v10400_v41 = vpop.f32.mrf.mxu0 }
0x121a   : > { %v6069_v61 = vpop.f32.mrf.mxu0 }
0x121b   : > { %v6075_v5 = vadd.f32 %v6069_v61, %v5976_v3 }
0x121c   : > { %v10411_v63 = vpop.f32.mrf.mxu0 }
0x121d   : > { %v10844_v63 = vld [vmem:[%s12078_s1 + $0x18] sm:$0xff]  }
0x121e   : > { %v6072_v2 = vpop.f32.mrf.mxu0 }
0x1220   : > { %v10412_v4 = vpop.f32.mrf.mxu0 }
0x1222   : > { %v6168_v6 = vpop.f32.mrf.mxu0 }
0x1223   : > { %v6174_v7 = vadd.f32 %v6168_v6, %v6075_v5  ;;  %v10845_v6 = vld [vmem:[%s12078_s1 + $0x20] sm:$0xff]  }
0x1224   : > { %v10423_v9 = vpop.f32.mrf.mxu0 }
0x1225   : > { %v6176_v11 = vmul.f32 %v6174_v7, %v6174_v7 }
0x1226   : > { %v6171_v13 = vpop.f32.mrf.mxu0 }
0x1227   : > { %10426 = vmatpush3.msra.mxu1 %v6176_v11 }
0x1228   : > { %v10424_v14 = vpop.f32.mrf.mxu0  ;;  %10428 = vmatmul.mubr.msk.f32.vlgmr.msra.gmra.mxu1 %vm2988_vm4, %v6175_v12  ;;  %10436 = vmatprep.subr.bf16.mxu1 %v11023_v18 }
0x1229   : > { %10438 = vmatprep.mubr.msk.bf16.mxu1 %vm11024_vm3, %v11023_v18  ;;  %v10846_v14 = vld [vmem:[%s12078_s1 + $0x28] sm:$0xff]  }
0x12e8   : > { %v6252_v15 = vpop.f32.mrf.mxu1 }
0x12e9   : > { %v6253_v16 = vadd.f32 %v6252_v15, %v6181_v53 }
0x12ea   : > { %v10429_v17 = vpop.f32.mrf.mxu1 }
0x12eb   : > { %10966 = vrsqrt.f32 %v6253_v16  ;;  %vm6258_vm10 = vcmp.eq.f32.partialorder %v6253_v16, inf  ;;  %v6261_v21 = vand.u32 2147483648, %v6253_v16  ;;  %vm6260_vm11 = vcmp.eq.f32.partialorder %v6253_v16, 0.0 }
0x12f8   : > { %v10967_v19 = vpop.eup %10966 }
0x12f9   : > { %v6257_v20 = vmul.f32 %v10967_v19, %v6253_v16 }
0x12fb   : > { %v6259_v22 = vsel %vm6258_vm10, %v6253_v16, %v6257_v20  ;;  %v10847_v20 = vld [vmem:[%s12078_s1 + $0x30] sm:$0xff]  }
0x12fc   : > { %v6262_v23 = vsel %vm6260_vm11, %v6261_v21, %v6259_v22 }
0x12fd   : > { %v6263_v24 = vmul.f32 %v6262_v23, %v6174_v7 }
0x12ff   : > { %v6266_v25 = vmin.f32 %v6263_v24, 0.0  ;;  %v6264_v27 = vmax.f32 %v6263_v24, 0.0 }
0x1301   : > { %v6272_v28 = vmul.f32 %v6270_v26, %v6266_v25  ;;  %v10848_v26 = vld [vmem:[%s12078_s1 + $0x38] sm:$0xff]  }
0x1303   : > { %v6273_v44 = vadd.f32 %v6272_v28, %v6264_v27 }
0x1305   : > { %v6274_v29 = vpack.c.bf16 %v6273_v44, %v6273_v44 }
0x1307   : > { %v6280_v30 = vsel %vm3079_vm5, %v6274_v29, 0 }
0x1308   : > { %10431 = vmatpush3.bf16.msra.mxu0 %v6280_v30  ;;  %10437 = vmatpush3.bf16.msra.mxu1 %v6280_v30 }
0x1309   : > { %10442 = vmatprep.subr.bf16.mxu0 %v11023_v18  ;;  %10448 = vmatprep.subr.bf16.mxu1 %v11023_v18 }
0x130b   : > { %10433 = vmatmul.mubr.msk.bf16.vlgmr.msra.gmra.mxu0 %vm2988_vm4, %v6275_v31  ;;  %10439 = vmatmul.mubr.msk.bf16.vlgmr.msra.gmra.mxu1 %vm2988_vm4, %v9413_v10  ;;  %v10849_v31 = vld [vmem:[%s12078_s1 + $0x40] sm:$0xff]  }
0x130c   : > { %10443 = vmatpush3.bf16.msra.mxu0 %v10841_v32  ;;  %10444 = vmatprep.mubr.msk.bf16.mxu0 %vm11024_vm3, %v11023_v18 }
0x130d   : > { %10450 = vmatprep.mubr.msk.bf16.mxu1 %vm11024_vm3, %v11023_v18  ;;  %10454 = vmatprep.subr.bf16.mxu0 %v11023_v18 }
0x130e   : > { %10449 = vmatpush3.bf16.msra.mxu1 %v10842_v33 }
0x130f   : > { %10460 = vmatprep.subr.bf16.mxu1 %v11023_v18 }
0x13cb   : > { %v6316_v34 = vpop.f32.mrf.mxu0  ;;  %v6364_v35 = vpop.f32.mrf.mxu1 }
0x13cc   : > { %v6322_v36 = vpack.c.bf16 %v6316_v34, %v6316_v34  ;;  %v6370_v38 = vpack.c.bf16 %v6364_v35, %v6364_v35 }
0x13cd   : > { %v10440_v39 = vpop.f32.mrf.mxu1  ;;  %v10434_v40 = vpop.f32.mrf.mxu0 }
0x13ce   : > { %10445 = vmatmul.mubr.msk.bf16.vlgmr.msra.gmra.mxu0 %vm4382_vm7, %v6370_v38  ;;  %10451 = vmatmul.mubr.msk.bf16.vlgmr.msra.gmra.mxu1 %vm4382_vm7, %v6322_v36 }
0x13cf   : > { %10455 = vmatpush3.bf16.msra.mxu0 %v6280_v30  ;;  %v6367_v42 = vpop.f32.mrf.mxu1  ;;  %10456 = vmatprep.mubr.msk.bf16.mxu0 %vm11024_vm3, %v11023_v18  ;;  %v6319_v43 = vpop.f32.mrf.mxu0 }
0x13d0   : > { %10466 = vmatprep.subr.bf16.mxu0 %v11023_v18  ;;  %10462 = vmatprep.mubr.msk.bf16.mxu1 %vm11024_vm3, %v11023_v18 }
0x13d1   : > { %v10441_v37 = vpop.f32.mrf.mxu1  ;;  %v10435_v45 = vpop.f32.mrf.mxu0  ;;  %10461 = vmatpush3.bf16.msra.mxu1 %v10843_v52 }
0x13d2   : > { %10472 = vmatprep.subr.bf16.mxu1 %v11023_v18 }
0x13d6   : > { %10457 = vmatmul.mubr.msk.bf16.vlgmr.msra.gmra.mxu0 %vm2988_vm4, %v9421_v46 }
0x13d7   : > { %10467 = vmatpush3.bf16.msra.mxu0 %v6280_v30  ;;  %10468 = vmatprep.mubr.msk.bf16.mxu0 %vm11024_vm3, %v11023_v18 }
0x13d8   : > { %10478 = vmatprep.subr.bf16.mxu0 %v11023_v18 }
0x13de   : > { %10469 = vmatmul.mubr.msk.bf16.vlgmr.msra.gmra.mxu0 %vm2988_vm4, %v9427_v47 }
0x13df   : > { %10479 = vmatpush3.bf16.msra.mxu0 %v6280_v30  ;;  %10480 = vmatprep.mubr.msk.bf16.mxu0 %vm11024_vm3, %v11023_v18 }
0x13e0   : > { %10490 = vmatprep.subr.bf16.mxu0 %v11023_v18 }
0x13e6   : > { %10481 = vmatmul.mubr.msk.bf16.vlgmr.msra.gmra.mxu0 %vm2988_vm4, %v9433_v8 }
0x13e7   : > { %10491 = vmatpush3.bf16.msra.mxu0 %v6280_v30  ;;  %10492 = vmatprep.mubr.msk.bf16.mxu0 %vm11024_vm3, %v11023_v18 }
0x13e8   : > { %10502 = vmatprep.subr.bf16.mxu0 %v11023_v18 }
0x13ee   : > { %10493 = vmatmul.mubr.msk.bf16.vlgmr.msra.gmra.mxu0 %vm2988_vm4, %v9439_v48 }
0x13ef   : > { %10503 = vmatpush3.bf16.msra.mxu0 %v6280_v30  ;;  %10504 = vmatprep.mubr.msk.bf16.mxu0 %vm11024_vm3, %v11023_v18 }
0x13f0   : > { %10514 = vmatprep.subr.bf16.mxu0 %v11023_v18 }
0x13f6   : > { %10505 = vmatmul.mubr.msk.bf16.vlgmr.msra.gmra.mxu0 %vm2988_vm4, %v9445_v49 }
0x13f7   : > { %10515 = vmatpush3.bf16.msra.mxu0 %v6280_v30  ;;  %10516 = vmatprep.mubr.msk.bf16.mxu0 %vm11024_vm3, %v11023_v18 }
0x13f8   : > { %10526 = vmatprep.subr.bf16.mxu0 %v11023_v18 }
0x13fe   : > { %10517 = vmatmul.mubr.msk.bf16.vlgmr.msra.gmra.mxu0 %vm2988_vm4, %v9451_v50 }
0x13ff   : > { %10527 = vmatpush3.bf16.msra.mxu0 %v6280_v30  ;;  %10528 = vmatprep.mubr.msk.bf16.mxu0 %vm11024_vm3, %v11023_v18 }
0x1400   : > { %10538 = vmatprep.subr.mxu0 %v11023_v18 }
0x1406   : > { %10529 = vmatmul.mubr.msk.bf16.vlgmr.msra.gmra.mxu0 %vm2988_vm4, %v9457_v51 }
0x1407   : > { %10540 = vmatprep.mubr.msk.f32.mxu0 %vm11024_vm3, %v11023_v18 }
0x148e   : > { %v6417_v54 = vpop.f32.mrf.mxu0  ;;  %v6466_v55 = vpop.f32.mrf.mxu1 }
0x148f   : > { %v11849_v56 = vadd.f32 %v6466_v55, %v6417_v54 }
0x1490   : > { %v10446_v57 = vpop.f32.mrf.mxu0  ;;  %v10452_v58 = vpop.f32.mrf.mxu1 }
0x1492   : > { %v6420_v59 = vpop.f32.mrf.mxu0  ;;  %v6469_v41 = vpop.f32.mrf.mxu1 }
0x1494   : > { %v10447_v60 = vpop.f32.mrf.mxu0  ;;  %v10453_v61 = vpop.f32.mrf.mxu1 }
0x1496   : > { %v6511_v62 = vpop.f32.mrf.mxu0 }
0x1497   : > { %v6517_v1 = vpack.c.bf16 %v6511_v62, %v6511_v62 }
0x1498   : > { %v10458_v2 = vpop.f32.mrf.mxu0 }
0x1499   : > { %10463 = vmatmul.mubr.msk.bf16.vlgmr.msra.gmra.mxu1 %vm4382_vm7, %v6517_v1 }
0x149a   : > { %v6514_v3 = vpop.f32.mrf.mxu0  ;;  %10473 = vmatpush3.bf16.msra.mxu1 %v10844_v63  ;;  %10474 = vmatprep.mubr.msk.bf16.mxu1 %vm11024_vm3, %v11023_v18 }
0x149b   : > { %10484 = vmatprep.subr.bf16.mxu1 %v11023_v18 }
0x149c   : > { %v10459_v4 = vpop.f32.mrf.mxu0 }
0x149e   : > { %v6610_v5 = vpop.f32.mrf.mxu0 }
0x149f   : > { %v6616_v7 = vpack.c.bf16 %v6610_v5, %v6610_v5 }
0x14a0   : > { %v10470_v9 = vpop.f32.mrf.mxu0 }
0x14a1   : > { %10475 = vmatmul.mubr.msk.bf16.vlgmr.msra.gmra.mxu1 %vm4382_vm7, %v6616_v7 }
0x14a2   : > { %v6613_v11 = vpop.f32.mrf.mxu0  ;;  %10485 = vmatpush3.bf16.msra.mxu1 %v10845_v6  ;;  %10486 = vmatprep.mubr.msk.bf16.mxu1 %vm11024_vm3, %v11023_v18 }
0x14a3   : > { %10496 = vmatprep.subr.bf16.mxu1 %v11023_v18 }
0x14a4   : > { %v10471_v12 = vpop.f32.mrf.mxu0 }
0x14a6   : > { %v6709_v13 = vpop.f32.mrf.mxu0 }
0x14a7   : > { %v6715_v53 = vpack.c.bf16 %v6709_v13, %v6709_v13 }
0x14a8   : > { %v10482_v15 = vpop.f32.mrf.mxu0 }
0x14a9   : > { %10487 = vmatmul.mubr.msk.bf16.vlgmr.msra.gmra.mxu1 %vm4382_vm7, %v6715_v53  ;;  %v7165_v53 = vld [vmem:[%s12079_s10] sm:$0xff]  ;;  %s1003_s10 = scalar_lea.vmem %s11188_s3, %s9633_s0 }
0x14aa   : > { %v6712_v16 = vpop.f32.mrf.mxu0  ;;  %10497 = vmatpush3.bf16.msra.mxu1 %v10846_v14  ;;  %10498 = vmatprep.mubr.msk.bf16.mxu1 %vm11024_vm3, %v11023_v18 }
0x14ab   : > { %10508 = vmatprep.subr.bf16.mxu1 %v11023_v18 }
0x14ac   : > { %v10483_v17 = vpop.f32.mrf.mxu0 }
0x14ae   : > { %v6808_v19 = vpop.f32.mrf.mxu0 }
0x14af   : > { %v6814_v21 = vpack.c.bf16 %v6808_v19, %v6808_v19 }
0x14b0   : > { %v10494_v22 = vpop.f32.mrf.mxu0 }
0x14b1   : > { %10499 = vmatmul.mubr.msk.bf16.vlgmr.msra.gmra.mxu1 %vm4382_vm7, %v6814_v21 }
0x14b2   : > { %v6811_v23 = vpop.f32.mrf.mxu0  ;;  %10509 = vmatpush3.bf16.msra.mxu1 %v10847_v20  ;;  %10510 = vmatprep.mubr.msk.bf16.mxu1 %vm11024_vm3, %v11023_v18 }
0x14b3   : > { %10520 = vmatprep.subr.bf16.mxu1 %v11023_v18 }
0x14b4   : > { %v10495_v24 = vpop.f32.mrf.mxu0 }
0x14b6   : > { %v6907_v25 = vpop.f32.mrf.mxu0 }
0x14b7   : > { %v6913_v27 = vpack.c.bf16 %v6907_v25, %v6907_v25 }
0x14b8   : > { %v10506_v28 = vpop.f32.mrf.mxu0 }
0x14b9   : > { %10511 = vmatmul.mubr.msk.bf16.vlgmr.msra.gmra.mxu1 %vm4382_vm7, %v6913_v27 }
0x14ba   : > { %v6910_v44 = vpop.f32.mrf.mxu0  ;;  %10521 = vmatpush3.bf16.msra.mxu1 %v10848_v26  ;;  %10522 = vmatprep.mubr.msk.bf16.mxu1 %vm11024_vm3, %v11023_v18 }
0x14bb   : > { %10532 = vmatprep.subr.bf16.mxu1 %v11023_v18 }
0x14bc   : > { %v10507_v29 = vpop.f32.mrf.mxu0 }
0x14be   : > { %v7006_v30 = vpop.f32.mrf.mxu0 }
0x14bf   : > { %v7012_v10 = vpack.c.bf16 %v7006_v30, %v7006_v30 }
0x14c0   : > { %v10518_v32 = vpop.f32.mrf.mxu0 }
0x14c1   : > { %10523 = vmatmul.mubr.msk.bf16.vlgmr.msra.gmra.mxu1 %vm4382_vm7, %v7012_v10  ;;  %v10852_v10 = vld [vmem:[%s12080_s16 + $0x74] ss:$8 sps:$4 sm:$0xff]  }
0x14c2   : > { %v7009_v33 = vpop.f32.mrf.mxu0  ;;  %10533 = vmatpush3.bf16.msra.mxu1 %v10849_v31  ;;  %10534 = vmatprep.mubr.msk.bf16.mxu1 %vm11024_vm3, %v11023_v18  ;;  %v10855_v32 = vld [vmem:[%s12080_s16 + $0x34] ss:$8 sps:$4 sm:$0xff]  }
0x14c3   : > { %10543 = vmatprep.subr.bf16.mxu1 %v11023_v18 }
0x14c4   : > { %v10519_v34 = vpop.f32.mrf.mxu0 }
0x14c5   : > { %v7265_v34 = vld [vmem:[%s12081_s18] sm:$0x3] }
0x14c6   : > { %v7105_v35 = vpop.f32.mrf.mxu0 }
0x14c7   : > { %v7111_v36 = vpack.c.bf16 %v7105_v35, %v7105_v35  ;;  %v9465_v35 = vld [vmem:[%s12081_s18 + $0x2] sm:$0x3] }
0x14c8   : > { %v10530_v38 = vpop.f32.mrf.mxu0 }
0x14c9   : > { %10535 = vmatmul.mubr.msk.bf16.vlgmr.msra.gmra.mxu1 %vm4382_vm7, %v7111_v36  ;;  %v10850_v36 = vld [vmem:[%s12080_s16 + $0x70] ss:$8 sps:$4 sm:$0xff]  }
0x14ca   : > { %v7108_v39 = vpop.f32.mrf.mxu0  ;;  %10545 = vmatprep.mubr.msk.bf16.mxu1 %vm11024_vm3, %v11023_v18  ;;  %v10853_v38 = vld [vmem:[%s12080_s16 + $0x30] ss:$8 sps:$4 sm:$0xff]  }
0x14cb   : > { %v10858_v39 = vld [vmem:[%s12080_s16 + $0x64] ss:$8 sps:$4 sm:$0xff]  }
0x14cc   : > { %v10531_v40 = vpop.f32.mrf.mxu0 }
0x14cd   : > { %v10861_v40 = vld [vmem:[%s12080_s16 + $0x24] ss:$8 sps:$4 sm:$0xff]  }
0x1559   : > { %v6564_v42 = vpop.f32.mrf.mxu1 }
0x155a   : > { %v6570_v61 = vadd.f32 %v6564_v42, %v11849_v56  ;;  %v7171_v56 = vpop.permute.xlu1 %7170  ;;  %v10856_v42 = vld [vmem:[%s12080_s16 + $0x60] ss:$8 sps:$4 sm:$0xff]  }
0x155b   : > { %v10464_v43 = vpop.f32.mrf.mxu1 }
0x155c   : > { %v10859_v43 = vld [vmem:[%s12080_s16 + $0x20] ss:$8 sps:$4 sm:$0xff]  }
0x155d   : > { %v6567_v37 = vpop.f32.mrf.mxu1 }
0x155e   : > { %v7260_v28 = vpop.permute.xlu1 %7259  ;;  %v10864_v37 = vld [vmem:[%s12080_s16 + $0x54] ss:$8 sps:$4 sm:$0xff]  }
0x155f   : > { %v10465_v45 = vpop.f32.mrf.mxu1 }
0x1560   : > { %v10867_v45 = vld [vmem:[%s12080_s16 + $0x14] ss:$8 sps:$4 sm:$0xff]  }
0x1561   : > { %v6663_v46 = vpop.f32.mrf.mxu1 }
0x1562   : > { %v6669_v63 = vadd.f32 %v6663_v46, %v6570_v61  ;;  %v10862_v46 = vld [vmem:[%s12080_s16 + $0x50] ss:$8 sps:$4 sm:$0xff]  }
0x1563   : > { %v10476_v47 = vpop.f32.mrf.mxu1 }
0x1564   : > { %v10865_v47 = vld [vmem:[%s12080_s16 + $0x10] ss:$8 sps:$4 sm:$0xff]  }
0x1565   : > { %v6666_v8 = vpop.f32.mrf.mxu1 }
0x1566   : > { %v10870_v8 = vld [vmem:[%s12080_s16 + $0x44] ss:$8 sps:$4 sm:$0xff]  }
0x1567   : > { %v10477_v48 = vpop.f32.mrf.mxu1 }
0x1568   : > { %v10873_v48 = vld [vmem:[%s12080_s16 + $0x4] ss:$8 sps:$4 sm:$0xff]  }
0x1569   : > { %v6762_v49 = vpop.f32.mrf.mxu1 }
0x156a   : > { %v6768_v2 = vadd.f32 %v6762_v49, %v6669_v63  ;;  %v10868_v49 = vld [vmem:[%s12080_s16 + $0x40] ss:$8 sps:$4 sm:$0xff]  }
0x156b   : > { %v10488_v50 = vpop.f32.mrf.mxu1  ;;  %v10877_v63 = vld [vmem:[%s12080_s16 + $0xa0] ss:$8 sps:$4 sm:$0xff]  }
0x156c   : > { %v10871_v50 = vld [vmem:[%s12080_s16] ss:$8 sps:$4 sm:$0xff]  }
0x156d   : > { %v6765_v51 = vpop.f32.mrf.mxu1 }
0x156e   : > { %v10876_v51 = vld [vmem:[%s12080_s16 + $0xb4] ss:$8 sps:$4 sm:$0xff]  }
0x156f   : > { %v10489_v52 = vpop.f32.mrf.mxu1 }
0x1571   : > { %v6861_v54 = vpop.f32.mrf.mxu1 }
0x1572   : > { %v6867_v4 = vadd.f32 %v6861_v54, %v6768_v2 }
0x1573   : > { %v10500_v55 = vpop.f32.mrf.mxu1 }
0x1575   : > { %v6864_v57 = vpop.f32.mrf.mxu1 }
0x1577   : > { %v10501_v58 = vpop.f32.mrf.mxu1 }
0x1578   : > { %v10874_v58 = vld [vmem:[%s12080_s16 + $0xb0] ss:$8 sps:$4 sm:$0xff]  }
0x1579   : > { %v6960_v59 = vpop.f32.mrf.mxu1 }
0x157a   : > { %v6966_v6 = vadd.f32 %v6960_v59, %v6867_v4  ;;  %v9512_v4 = vld [vmem:[%s12081_s18 + $0x6] sm:$0x3] }
0x157b   : > { %v10512_v41 = vpop.f32.mrf.mxu1 }
0x157d   : > { %v6963_v60 = vpop.f32.mrf.mxu1 }
0x157e   : > { %v10879_v60 = vld [vmem:[%s12080_s16 + $0xa4] ss:$8 sps:$4 sm:$0xff]  }
0x157f   : > { %v10513_v62 = vpop.f32.mrf.mxu1 }
0x1581   : > { %v7059_v1 = vpop.f32.mrf.mxu1 }
0x1582   : > { %v7065_v9 = vadd.f32 %v7059_v1, %v6966_v6  ;;  %v10885_v6 = vld [vmem:[%s12080_s16 + $0xf4] ss:$8 sps:$4 sm:$0xff]  }
0x1583   : > { %v10524_v3 = vpop.f32.mrf.mxu1 }
0x1584   : > { %v9493_v3 = vld [vmem:[%s12081_s18 + $0x4] sm:$0x3] }
0x1585   : > { %v7062_v5 = vpop.f32.mrf.mxu1 }
0x1586   : > { %v10882_v5 = vld [vmem:[%s12080_s16 + $0x94] ss:$8 sps:$4 sm:$0xff]  }
0x1587   : > { %v10525_v7 = vpop.f32.mrf.mxu1 }
0x1588   : > { %v10880_v7 = vld [vmem:[%s12080_s16 + $0x90] ss:$8 sps:$4 sm:$0xff]  }
0x1589   : > { %v7158_v11 = vpop.f32.mrf.mxu1 }
0x158a   : > { %v7164_v12 = vadd.f32 %v7158_v11, %v7065_v9  ;;  %v10883_v9 = vld [vmem:[%s12080_s16 + $0xf0] ss:$8 sps:$4 sm:$0xff]   ;;  %v10888_v11 = vld [vmem:[%s12080_s16 + $0x84] ss:$8 sps:$4 sm:$0xff]  }
0x158b   : > { %v10536_v13 = vpop.f32.mrf.mxu1 }
0x158c   : > { %v7166_v14 = vmul.f32 %v7164_v12, %v7164_v12  ;;  %v10886_v13 = vld [vmem:[%s12080_s16 + $0x80] ss:$8 sps:$4 sm:$0xff]  }
0x158d   : > { %v7161_v15 = vpop.f32.mrf.mxu1 }
0x158e   : > { %10539 = vmatpush3.msra.mxu0 %v7166_v14  ;;  %v10889_v14 = vld [vmem:[%s12080_s16 + $0xe0] ss:$8 sps:$4 sm:$0xff]   ;;  %v10892_v15 = vld [vmem:[%s12080_s16 + $0xd0] ss:$8 sps:$4 sm:$0xff]  }
0x158f   : > { %v10537_v16 = vpop.f32.mrf.mxu1  ;;  %10541 = vmatmul.mubr.msk.f32.vlgmr.msra.gmra.mxu0 %vm2988_vm4, %v7165_v53  ;;  %10549 = vmatprep.subr.bf16.mxu0 %v11023_v18  ;;  %v10894_v53 = vld [vmem:[%s12080_s16 + $0xd4] ss:$8 sps:$4 sm:$0xff]  }
0x1590   : > { %10551 = vmatprep.mubr.msk.bf16.mxu0 %vm11024_vm3, %v11023_v18  ;;  %v10897_v16 = vld [vmem:[%s12080_s16 + $0xc4] ss:$8 sps:$4 sm:$0xff]  }
0x164f   : > { %v7242_v17 = vpop.f32.mrf.mxu0 }
0x1650   : > { %v7243_v19 = vadd.f32 %v7242_v17, %v7171_v56  ;;  %v10895_v56 = vld [vmem:[%s12080_s16 + $0xc0] ss:$8 sps:$4 sm:$0xff]  }
0x1651   : > { %v10542_v20 = vpop.f32.mrf.mxu0 }
0x1652   : > { %10968 = vrsqrt.f32 %v7243_v19  ;;  %vm7248_vm12 = vcmp.eq.f32.partialorder %v7243_v19, inf  ;;  %v7251_v23 = vand.u32 2147483648, %v7243_v19  ;;  %vm7250_vm13 = vcmp.eq.f32.partialorder %v7243_v19, 0.0 }
0x165f   : > { %v10969_v21 = vpop.eup %10968 }
0x1660   : > { %v7247_v22 = vmul.f32 %v10969_v21, %v7243_v19 }
0x1662   : > { %v7249_v24 = vsel %vm7248_vm12, %v7243_v19, %v7247_v22 }
0x1663   : > { %v7252_v25 = vsel %vm7250_vm13, %v7251_v23, %v7249_v24 }
0x1664   : > { %v7253_v26 = vmul.f32 %v7252_v25, %v7164_v12  ;;  %v10891_v12 = vld [vmem:[%s12080_s16 + $0xe4] ss:$8 sps:$4 sm:$0xff]  }
0x1666   : > { %v7256_v27 = vmin.f32 %v7253_v26, 0.0  ;;  %v7254_v44 = vmax.f32 %v7253_v26, 0.0 }
0x1668   : > { %v7262_v29 = vmul.f32 %v7260_v28, %v7256_v27 }
0x166a   : > { %v7263_v30 = vadd.f32 %v7262_v29, %v7254_v44  ;;  %v10900_v29 = vld [vmem:[%s12080_s16 + $0x134] ss:$8 sps:$4 sm:$0xff]  }
0x166c   : > { %v7264_v31 = vpack.c.bf16 %v7263_v30, %v7263_v30 }
0x166e   : > { %v11893_v33 = vsel %vm3079_vm5, %v7264_v31, 0 }
0x166f   : > { %10544 = vmatpush3.bf16.msra.mxu1 %v11893_v33  ;;  %10550 = vmatpush3.bf16.msra.mxu0 %v11893_v33 }
0x1670   : > { %7427 = vmatprep.subr.bf16.mxu1 %v10852_v10  ;;  %7511 = vmatprep.subr.bf16.mxu0 %v10855_v32 }
0x1672   : > { %10546 = vmatmul.mubr.msk.bf16.vlgmr.msra.gmra.mxu1 %vm2988_vm4, %v7265_v34  ;;  %10552 = vmatmul.mubr.msk.bf16.vlgmr.msra.gmra.mxu0 %vm2988_vm4, %v9465_v35  ;;  %v9531_v34 = vld [vmem:[%s12081_s18 + $0x8] sm:$0x3] }
0x1673   : > { %7428 = vmatpush1.bf16.msra.mxu1 %v10850_v36  ;;  %7512 = vmatpush1.bf16.msra.mxu0 %v10853_v38  ;;  %v10898_v36 = vld [vmem:[%s12080_s16 + $0x130] ss:$8 sps:$4 sm:$0xff]   ;;  %v10903_v38 = vld [vmem:[%s12080_s16 + $0x124] ss:$8 sps:$4 sm:$0xff]  }
0x1674   : > { %7429 = vmatprep.subr.bf16.mxu1 %v10858_v39  ;;  %7513 = vmatprep.subr.bf16.mxu0 %v10861_v40 }
0x1675   : > { %7451 = vmatprep.mubr.bf16.mxu1 %v11021_v0  ;;  %7535 = vmatprep.mubr.bf16.mxu0 %v11021_v0 }
0x1677   : > { %7430 = vmatpush1.bf16.msra.mxu1 %v10856_v42  ;;  %7514 = vmatpush1.bf16.msra.mxu0 %v10859_v43  ;;  %v10901_v42 = vld [vmem:[%s12080_s16 + $0x120] ss:$8 sps:$4 sm:$0xff]  }
0x1678   : > { %7431 = vmatprep.subr.bf16.mxu1 %v10864_v37  ;;  %7515 = vmatprep.subr.bf16.mxu0 %v10867_v45  ;;  %v9550_v37 = vld [vmem:[%s12081_s18 + $0xa] sm:$0x3]  ;;  %v10906_v45 = vld [vmem:[%s12080_s16 + $0x114] ss:$8 sps:$4 sm:$0xff]  }
0x167b   : > { %7432 = vmatpush1.bf16.msra.mxu1 %v10862_v46  ;;  %7516 = vmatpush1.bf16.msra.mxu0 %v10865_v47  ;;  %v10909_v46 = vld [vmem:[%s12080_s16 + $0x174] ss:$8 sps:$4 sm:$0xff]   ;;  %v10904_v47 = vld [vmem:[%s12080_s16 + $0x110] ss:$8 sps:$4 sm:$0xff]  }
0x167c   : > { %7433 = vmatprep.subr.bf16.mxu1 %v10870_v8  ;;  %7517 = vmatprep.subr.bf16.mxu0 %v10873_v48  ;;  %v10907_v8 = vld [vmem:[%s12080_s16 + $0x170] ss:$8 sps:$4 sm:$0xff]   ;;  %v10912_v48 = vld [vmem:[%s12080_s16 + $0x104] ss:$8 sps:$4 sm:$0xff]  }
0x167f   : > { %7434 = vmatpush1.bf16.msra.mxu1 %v10868_v49  ;;  %7518 = vmatpush1.bf16.msra.mxu0 %v10871_v50  ;;  %v10915_v49 = vld [vmem:[%s12080_s16 + $0x164] ss:$8 sps:$4 sm:$0xff]   ;;  %v10910_v50 = vld [vmem:[%s12080_s16 + $0x100] ss:$8 sps:$4 sm:$0xff]  }
0x1680   : > { %10555 = vmatprep.subr.bf16.mxu1 %v11023_v18  ;;  %7650 = vmatprep.subr.bf16.mxu0 %v10876_v51  ;;  %v10913_v51 = vld [vmem:[%s12080_s16 + $0x160] ss:$8 sps:$4 sm:$0xff]  }
0x1732   : > { %v7306_v52 = vpop.f32.mrf.mxu1  ;;  %v7360_v54 = vpop.f32.mrf.mxu0 }
0x1733   : > { %v7312_v55 = vpack.c.bf16 %v7306_v52, %v7306_v52  ;;  %v7366_v57 = vpack.c.bf16 %v7360_v54, %v7360_v54  ;;  %v10918_v52 = vld [vmem:[%s12080_s16 + $0x154] ss:$8 sps:$4 sm:$0xff]   ;;  %v10916_v54 = vld [vmem:[%s12080_s16 + $0x150] ss:$8 sps:$4 sm:$0xff]  }
0x1734   : > { %v10553_v59 = vpop.f32.mrf.mxu0  ;;  %v10547_v41 = vpop.f32.mrf.mxu1 }
0x1735   : > { %9483 = vmatmul.mubr.msk.bf16.vlgmr.msra.gmra.mxu1 %vm3211_vm6, %v7366_v57  ;;  %9492 = vmatmul.mubr.msk.bf16.vlgmr.msra.gmra.mxu0 %vm3211_vm6, %v7312_v55  ;;  %v10921_v55 = vld [vmem:[%s12080_s16 + $0x144] ss:$8 sps:$4 sm:$0xff]   ;;  %v10919_v57 = vld [vmem:[%s12080_s16 + $0x140] ss:$8 sps:$4 sm:$0xff]  }
0x1736   : > { %10556 = vmatpush3.bf16.msra.mxu1 %v11893_v33  ;;  %v7363_v61 = vpop.f32.mrf.mxu0  ;;  %10557 = vmatprep.mubr.msk.bf16.mxu1 %vm11024_vm3, %v11023_v18  ;;  %v7309_v62 = vpop.f32.mrf.mxu1 }
0x1737   : > { %10561 = vmatprep.subr.bf16.mxu1 %v11023_v18  ;;  %7651 = vmatpush1.bf16.msra.mxu0 %v10874_v58 }
0x1738   : > { %v10554_v1 = vpop.f32.mrf.mxu0  ;;  %v10548_v2 = vpop.f32.mrf.mxu1  ;;  %7652 = vmatprep.subr.bf16.mxu0 %v10879_v60  ;;  %7674 = vmatprep.mubr.bf16.mxu0 %v11021_v0 }
0x173b   : > { %7653 = vmatpush1.bf16.msra.mxu0 %v10877_v63 }
0x173c   : > { %7654 = vmatprep.subr.bf16.mxu0 %v10882_v5 }
0x173d   : > { %10558 = vmatmul.mubr.msk.bf16.vlgmr.msra.gmra.mxu1 %vm2988_vm4, %v9493_v3 }
0x173e   : > { %10562 = vmatpush3.bf16.msra.mxu1 %v11893_v33  ;;  %10563 = vmatprep.mubr.msk.bf16.mxu1 %vm11024_vm3, %v11023_v18 }
0x173f   : > { %7791 = vmatprep.subr.bf16.mxu1 %v10885_v6  ;;  %7655 = vmatpush1.bf16.msra.mxu0 %v10880_v7 }
0x1740   : > { %7656 = vmatprep.subr.bf16.mxu0 %v10888_v11 }
0x1743   : > { %7657 = vmatpush1.bf16.msra.mxu0 %v10886_v13 }
0x1744   : > { %10567 = vmatprep.subr.bf16.mxu0 %v11023_v18 }
0x1745   : > { %10564 = vmatmul.mubr.msk.bf16.vlgmr.msra.gmra.mxu1 %vm2988_vm4, %v9512_v4  ;;  %v10924_v4 = vld [vmem:[%s12080_s16 + $0x1b4] ss:$8 sps:$4 sm:$0xff]  }
0x1746   : > { %7815 = vmatprep.mubr.bf16.mxu1 %v11021_v0  ;;  %7792 = vmatpush1.bf16.msra.mxu1 %v10883_v9 }
0x1747   : > { %7793 = vmatprep.subr.bf16.mxu1 %v10891_v12 }
0x174a   : > { %7794 = vmatpush1.bf16.msra.mxu1 %v10889_v14 }
0x174b   : > { %7795 = vmatprep.subr.bf16.mxu1 %v10894_v53  ;;  %v9569_v53 = vld [vmem:[%s12081_s18 + $0xc] sm:$0x3] }
0x174e   : > { %7796 = vmatpush1.bf16.msra.mxu1 %v10892_v15 }
0x174f   : > { %7797 = vmatprep.subr.bf16.mxu1 %v10897_v16  ;;  %v10922_v16 = vld [vmem:[%s12080_s16 + $0x1b0] ss:$8 sps:$4 sm:$0xff]  }
0x1752   : > { %7798 = vmatpush1.bf16.msra.mxu1 %v10895_v56  ;;  %v10927_v56 = vld [vmem:[%s12080_s16 + $0x1a4] ss:$8 sps:$4 sm:$0xff]  }
0x1753   : > { %10573 = vmatprep.subr.bf16.mxu1 %v11023_v18 }
0x17f5   : > { %v7453_v17 = vpop.f32.mrf.mxu1  ;;  %v7537_v19 = vpop.f32.mrf.mxu0 }
0x17f6   : > { %v11951_v20 = vadd.f32 %v7537_v19, %v7453_v17 }
0x17f7   : > { %v7455_v21 = vpop.f32.mrf.mxu1  ;;  %v7539_v22 = vpop.f32.mrf.mxu0 }
0x17f8   : > { %v11953_v23 = vadd.f32 %v7539_v22, %v7455_v21  ;;  %v9588_v22 = vld [vmem:[%s12081_s18 + $0xe] sm:$0x3] }
0x17f9   : > { %v7457_v24 = vpop.f32.mrf.mxu1  ;;  %v7541_v25 = vpop.f32.mrf.mxu0 }
0x17fa   : > { %v10928_v24 = vld [vmem:[%s12080_s16 + $0x190] ss:$8 sps:$4 sm:$0xff]   ;;  %v10933_v25 = vld [vmem:[%s12080_s16 + $0x1f4] ss:$8 sps:$4 sm:$0xff]  }
0x17fb   : > { %v7458_v26 = vpop.f32.mrf.mxu1  ;;  %v7542_v27 = vpop.f32.mrf.mxu0 }
0x17fc   : > { %v10931_v26 = vld [vmem:[%s12080_s16 + $0x1f0] ss:$8 sps:$4 sm:$0xff]   ;;  %v10936_v27 = vld [vmem:[%s12080_s16 + $0x184] ss:$8 sps:$4 sm:$0xff]  }
0x17fd   : > { %v7583_v28 = vpop.f32.mrf.mxu1 }
0x17fe   : > { %v7589_v44 = vpack.c.bf16 %v7583_v28, %v7583_v28  ;;  %v10934_v28 = vld [vmem:[%s12080_s16 + $0x180] ss:$8 sps:$4 sm:$0xff]  }
0x17ff   : > { %v10559_v30 = vpop.f32.mrf.mxu1 }
0x1800   : > { %9511 = vmatmul.mubr.msk.bf16.vlgmr.msra.gmra.mxu0 %vm3211_vm6, %v7589_v44  ;;  %v10937_v44 = vld [vmem:[%s12080_s16 + $0x1e0] ss:$8 sps:$4 sm:$0xff]   ;;  %v10942_v30 = vld [vmem:[%s12080_s16 + $0x1d4] ss:$8 sps:$4 sm:$0xff]  }
0x1801   : > { %10568 = vmatpush3.bf16.msra.mxu0 %v11893_v33  ;;  %v7586_v31 = vpop.f32.mrf.mxu1  ;;  %10569 = vmatprep.mubr.msk.bf16.mxu0 %vm11024_vm3, %v11023_v18 }
0x1802   : > { %7932 = vmatprep.subr.bf16.mxu0 %v10900_v29  ;;  %v10939_v29 = vld [vmem:[%s12080_s16 + $0x1e4] ss:$8 sps:$4 sm:$0xff]   ;;  %v10940_v31 = vld [vmem:[%s12080_s16 + $0x1d0] ss:$8 sps:$4 sm:$0xff]  }
0x1803   : > { %v10560_v10 = vpop.f32.mrf.mxu1 }
0x1804   : > { %v10943_v10 = vld [vmem:[%s12080_s16 + $0x1c0] ss:$8 sps:$4 sm:$0xff]  }
0x1805   : > { %v7724_v32 = vpop.f32.mrf.mxu1 }
0x1806   : > { %v7730_v35 = vpack.c.bf16 %v7724_v32, %v7724_v32  ;;  %v10945_v32 = vld [vmem:[%s12080_s16 + $0x1c4] ss:$8 sps:$4 sm:$0xff]  }
0x1807   : > { %v10565_v39 = vpop.f32.mrf.mxu1 }
0x1808   : > { %9530 = vmatmul.mubr.msk.bf16.vlgmr.msra.gmra.mxu1 %vm3211_vm6, %v7730_v35  ;;  %10570 = vmatmul.mubr.msk.bf16.vlgmr.msra.gmra.mxu0 %vm2988_vm4, %v9531_v34 }
0x1809   : > { %10574 = vmatpush3.bf16.msra.mxu1 %v11893_v33  ;;  %10575 = vmatprep.mubr.msk.bf16.mxu1 %vm11024_vm3, %v11023_v18  ;;  %v7727_v40 = vpop.f32.mrf.mxu1 }
0x180a   : > { %7933 = vmatpush1.bf16.msra.mxu0 %v10898_v36  ;;  %7956 = vmatprep.mubr.bf16.mxu0 %v11021_v0 }
0x180b   : > { %7934 = vmatprep.subr.bf16.mxu0 %v10903_v38  ;;  %v10566_v43 = vpop.f32.mrf.mxu1  ;;  %8073 = vmatprep.subr.bf16.mxu1 %v10909_v46  ;;  %v10948_v46 = vld [vmem:[%s12080_s16 + $0x234] ss:$8 sps:$4 sm:$0xff]  }
0x180e   : > { %7935 = vmatpush1.bf16.msra.mxu0 %v10901_v42 }
0x180f   : > { %7936 = vmatprep.subr.bf16.mxu0 %v10906_v45 }
0x1810   : > { %10576 = vmatmul.mubr.msk.bf16.vlgmr.msra.gmra.mxu1 %vm2988_vm4, %v9550_v37 }
0x1811   : > { %8097 = vmatprep.mubr.bf16.mxu1 %v11021_v0  ;;  %8074 = vmatpush1.bf16.msra.mxu1 %v10907_v8 }
0x1812   : > { %7937 = vmatpush1.bf16.msra.mxu0 %v10904_v47  ;;  %8075 = vmatprep.subr.bf16.mxu1 %v10915_v49 }
0x1813   : > { %7938 = vmatprep.subr.bf16.mxu0 %v10912_v48 }
0x1815   : > { %8076 = vmatpush1.bf16.msra.mxu1 %v10913_v51 }
0x1816   : > { %7939 = vmatpush1.bf16.msra.mxu0 %v10910_v50  ;;  %8077 = vmatprep.subr.bf16.mxu1 %v10918_v52 }
0x1817   : > { %10579 = vmatprep.subr.bf16.mxu0 %v11023_v18 }
0x1819   : > { %8078 = vmatpush1.bf16.msra.mxu1 %v10916_v54 }
0x181a   : > { %8079 = vmatprep.subr.bf16.mxu1 %v10921_v55  ;;  %v9607_v55 = vld [vmem:[%s12081_s18 + $0x10] sm:$0x3] }
0x181d   : > { %8080 = vmatpush1.bf16.msra.mxu1 %v10919_v57  ;;  %v10946_v57 = vld [vmem:[%s12080_s16 + $0x230] ss:$8 sps:$4 sm:$0xff]  }
0x181e   : > { %10585 = vmatprep.subr.bf16.mxu1 %v11023_v18 }
0x18c0   : > { %v7676_v58 = vpop.f32.mrf.mxu0 }
0x18c1   : > { %v7683_v59 = vadd.f32 %v7676_v58, %v11951_v20  ;;  %v10925_v20 = vld [vmem:[%s12080_s16 + $0x1a0] ss:$8 sps:$4 sm:$0xff]  }
0x18c2   : > { %v7678_v41 = vpop.f32.mrf.mxu0 }
0x18c3   : > { %v7684_v60 = vadd.f32 %v7678_v41, %v11953_v23  ;;  %v10930_v23 = vld [vmem:[%s12080_s16 + $0x194] ss:$8 sps:$4 sm:$0xff]  }
0x18c4   : > { %v7680_v61 = vpop.f32.mrf.mxu0 }
0x18c6   : > { %v7681_v62 = vpop.f32.mrf.mxu0 }
0x18c7   : > { %v10954_v62 = vld [vmem:[%s12080_s16 + $0x214] ss:$8 sps:$4 sm:$0xff]  }
0x18c8   : > { %v7817_v63 = vpop.f32.mrf.mxu1  ;;  %v7865_v1 = vpop.f32.mrf.mxu0 }
0x18c9   : > { %v7824_v2 = vadd.f32 %v7817_v63, %v7683_v59  ;;  %v7871_v3 = vpack.c.bf16 %v7865_v1, %v7865_v1  ;;  %v10951_v59 = vld [vmem:[%s12080_s16 + $0x224] ss:$8 sps:$4 sm:$0xff]   ;;  %v10952_v63 = vld [vmem:[%s12080_s16 + $0x210] ss:$8 sps:$4 sm:$0xff]   ;;  %v10955_v1 = vld [vmem:[%s12080_s16 + $0x200] ss:$8 sps:$4 sm:$0xff]  }
0x18ca   : > { %v7819_v5 = vpop.f32.mrf.mxu1  ;;  %v10571_v6 = vpop.f32.mrf.mxu0 }
0x18cb   : > { %v7825_v7 = vadd.f32 %v7819_v5, %v7684_v60  ;;  %9549 = vmatmul.mubr.msk.bf16.vlgmr.msra.gmra.mxu0 %vm3211_vm6, %v7871_v3 }
0x18cc   : > { %10580 = vmatpush3.bf16.msra.mxu0 %v11893_v33  ;;  %v7821_v9 = vpop.f32.mrf.mxu1  ;;  %v7868_v11 = vpop.f32.mrf.mxu0  ;;  %10581 = vmatprep.mubr.msk.bf16.mxu0 %vm11024_vm3, %v11023_v18 }
0x18cd   : > { %8214 = vmatprep.subr.bf16.mxu0 %v10924_v4 }
0x18ce   : > { %v7822_v12 = vpop.f32.mrf.mxu1  ;;  %v10572_v13 = vpop.f32.mrf.mxu0 }
0x18d0   : > { %v8006_v14 = vpop.f32.mrf.mxu1 }
0x18d1   : > { %v8012_v15 = vpack.c.bf16 %v8006_v14, %v8006_v14 }
0x18d2   : > { %v10577_v17 = vpop.f32.mrf.mxu1 }
0x18d3   : > { %9568 = vmatmul.mubr.msk.bf16.vlgmr.msra.gmra.mxu1 %vm3211_vm6, %v8012_v15  ;;  %10582 = vmatmul.mubr.msk.bf16.vlgmr.msra.gmra.mxu0 %vm2988_vm4, %v9569_v53 }
0x18d4   : > { %10586 = vmatpush3.bf16.msra.mxu1 %v11893_v33  ;;  %10587 = vmatprep.mubr.msk.bf16.mxu1 %vm11024_vm3, %v11023_v18  ;;  %v8009_v19 = vpop.f32.mrf.mxu1 }
0x18d5   : > { %8215 = vmatpush1.bf16.msra.mxu0 %v10922_v16  ;;  %8238 = vmatprep.mubr.bf16.mxu0 %v11021_v0 }
0x18d6   : > { %8216 = vmatprep.subr.bf16.mxu0 %v10927_v56  ;;  %v10578_v21 = vpop.f32.mrf.mxu1  ;;  %8355 = vmatprep.subr.bf16.mxu1 %v10933_v25 }
0x18d9   : > { %8217 = vmatpush1.bf16.msra.mxu0 %v10925_v20 }
0x18da   : > { %8218 = vmatprep.subr.bf16.mxu0 %v10930_v23 }
0x18db   : > { %10588 = vmatmul.mubr.msk.bf16.vlgmr.msra.gmra.mxu1 %vm2988_vm4, %v9588_v22 }
0x18dc   : > { %8379 = vmatprep.mubr.bf16.mxu1 %v11021_v0  ;;  %8356 = vmatpush1.bf16.msra.mxu1 %v10931_v26 }
0x18dd   : > { %8219 = vmatpush1.bf16.msra.mxu0 %v10928_v24  ;;  %8357 = vmatprep.subr.bf16.mxu1 %v10939_v29 }
0x18de   : > { %8220 = vmatprep.subr.bf16.mxu0 %v10936_v27  ;;  %v8531_v27 = vld [vmem:[%s12082_s26] sm:$0x7] }
0x18e0   : > { %8358 = vmatpush1.bf16.msra.mxu1 %v10937_v44 }
0x18e1   : > { %8221 = vmatpush1.bf16.msra.mxu0 %v10934_v28  ;;  %8359 = vmatprep.subr.bf16.mxu1 %v10942_v30  ;;  %v8538_v28 = vpop.permute.xlu1 %8537 }
0x18e2   : > { %10591 = vmatprep.subr.bf16.mxu0 %v11023_v18 }
0x18e4   : > { %8360 = vmatpush1.bf16.msra.mxu1 %v10940_v31 }
0x18e5   : > { %8361 = vmatprep.subr.bf16.mxu1 %v10945_v32 }
0x18e8   : > { %8362 = vmatpush1.bf16.msra.mxu1 %v10943_v10 }
0x198b   : > { %v7958_v34 = vpop.f32.mrf.mxu0 }
0x198c   : > { %v7965_v35 = vadd.f32 %v7958_v34, %v7824_v2  ;;  %v10957_v2 = vld [vmem:[%s12080_s16 + $0x204] ss:$8 sps:$4 sm:$0xff]  }
0x198d   : > { %v7960_v36 = vpop.f32.mrf.mxu0 }
0x198e   : > { %v7966_v38 = vadd.f32 %v7960_v36, %v7825_v7 }
0x198f   : > { %v7962_v39 = vpop.f32.mrf.mxu0 }
0x1991   : > { %v7963_v40 = vpop.f32.mrf.mxu0 }
0x1993   : > { %v8099_v42 = vpop.f32.mrf.mxu1  ;;  %v8147_v43 = vpop.f32.mrf.mxu0 }
0x1994   : > { %v8106_v37 = vadd.f32 %v8099_v42, %v7965_v35  ;;  %v8153_v45 = vpack.c.bf16 %v8147_v43, %v8147_v43 }
0x1995   : > { %v8101_v47 = vpop.f32.mrf.mxu1  ;;  %v10583_v8 = vpop.f32.mrf.mxu0 }
0x1996   : > { %v8107_v48 = vadd.f32 %v8101_v47, %v7966_v38  ;;  %9587 = vmatmul.mubr.msk.bf16.vlgmr.msra.gmra.mxu0 %vm3211_vm6, %v8153_v45 }
0x1997   : > { %10592 = vmatpush3.bf16.msra.mxu0 %v11893_v33  ;;  %v8103_v49 = vpop.f32.mrf.mxu1  ;;  %v8150_v50 = vpop.f32.mrf.mxu0  ;;  %10593 = vmatprep.mubr.msk.bf16.mxu0 %vm11024_vm3, %v11023_v18  ;;  %v10949_v33 = vld [vmem:[%s12080_s16 + $0x220] ss:$8 sps:$4 sm:$0xff]  }
0x1998   : > { %8496 = vmatprep.subr.bf16.mxu0 %v10948_v46 }
0x1999   : > { %v8104_v51 = vpop.f32.mrf.mxu1  ;;  %v10584_v52 = vpop.f32.mrf.mxu0 }
0x199b   : > { %v8288_v54 = vpop.f32.mrf.mxu1 }
0x199c   : > { %v8294_v58 = vpack.c.bf16 %v8288_v54, %v8288_v54 }
0x199d   : > { %v10589_v41 = vpop.f32.mrf.mxu1 }
0x199e   : > { %9606 = vmatmul.mubr.msk.bf16.vlgmr.msra.gmra.mxu1 %vm3211_vm6, %v8294_v58  ;;  %10594 = vmatmul.mubr.msk.bf16.vlgmr.msra.gmra.mxu0 %vm2988_vm4, %v9607_v55 }
0x199f   : > { %8497 = vmatpush1.bf16.msra.mxu0 %v10946_v57  ;;  %v8291_v60 = vpop.f32.mrf.mxu1  ;;  %8520 = vmatprep.mubr.bf16.mxu0 %v11021_v0 }
0x19a0   : > { %8498 = vmatprep.subr.bf16.mxu0 %v10951_v59  ;;  %8614 = vmatprep.mubr.f32.mxu1 %v11023_v18 }
0x19a1   : > { %v10590_v61 = vpop.f32.mrf.mxu1 }
0x19a3   : > { %8499 = vmatpush1.bf16.msra.mxu0 %v10949_v33 }
0x19a4   : > { %8500 = vmatprep.subr.bf16.mxu0 %v10954_v62 }
0x19a7   : > { %8501 = vmatpush1.bf16.msra.mxu0 %v10952_v63 }
0x19a8   : > { %8502 = vmatprep.subr.bf16.mxu0 %v10957_v2 }
0x19ab   : > { %8503 = vmatpush1.bf16.msra.mxu0 %v10955_v1 }
0x1a56   : > { %v8240_v3 = vpop.f32.mrf.mxu0 }
0x1a57   : > { %v8247_v4 = vadd.f32 %v8240_v3, %v8106_v37 }
0x1a58   : > { %v8242_v5 = vpop.f32.mrf.mxu0 }
0x1a59   : > { %v8248_v6 = vadd.f32 %v8242_v5, %v8107_v48 }
0x1a5a   : > { %v8244_v7 = vpop.f32.mrf.mxu0 }
0x1a5c   : > { %v8245_v9 = vpop.f32.mrf.mxu0 }
0x1a5e   : > { %v8381_v0 = vpop.f32.mrf.mxu1  ;;  %v8429_v11 = vpop.f32.mrf.mxu0 }
0x1a5f   : > { %v8388_v12 = vadd.f32 %v8381_v0, %v8247_v4  ;;  %v8435_v18 = vpack.c.bf16 %v8429_v11, %v8429_v11 }
0x1a60   : > { %v8383_v13 = vpop.f32.mrf.mxu1  ;;  %v10595_v14 = vpop.f32.mrf.mxu0 }
0x1a61   : > { %v8389_v53 = vadd.f32 %v8383_v13, %v8248_v6  ;;  %9625 = vmatmul.mubr.msk.bf16.vlgmr.msra.gmra.mxu0 %vm3211_vm6, %v8435_v18 }
0x1a62   : > { %v8432_v15 = vpop.f32.mrf.mxu0  ;;  %v8385_v16 = vpop.f32.mrf.mxu1 }
0x1a64   : > { %v10596_v56 = vpop.f32.mrf.mxu0  ;;  %v8386_v17 = vpop.f32.mrf.mxu1 }
0x1b21   : > { %v8522_v19 = vpop.f32.mrf.mxu0 }
0x1b22   : > { %v8529_v20 = vadd.f32 %v8522_v19, %v8388_v12 }
0x1b23   : > { %v8524_v21 = vpop.f32.mrf.mxu0 }
0x1b24   : > { %v8530_v22 = vadd.f32 %v8524_v21, %v8389_v53  ;;  %v8532_v25 = vmul.f32 %v8529_v20, %v8529_v20 }
0x1b25   : > { %v8526_v23 = vpop.f32.mrf.mxu0 }
0x1b26   : > { %v8533_v24 = vmul.f32 %v8530_v22, %v8530_v22 }
0x1b27   : > { %v8527_v26 = vpop.f32.mrf.mxu0 }
0x1b28   : > { %9626 = vmatprep.subr.msk.mxu1 %vm8543_vm14, %v8533_v24 }
0x1b29   : > { %9627 = vmatpush1.msk.msra.mxu1 %vm8543_vm14, %v8532_v25 }
0x1b2a   : > { %9628 = vmatmul.mubr.msk.f32.vlgmr.msra.gmra.mxu1 %vm1012_vm2, %v8531_v27 }
0x1bea   : > { %v8616_v44 = vpop.f32.mrf.mxu1 }
0x1beb   : > { %v8617_v29 = vadd.f32 %v8616_v44, %v8538_v28 }
0x1bec   : > { %v8618_v30 = vpop.f32.mrf.mxu1 }
0x1bed   : > { %10970 = vrsqrt.f32 %v8617_v29  ;;  %v8619_v31 = vadd.f32 %v8618_v30, %v8538_v28  ;;  %vm8623_vm15 = vcmp.eq.f32.partialorder %v8617_v29, inf  ;;  %v8626_v34 = vand.u32 2147483648, %v8617_v29 }
0x1bee   : > { %vm8625_vm0 = vcmp.eq.f32.partialorder %v8617_v29, 0.0 }
0x1bef   : > { %10972 = vrsqrt.f32 %v8619_v31  ;;  %vm8630_vm1 = vcmp.eq.f32.partialorder %v8619_v31, inf  ;;  %v8633_v42 = vand.u32 2147483648, %v8619_v31  ;;  %vm8632_vm2 = vcmp.eq.f32.partialorder %v8619_v31, 0.0 }
0x1bfa   : > { %v10971_v10 = vpop.eup %10970 }
0x1bfb   : > { %v8622_v32 = vmul.f32 %v10971_v10, %v8617_v29 }
0x1bfc   : > { %v10973_v35 = vpop.eup %10972 }
0x1bfd   : > { %v8624_v36 = vsel %vm8623_vm15, %v8617_v29, %v8622_v32  ;;  %v8629_v39 = vmul.f32 %v10973_v35, %v8619_v31 }
0x1bfe   : > { %v8627_v38 = vsel %vm8625_vm0, %v8626_v34, %v8624_v36 }
0x1bff   : > { %v8635_v40 = vmul.f32 %v8627_v38, %v8529_v20  ;;  %v8631_v43 = vsel %vm8630_vm1, %v8619_v31, %v8629_v39 }
0x1c00   : > { %v8634_v45 = vsel %vm8632_vm2, %v8633_v42, %v8631_v43 }
0x1c01   : > { %v9629_v37 = vmul.f32 -1.442695, %v8635_v40  ;;  %v8636_v46 = vmul.f32 %v8634_v45, %v8530_v22 }
0x1c03   : > { %10974 = vpow2.f32 %v9629_v37  ;;  %v9630_v47 = vmul.f32 -1.442695, %v8636_v46 }
0x1c05   : > { %10976 = vpow2.f32 %v9630_v47 }
0x1c10   : > { %v10975_v8 = vpop.eup %10974 }
0x1c11   : > { %v8643_v48 = vadd.f32 1.0, %v10975_v8 }
0x1c12   : > { %v10977_v49 = vpop.eup %10976 }
0x1c13   : > { %v8644_v50 = vadd.f32 1.0, %v10977_v49  ;;  %10978 = vrcp.f32 %v8643_v48 }
0x1c15   : > { %10980 = vrcp.f32 %v8644_v50 }
0x1c20   : > { %v10979_v51 = vpop.eup %10978 }
0x1c22   : > { %v10981_v52 = vpop.eup %10980 }
0x1c23   : > { %v8651_v54 = vcombine.low %v10979_v51, %v10981_v52 }
0x1c25   : > { %8653 = vst [vmem:[%s1003_s10] sm:$0x77] %v8651_v54 }
0x1c26 PF: > { %s75_s22 = sadd.s32 1, %s10988_s22  }
0x1c27   : > { %p72_p4 = scmp.ge.s32.totalorder %s75_s22, 4  }
0x1c29   :  { %74 = sbr.rel (!%p72_p4) target bundleno = 48 (0x30), region = 309 }

</bundles_post_ra>
